<compile_context>
chip_gen: v7x
topology: tpu7x:2x2x1
jax: 0.10.0
libtpu: 0.0.40
codegen_flags: <defaults>
</compile_context>

<pallas_src>
import functools

import jax
import jax.numpy as jnp
from jax.experimental import pallas as pl
from jax.experimental.pallas import tpu as pltpu

LN_EPS = 1e-5        # torch.nn.LayerNorm default
NEG_SLOPE = 0.01     # F.leaky_relu default negative_slope
NUM_HEADS = 4
NUM_LAYERS = 6


def _layernorm(x, gamma, beta):
    mu = jnp.mean(x, axis=-1, keepdims=True)
    var = jnp.mean((x - mu) ** 2, axis=-1, keepdims=True)
    return (x - mu) * jax.lax.rsqrt(var + LN_EPS) * gamma + beta


# ----------------------------- fused Pallas kernel ---------------------------

def encoder_kernel(x_ref, upw_ref, upb_ref,
                   wqkv_ref, bqkv_ref, wo_ref, bo_ref,
                   g1_ref, be1_ref, w1_ref, b1_ref, w2_ref, b2_ref,
                   g2_ref, be2_ref,
                   w3_ref, lb_ref, lng_ref, lnb_ref,
                   o_ref, *, num_heads, num_layers):
    # One batch element per grid step; all weights resident in VMEM.
    x = x_ref[0].astype(jnp.float32)                      # (S, 2)

    # ---- upscale: Linear(2, D).  K=2 contraction as broadcast mul+add (VPU),
    # avoids an MXU matmul with a contraction dim of 2.
    upw = upw_ref[...]                                    # (2, D)
    y = x[:, 0:1] * upw[0:1, :] + x[:, 1:2] * upw[1:2, :] + upb_ref[...]   # (S, D)

    S, D = y.shape
    hd = D // num_heads
    scale = 1.0 / (hd ** 0.5)

    # ---- 6 post-norm TransformerEncoderLayers (statically unrolled).
    for l in range(num_layers):
        # Hoist all per-layer parameter reads (read each ref once per layer).
        wqkv = wqkv_ref[l]                                # (D, 3D)
        bqkv = bqkv_ref[l]                                # (1, 3D)
        wo_l = wo_ref[l]                                  # (H, hd, D)
        bo = bo_ref[l]                                    # (1, D)
        g1, be1 = g1_ref[l], be1_ref[l]                   # (1, D)
        w1, b1 = w1_ref[l], b1_ref[l]                     # (D, F), (1, F)
        w2, b2 = w2_ref[l], b2_ref[l]                     # (F, D), (1, D)
        g2, be2 = g2_ref[l], be2_ref[l]                   # (1, D)

        # Fused QKV projection: one MXU push per layer.
        qkv = jnp.dot(y, wqkv, preferred_element_type=jnp.float32) + bqkv  # (S, 3D)
        q = qkv[:, 0:D]
        k = qkv[:, D:2 * D]
        v = qkv[:, 2 * D:3 * D]

        # Multi-head self-attention; the output projection is folded into the
        # per-head loop: concat(head_h) @ Wo == sum_h head_h @ Wo[h].
        attn = jnp.zeros_like(y)                          # (S, D) f32
        for h in range(num_heads):
            lo, hi = h * hd, (h + 1) * hd
            qh, kh, vh = q[:, lo:hi], k[:, lo:hi], v[:, lo:hi]
            s_mat = jnp.dot(qh, kh.T, preferred_element_type=jnp.float32) * scale
            s_mat = s_mat - jnp.max(s_mat, axis=-1, keepdims=True)
            p = jnp.exp(s_mat)
            p = p * pl.reciprocal(jnp.sum(p, axis=-1, keepdims=True), approx=True)
            oh = jnp.dot(p, vh, preferred_element_type=jnp.float32)       # (S, hd)
            attn = attn + jnp.dot(oh, wo_l[h],
                                  preferred_element_type=jnp.float32)     # (S, D)
        attn = attn + bo
        # dropout -> identity (inference)

        y1 = _layernorm(y + attn, g1, be1)

        ff = jnp.dot(y1, w1, preferred_element_type=jnp.float32) + b1
        ff = jnp.where(ff >= 0.0, ff, NEG_SLOPE * ff)     # leaky_relu(0.01)
        ff = jnp.dot(ff, w2, preferred_element_type=jnp.float32) + b2

        y = _layernorm(y1 + ff, g2, be2)

    # ---- head: flatten + Linear(S*D, O) + LayerNorm(O), computed without an
    # in-kernel (S,D)->(1,S*D) relayout: y.flatten() @ W == sum_s y[s,:] @ W3[s].
    z = lb_ref[...]                                       # (1, O)
    for s in range(S):
        z = z + jnp.dot(y[s:s + 1, :], w3_ref[s], preferred_element_type=jnp.float32)
    o_ref[0] = _layernorm(z, lng_ref[...], lnb_ref[...]).astype(o_ref.dtype)


def _full_spec(arr):
    zeros = (0,) * arr.ndim
    return pl.BlockSpec(arr.shape, lambda i, zeros=zeros: zeros)


def encoder_forward_pallas(x, params, num_heads=NUM_HEADS):
    B = x.shape[0]
    x3 = x.reshape(B, -1, 2)                              # x.view(B, -1, 2)
    S = x3.shape[1]
    D = params["upscale_w"].shape[1]
    O = params["lin2_w"].shape[1]
    L = params["wqkv"].shape[0]
    assert D % num_heads == 0
    hd = D // num_heads

    # Host-side weight re-layouts (cheap, done once outside the kernel).
    wo_split = params["wo"].reshape(L, num_heads, hd, D)  # per-head Wo slabs
    w3 = params["lin2_w"].reshape(S, D, O)                # per-position head weights

    weights = (params["upscale_w"], params["upscale_b"],
               params["wqkv"], params["bqkv"], wo_split, params["bo"],
               params["g1"], params["be1"], params["w1"], params["b1"],
               params["w2"], params["b2"], params["g2"], params["be2"],
               w3, params["lin2_b"], params["ln_g"], params["ln_b"])

    out = pl.pallas_call(
        functools.partial(encoder_kernel, num_heads=num_heads, num_layers=L),
        out_shape=jax.ShapeDtypeStruct((B, 1, O), jnp.float32),
        grid=(B,),
        in_specs=[pl.BlockSpec((1, S, 2), lambda i: (i, 0, 0))]
                 + [_full_spec(w) for w in weights],
        out_specs=pl.BlockSpec((1, 1, O), lambda i: (i, 0, 0)),
        compiler_params=pltpu.CompilerParams(
            dimension_semantics=("parallel",),
            vmem_limit_bytes=16 * 1024 * 1024),
    )(x3, *weights)
    return out.reshape(B, O)


# ----------------------------- parameters ------------------------------------

def init_encoder_params(key, latent, output_shape, len_seq, num_layers=NUM_LAYERS):
    # All linear weights stored pre-transposed as (in, out); biases as (1, out).
    # Per-layer weights are stacked along a leading layer dim.
    D = latent
    F = latent  # dim_feedforward = latentShape
    it = iter(jax.random.split(key, 16))

    def rnd(shape):
        return jax.random.normal(next(it), shape, jnp.float32) * 0.05

    return {
        "upscale_w": rnd((2, D)),
        "upscale_b": rnd((1, D)),
        "wqkv": rnd((num_layers, D, 3 * D)),
        "bqkv": rnd((num_layers, 1, 3 * D)),
        "wo":   rnd((num_layers, D, D)),
        "bo":   rnd((num_layers, 1, D)),
        "g1":   jnp.ones((num_layers, 1, D), jnp.float32),
        "be1":  jnp.zeros((num_layers, 1, D), jnp.float32),
        "w1":   rnd((num_layers, D, F)),
        "b1":   rnd((num_layers, 1, F)),
        "w2":   rnd((num_layers, F, D)),
        "b2":   rnd((num_layers, 1, D)),
        "g2":   jnp.ones((num_layers, 1, D), jnp.float32),
        "be2":  jnp.zeros((num_layers, 1, D), jnp.float32),
        "lin2_w": rnd((len_seq * D, output_shape)),
        "lin2_b": rnd((1, output_shape)),
        "ln_g": jnp.ones((1, output_shape), jnp.float32),
        "ln_b": jnp.zeros((1, output_shape), jnp.float32),
    }


# ----------------------------- pure-JAX reference -----------------------------

def encoder_forward_ref(x, params, num_heads=NUM_HEADS):
    B = x.shape[0]
    y = x.reshape(B, -1, 2).astype(jnp.float32)
    y = y @ params["upscale_w"] + params["upscale_b"]
    L = params["wqkv"].shape[0]
    D = y.shape[-1]
    hd = D // num_heads
    scale = 1.0 / (hd ** 0.5)
    for l in range(L):
        qkv = y @ params["wqkv"][l] + params["bqkv"][l]
        q, k, v = qkv[..., :D], qkv[..., D:2 * D], qkv[..., 2 * D:]

        def split(t):
            return t.reshape(B, -1, num_heads, hd).transpose(0, 2, 1, 3)

        qh, kh, vh = split(q), split(k), split(v)
        s = jnp.einsum("bhqd,bhkd->bhqk", qh, kh) * scale
        p = jax.nn.softmax(s, axis=-1)
        o = jnp.einsum("bhqk,bhkd->bhqd", p, vh).transpose(0, 2, 1, 3).reshape(y.shape)
        attn = o @ params["wo"][l] + params["bo"][l]
        y1 = _layernorm(y + attn, params["g1"][l], params["be1"][l])
        ff = y1 @ params["w1"][l] + params["b1"][l]
        ff = jnp.where(ff >= 0.0, ff, NEG_SLOPE * ff)
        ff = ff @ params["w2"][l] + params["b2"][l]
        y = _layernorm(y1 + ff, params["g2"][l], params["be2"][l])
    y = y.reshape(B, -1)
    z = y @ params["lin2_w"] + params["lin2_b"]
    return _layernorm(z, params["ln_g"], params["ln_b"])


# ----------------------------- main -------------------------------------------

if __name__ == "__main__":
    B, LEN_SEQ, LATENT, OUT = 2, 8, 32, 16      # latentShape % nhead == 0
    key = jax.random.PRNGKey(0)
    pkey, xkey = jax.random.split(key)
    params = init_encoder_params(pkey, LATENT, OUT, LEN_SEQ)
    x = jax.random.normal(xkey, (B, LEN_SEQ, 2), jnp.float32)

    out = jax.block_until_ready(encoder_forward_pallas(x, params))

    with jax.default_matmul_precision("highest"):
        ref = jax.block_until_ready(encoder_forward_ref(x, params))

    assert out.shape == (B, OUT), out.shape
    assert bool(jnp.all(jnp.isfinite(out)))
    assert bool(jnp.allclose(out, ref, atol=1e-2, rtol=1e-2)), (out, ref)
    print("KERNEL_OK")
</pallas_src>

<mosaic_0001>
module attributes {stable_mosaic.version = 11 : i64} {
  func.func @encoder_kernel(%arg0: i32, %arg1: memref<1x8x2xf32, #tpu.memory_space<vmem>>, %arg2: memref<2x32xf32, #tpu.memory_space<vmem>>, %arg3: memref<1x32xf32, #tpu.memory_space<vmem>>, %arg4: memref<6x32x96xf32, #tpu.memory_space<vmem>>, %arg5: memref<6x1x96xf32, #tpu.memory_space<vmem>>, %arg6: memref<6x4x8x32xf32, #tpu.memory_space<vmem>>, %arg7: memref<6x1x32xf32, #tpu.memory_space<vmem>>, %arg8: memref<6x1x32xf32, #tpu.memory_space<vmem>>, %arg9: memref<6x1x32xf32, #tpu.memory_space<vmem>>, %arg10: memref<6x32x32xf32, #tpu.memory_space<vmem>>, %arg11: memref<6x1x32xf32, #tpu.memory_space<vmem>>, %arg12: memref<6x32x32xf32, #tpu.memory_space<vmem>>, %arg13: memref<6x1x32xf32, #tpu.memory_space<vmem>>, %arg14: memref<6x1x32xf32, #tpu.memory_space<vmem>>, %arg15: memref<6x1x32xf32, #tpu.memory_space<vmem>>, %arg16: memref<8x32x16xf32, #tpu.memory_space<vmem>>, %arg17: memref<1x16xf32, #tpu.memory_space<vmem>>, %arg18: memref<1x16xf32, #tpu.memory_space<vmem>>, %arg19: memref<1x16xf32, #tpu.memory_space<vmem>>, %arg20: memref<1x1x16xf32, #tpu.memory_space<vmem>>) attributes {dimension_semantics = [#tpu.dimension_semantics<parallel>], iteration_bounds = array<i64: 2>, scalar_prefetch = 0 : i64, scratch_operands = 0 : i64, tpu.core_type = #tpu.core_type<tc>, window_params = [{transform_indices = @transform_0, window_bounds = array<i64: 1, 8, 2>}, {pipeline_mode = #tpu.pipeline_mode<synchronous>, transform_indices = @transform_1, window_bounds = array<i64: 2, 32>}, {pipeline_mode = #tpu.pipeline_mode<synchronous>, transform_indices = @transform_2, window_bounds = array<i64: 1, 32>}, {pipeline_mode = #tpu.pipeline_mode<synchronous>, transform_indices = @transform_3, window_bounds = array<i64: 6, 32, 96>}, {pipeline_mode = #tpu.pipeline_mode<synchronous>, transform_indices = @transform_4, window_bounds = array<i64: 6, 1, 96>}, {pipeline_mode = #tpu.pipeline_mode<synchronous>, transform_indices = @transform_5, window_bounds = array<i64: 6, 4, 8, 32>}, {pipeline_mode = #tpu.pipeline_mode<synchronous>, transform_indices = @transform_6, window_bounds = array<i64: 6, 1, 32>}, {pipeline_mode = #tpu.pipeline_mode<synchronous>, transform_indices = @transform_7, window_bounds = array<i64: 6, 1, 32>}, {pipeline_mode = #tpu.pipeline_mode<synchronous>, transform_indices = @transform_8, window_bounds = array<i64: 6, 1, 32>}, {pipeline_mode = #tpu.pipeline_mode<synchronous>, transform_indices = @transform_9, window_bounds = array<i64: 6, 32, 32>}, {pipeline_mode = #tpu.pipeline_mode<synchronous>, transform_indices = @transform_10, window_bounds = array<i64: 6, 1, 32>}, {pipeline_mode = #tpu.pipeline_mode<synchronous>, transform_indices = @transform_11, window_bounds = array<i64: 6, 32, 32>}, {pipeline_mode = #tpu.pipeline_mode<synchronous>, transform_indices = @transform_12, window_bounds = array<i64: 6, 1, 32>}, {pipeline_mode = #tpu.pipeline_mode<synchronous>, transform_indices = @transform_13, window_bounds = array<i64: 6, 1, 32>}, {pipeline_mode = #tpu.pipeline_mode<synchronous>, transform_indices = @transform_14, window_bounds = array<i64: 6, 1, 32>}, {pipeline_mode = #tpu.pipeline_mode<synchronous>, transform_indices = @transform_15, window_bounds = array<i64: 8, 32, 16>}, {pipeline_mode = #tpu.pipeline_mode<synchronous>, transform_indices = @transform_16, window_bounds = array<i64: 1, 16>}, {pipeline_mode = #tpu.pipeline_mode<synchronous>, transform_indices = @transform_17, window_bounds = array<i64: 1, 16>}, {pipeline_mode = #tpu.pipeline_mode<synchronous>, transform_indices = @transform_18, window_bounds = array<i64: 1, 16>}, {transform_indices = @transform_19, window_bounds = array<i64: 1, 1, 16>}]} {
    %c0 = arith.constant 0 : index
    %c0_0 = arith.constant 0 : index
    %c0_1 = arith.constant 0 : index
    %0 = vector.load %arg1[%c0, %c0_0, %c0_1] : memref<1x8x2xf32, #tpu.memory_space<vmem>>, vector<1x8x2xf32>
    %1 = vector.shape_cast %0 : vector<1x8x2xf32> to vector<8x2xf32>
    %c0_2 = arith.constant 0 : index
    %c0_3 = arith.constant 0 : index
    %2 = vector.load %arg2[%c0_2, %c0_3] : memref<2x32xf32, #tpu.memory_space<vmem>>, vector<2x32xf32>
    %3 = vector.extract_strided_slice %1 {offsets = [0, 0], sizes = [8, 1], strides = [1, 1]} : vector<8x2xf32> to vector<8x1xf32>
    %4 = vector.extract_strided_slice %2 {offsets = [0, 0], sizes = [1, 32], strides = [1, 1]} : vector<2x32xf32> to vector<1x32xf32>
    %5 = vector.broadcast %3 : vector<8x1xf32> to vector<8x32xf32>
    %6 = vector.broadcast %4 : vector<1x32xf32> to vector<8x32xf32>
    %7 = arith.mulf %5, %6 : vector<8x32xf32>
    %8 = vector.extract_strided_slice %1 {offsets = [0, 1], sizes = [8, 1], strides = [1, 1]} : vector<8x2xf32> to vector<8x1xf32>
    %9 = vector.extract_strided_slice %2 {offsets = [1, 0], sizes = [1, 32], strides = [1, 1]} : vector<2x32xf32> to vector<1x32xf32>
    %10 = vector.broadcast %8 : vector<8x1xf32> to vector<8x32xf32>
    %11 = vector.broadcast %9 : vector<1x32xf32> to vector<8x32xf32>
    %12 = arith.mulf %10, %11 : vector<8x32xf32>
    %13 = arith.addf %7, %12 : vector<8x32xf32>
    %c0_4 = arith.constant 0 : index
    %c0_5 = arith.constant 0 : index
    %14 = vector.load %arg3[%c0_4, %c0_5] : memref<1x32xf32, #tpu.memory_space<vmem>>, vector<1x32xf32>
    %15 = vector.broadcast %14 : vector<1x32xf32> to vector<8x32xf32>
    %16 = arith.addf %13, %15 : vector<8x32xf32>
    %c0_6 = arith.constant 0 : index
    %c0_7 = arith.constant 0 : index
    %c0_8 = arith.constant 0 : index
    %17 = vector.load %arg4[%c0_6, %c0_7, %c0_8] : memref<6x32x96xf32, #tpu.memory_space<vmem>>, vector<1x32x96xf32>
    %18 = vector.shape_cast %17 : vector<1x32x96xf32> to vector<32x96xf32>
    %c0_9 = arith.constant 0 : index
    %c0_10 = arith.constant 0 : index
    %c0_11 = arith.constant 0 : index
    %19 = vector.load %arg5[%c0_9, %c0_10, %c0_11] : memref<6x1x96xf32, #tpu.memory_space<vmem>>, vector<1x1x96xf32>
    %20 = vector.shape_cast %19 : vector<1x1x96xf32> to vector<1x96xf32>
    %c0_12 = arith.constant 0 : index
    %c0_13 = arith.constant 0 : index
    %c0_14 = arith.constant 0 : index
    %c0_15 = arith.constant 0 : index
    %21 = vector.load %arg6[%c0_12, %c0_13, %c0_14, %c0_15] : memref<6x4x8x32xf32, #tpu.memory_space<vmem>>, vector<1x4x8x32xf32>
    %22 = vector.shape_cast %21 : vector<1x4x8x32xf32> to vector<4x8x32xf32>
    %c0_16 = arith.constant 0 : index
    %c0_17 = arith.constant 0 : index
    %c0_18 = arith.constant 0 : index
    %23 = vector.load %arg7[%c0_16, %c0_17, %c0_18] : memref<6x1x32xf32, #tpu.memory_space<vmem>>, vector<1x1x32xf32>
    %24 = vector.shape_cast %23 : vector<1x1x32xf32> to vector<1x32xf32>
    %c0_19 = arith.constant 0 : index
    %c0_20 = arith.constant 0 : index
    %c0_21 = arith.constant 0 : index
    %25 = vector.load %arg8[%c0_19, %c0_20, %c0_21] : memref<6x1x32xf32, #tpu.memory_space<vmem>>, vector<1x1x32xf32>
    %26 = vector.shape_cast %25 : vector<1x1x32xf32> to vector<1x32xf32>
    %c0_22 = arith.constant 0 : index
    %c0_23 = arith.constant 0 : index
    %c0_24 = arith.constant 0 : index
    %27 = vector.load %arg9[%c0_22, %c0_23, %c0_24] : memref<6x1x32xf32, #tpu.memory_space<vmem>>, vector<1x1x32xf32>
    %28 = vector.shape_cast %27 : vector<1x1x32xf32> to vector<1x32xf32>
    %c0_25 = arith.constant 0 : index
    %c0_26 = arith.constant 0 : index
    %c0_27 = arith.constant 0 : index
    %29 = vector.load %arg10[%c0_25, %c0_26, %c0_27] : memref<6x32x32xf32, #tpu.memory_space<vmem>>, vector<1x32x32xf32>
    %30 = vector.shape_cast %29 : vector<1x32x32xf32> to vector<32x32xf32>
    %c0_28 = arith.constant 0 : index
    %c0_29 = arith.constant 0 : index
    %c0_30 = arith.constant 0 : index
    %31 = vector.load %arg11[%c0_28, %c0_29, %c0_30] : memref<6x1x32xf32, #tpu.memory_space<vmem>>, vector<1x1x32xf32>
    %32 = vector.shape_cast %31 : vector<1x1x32xf32> to vector<1x32xf32>
    %c0_31 = arith.constant 0 : index
    %c0_32 = arith.constant 0 : index
    %c0_33 = arith.constant 0 : index
    %33 = vector.load %arg12[%c0_31, %c0_32, %c0_33] : memref<6x32x32xf32, #tpu.memory_space<vmem>>, vector<1x32x32xf32>
    %34 = vector.shape_cast %33 : vector<1x32x32xf32> to vector<32x32xf32>
    %c0_34 = arith.constant 0 : index
    %c0_35 = arith.constant 0 : index
    %c0_36 = arith.constant 0 : index
    %35 = vector.load %arg13[%c0_34, %c0_35, %c0_36] : memref<6x1x32xf32, #tpu.memory_space<vmem>>, vector<1x1x32xf32>
    %36 = vector.shape_cast %35 : vector<1x1x32xf32> to vector<1x32xf32>
    %c0_37 = arith.constant 0 : index
    %c0_38 = arith.constant 0 : index
    %c0_39 = arith.constant 0 : index
    %37 = vector.load %arg14[%c0_37, %c0_38, %c0_39] : memref<6x1x32xf32, #tpu.memory_space<vmem>>, vector<1x1x32xf32>
    %38 = vector.shape_cast %37 : vector<1x1x32xf32> to vector<1x32xf32>
    %c0_40 = arith.constant 0 : index
    %c0_41 = arith.constant 0 : index
    %c0_42 = arith.constant 0 : index
    %39 = vector.load %arg15[%c0_40, %c0_41, %c0_42] : memref<6x1x32xf32, #tpu.memory_space<vmem>>, vector<1x1x32xf32>
    %40 = vector.shape_cast %39 : vector<1x1x32xf32> to vector<1x32xf32>
    %cst = arith.constant dense<0.000000e+00> : vector<8x96xf32>
    %41 = tpu.matmul %16, %18, %cst {dimension_numbers = #tpu.dot_dimension_numbers<[1], [0], [0], [1], [0, 0, 1, 1], [], []>} : vector<8x32xf32>, vector<32x96xf32>, vector<8x96xf32> -> vector<8x96xf32>
    %42 = vector.broadcast %20 : vector<1x96xf32> to vector<8x96xf32>
    %43 = arith.addf %41, %42 : vector<8x96xf32>
    %44 = vector.extract_strided_slice %43 {offsets = [0, 0], sizes = [8, 32], strides = [1, 1]} : vector<8x96xf32> to vector<8x32xf32>
    %45 = vector.extract_strided_slice %43 {offsets = [0, 32], sizes = [8, 32], strides = [1, 1]} : vector<8x96xf32> to vector<8x32xf32>
    %46 = vector.extract_strided_slice %43 {offsets = [0, 64], sizes = [8, 32], strides = [1, 1]} : vector<8x96xf32> to vector<8x32xf32>
    %cst_43 = arith.constant 0.000000e+00 : f32
    %47 = vector.broadcast %cst_43 : f32 to vector<8x32xf32>
    %48 = vector.extract_strided_slice %44 {offsets = [0, 0], sizes = [8, 8], strides = [1, 1]} : vector<8x32xf32> to vector<8x8xf32>
    %49 = vector.extract_strided_slice %45 {offsets = [0, 0], sizes = [8, 8], strides = [1, 1]} : vector<8x32xf32> to vector<8x8xf32>
    %50 = vector.extract_strided_slice %46 {offsets = [0, 0], sizes = [8, 8], strides = [1, 1]} : vector<8x32xf32> to vector<8x8xf32>
    %51 = tpu.transpose %49, [1, 0] : vector<8x8xf32> -> vector<8x8xf32>
    %cst_44 = arith.constant dense<0.000000e+00> : vector<8x8xf32>
    %52 = tpu.matmul %48, %51, %cst_44 {dimension_numbers = #tpu.dot_dimension_numbers<[1], [0], [0], [1], [0, 0, 1, 1], [], []>} : vector<8x8xf32>, vector<8x8xf32>, vector<8x8xf32> -> vector<8x8xf32>
    %cst_45 = arith.constant 0.353553385 : f32
    %53 = vector.broadcast %cst_45 : f32 to vector<8x8xf32>
    %54 = arith.mulf %52, %53 : vector<8x8xf32>
    %cst_46 = arith.constant dense<0xFF800000> : vector<8xf32>
    %55 = vector.multi_reduction <maximumf>, %54, %cst_46 [1] : vector<8x8xf32> to vector<8xf32>
    %56 = vector.shape_cast %55 : vector<8xf32> to vector<8x1xf32>
    %57 = vector.broadcast %56 : vector<8x1xf32> to vector<8x8xf32>
    %58 = arith.subf %54, %57 : vector<8x8xf32>
    %59 = math.exp %58 : vector<8x8xf32>
    %cst_47 = arith.constant dense<0.000000e+00> : vector<8xf32>
    %60 = vector.multi_reduction <add>, %59, %cst_47 [1] : vector<8x8xf32> to vector<8xf32>
    %61 = vector.shape_cast %60 : vector<8xf32> to vector<8x1xf32>
    %62 = tpu.reciprocal %61 {approx = true} : vector<8x1xf32> -> vector<8x1xf32>
    %63 = vector.broadcast %62 : vector<8x1xf32> to vector<8x8xf32>
    %64 = arith.mulf %59, %63 : vector<8x8xf32>
    %cst_48 = arith.constant dense<0.000000e+00> : vector<8x8xf32>
    %65 = tpu.matmul %64, %50, %cst_48 {dimension_numbers = #tpu.dot_dimension_numbers<[1], [0], [0], [1], [0, 0, 1, 1], [], []>} : vector<8x8xf32>, vector<8x8xf32>, vector<8x8xf32> -> vector<8x8xf32>
    %66 = vector.extract_strided_slice %22 {offsets = [0, 0, 0], sizes = [1, 8, 32], strides = [1, 1, 1]} : vector<4x8x32xf32> to vector<1x8x32xf32>
    %67 = vector.shape_cast %66 : vector<1x8x32xf32> to vector<8x32xf32>
    %cst_49 = arith.constant dense<0.000000e+00> : vector<8x32xf32>
    %68 = tpu.matmul %65, %67, %cst_49 {dimension_numbers = #tpu.dot_dimension_numbers<[1], [0], [0], [1], [0, 0, 1, 1], [], []>} : vector<8x8xf32>, vector<8x32xf32>, vector<8x32xf32> -> vector<8x32xf32>
    %69 = arith.addf %47, %68 : vector<8x32xf32>
    %70 = vector.extract_strided_slice %44 {offsets = [0, 8], sizes = [8, 8], strides = [1, 1]} : vector<8x32xf32> to vector<8x8xf32>
    %71 = vector.extract_strided_slice %45 {offsets = [0, 8], sizes = [8, 8], strides = [1, 1]} : vector<8x32xf32> to vector<8x8xf32>
    %72 = vector.extract_strided_slice %46 {offsets = [0, 8], sizes = [8, 8], strides = [1, 1]} : vector<8x32xf32> to vector<8x8xf32>
    %73 = tpu.transpose %71, [1, 0] : vector<8x8xf32> -> vector<8x8xf32>
    %cst_50 = arith.constant dense<0.000000e+00> : vector<8x8xf32>
    %74 = tpu.matmul %70, %73, %cst_50 {dimension_numbers = #tpu.dot_dimension_numbers<[1], [0], [0], [1], [0, 0, 1, 1], [], []>} : vector<8x8xf32>, vector<8x8xf32>, vector<8x8xf32> -> vector<8x8xf32>
    %cst_51 = arith.constant 0.353553385 : f32
    %75 = vector.broadcast %cst_51 : f32 to vector<8x8xf32>
    %76 = arith.mulf %74, %75 : vector<8x8xf32>
    %cst_52 = arith.constant dense<0xFF800000> : vector<8xf32>
    %77 = vector.multi_reduction <maximumf>, %76, %cst_52 [1] : vector<8x8xf32> to vector<8xf32>
    %78 = vector.shape_cast %77 : vector<8xf32> to vector<8x1xf32>
    %79 = vector.broadcast %78 : vector<8x1xf32> to vector<8x8xf32>
    %80 = arith.subf %76, %79 : vector<8x8xf32>
    %81 = math.exp %80 : vector<8x8xf32>
    %cst_53 = arith.constant dense<0.000000e+00> : vector<8xf32>
    %82 = vector.multi_reduction <add>, %81, %cst_53 [1] : vector<8x8xf32> to vector<8xf32>
    %83 = vector.shape_cast %82 : vector<8xf32> to vector<8x1xf32>
    %84 = tpu.reciprocal %83 {approx = true} : vector<8x1xf32> -> vector<8x1xf32>
    %85 = vector.broadcast %84 : vector<8x1xf32> to vector<8x8xf32>
    %86 = arith.mulf %81, %85 : vector<8x8xf32>
    %cst_54 = arith.constant dense<0.000000e+00> : vector<8x8xf32>
    %87 = tpu.matmul %86, %72, %cst_54 {dimension_numbers = #tpu.dot_dimension_numbers<[1], [0], [0], [1], [0, 0, 1, 1], [], []>} : vector<8x8xf32>, vector<8x8xf32>, vector<8x8xf32> -> vector<8x8xf32>
    %88 = vector.extract_strided_slice %22 {offsets = [1, 0, 0], sizes = [1, 8, 32], strides = [1, 1, 1]} : vector<4x8x32xf32> to vector<1x8x32xf32>
    %89 = vector.shape_cast %88 : vector<1x8x32xf32> to vector<8x32xf32>
    %cst_55 = arith.constant dense<0.000000e+00> : vector<8x32xf32>
    %90 = tpu.matmul %87, %89, %cst_55 {dimension_numbers = #tpu.dot_dimension_numbers<[1], [0], [0], [1], [0, 0, 1, 1], [], []>} : vector<8x8xf32>, vector<8x32xf32>, vector<8x32xf32> -> vector<8x32xf32>
    %91 = arith.addf %69, %90 : vector<8x32xf32>
    %92 = vector.extract_strided_slice %44 {offsets = [0, 16], sizes = [8, 8], strides = [1, 1]} : vector<8x32xf32> to vector<8x8xf32>
    %93 = vector.extract_strided_slice %45 {offsets = [0, 16], sizes = [8, 8], strides = [1, 1]} : vector<8x32xf32> to vector<8x8xf32>
    %94 = vector.extract_strided_slice %46 {offsets = [0, 16], sizes = [8, 8], strides = [1, 1]} : vector<8x32xf32> to vector<8x8xf32>
    %95 = tpu.transpose %93, [1, 0] : vector<8x8xf32> -> vector<8x8xf32>
    %cst_56 = arith.constant dense<0.000000e+00> : vector<8x8xf32>
    %96 = tpu.matmul %92, %95, %cst_56 {dimension_numbers = #tpu.dot_dimension_numbers<[1], [0], [0], [1], [0, 0, 1, 1], [], []>} : vector<8x8xf32>, vector<8x8xf32>, vector<8x8xf32> -> vector<8x8xf32>
    %cst_57 = arith.constant 0.353553385 : f32
    %97 = vector.broadcast %cst_57 : f32 to vector<8x8xf32>
    %98 = arith.mulf %96, %97 : vector<8x8xf32>
    %cst_58 = arith.constant dense<0xFF800000> : vector<8xf32>
    %99 = vector.multi_reduction <maximumf>, %98, %cst_58 [1] : vector<8x8xf32> to vector<8xf32>
    %100 = vector.shape_cast %99 : vector<8xf32> to vector<8x1xf32>
    %101 = vector.broadcast %100 : vector<8x1xf32> to vector<8x8xf32>
    %102 = arith.subf %98, %101 : vector<8x8xf32>
    %103 = math.exp %102 : vector<8x8xf32>
    %cst_59 = arith.constant dense<0.000000e+00> : vector<8xf32>
    %104 = vector.multi_reduction <add>, %103, %cst_59 [1] : vector<8x8xf32> to vector<8xf32>
    %105 = vector.shape_cast %104 : vector<8xf32> to vector<8x1xf32>
    %106 = tpu.reciprocal %105 {approx = true} : vector<8x1xf32> -> vector<8x1xf32>
    %107 = vector.broadcast %106 : vector<8x1xf32> to vector<8x8xf32>
    %108 = arith.mulf %103, %107 : vector<8x8xf32>
    %cst_60 = arith.constant dense<0.000000e+00> : vector<8x8xf32>
    %109 = tpu.matmul %108, %94, %cst_60 {dimension_numbers = #tpu.dot_dimension_numbers<[1], [0], [0], [1], [0, 0, 1, 1], [], []>} : vector<8x8xf32>, vector<8x8xf32>, vector<8x8xf32> -> vector<8x8xf32>
    %110 = vector.extract_strided_slice %22 {offsets = [2, 0, 0], sizes = [1, 8, 32], strides = [1, 1, 1]} : vector<4x8x32xf32> to vector<1x8x32xf32>
    %111 = vector.shape_cast %110 : vector<1x8x32xf32> to vector<8x32xf32>
    %cst_61 = arith.constant dense<0.000000e+00> : vector<8x32xf32>
    %112 = tpu.matmul %109, %111, %cst_61 {dimension_numbers = #tpu.dot_dimension_numbers<[1], [0], [0], [1], [0, 0, 1, 1], [], []>} : vector<8x8xf32>, vector<8x32xf32>, vector<8x32xf32> -> vector<8x32xf32>
    %113 = arith.addf %91, %112 : vector<8x32xf32>
    %114 = vector.extract_strided_slice %44 {offsets = [0, 24], sizes = [8, 8], strides = [1, 1]} : vector<8x32xf32> to vector<8x8xf32>
    %115 = vector.extract_strided_slice %45 {offsets = [0, 24], sizes = [8, 8], strides = [1, 1]} : vector<8x32xf32> to vector<8x8xf32>
    %116 = vector.extract_strided_slice %46 {offsets = [0, 24], sizes = [8, 8], strides = [1, 1]} : vector<8x32xf32> to vector<8x8xf32>
    %117 = tpu.transpose %115, [1, 0] : vector<8x8xf32> -> vector<8x8xf32>
    %cst_62 = arith.constant dense<0.000000e+00> : vector<8x8xf32>
    %118 = tpu.matmul %114, %117, %cst_62 {dimension_numbers = #tpu.dot_dimension_numbers<[1], [0], [0], [1], [0, 0, 1, 1], [], []>} : vector<8x8xf32>, vector<8x8xf32>, vector<8x8xf32> -> vector<8x8xf32>
    %cst_63 = arith.constant 0.353553385 : f32
    %119 = vector.broadcast %cst_63 : f32 to vector<8x8xf32>
    %120 = arith.mulf %118, %119 : vector<8x8xf32>
    %cst_64 = arith.constant dense<0xFF800000> : vector<8xf32>
    %121 = vector.multi_reduction <maximumf>, %120, %cst_64 [1] : vector<8x8xf32> to vector<8xf32>
    %122 = vector.shape_cast %121 : vector<8xf32> to vector<8x1xf32>
    %123 = vector.broadcast %122 : vector<8x1xf32> to vector<8x8xf32>
    %124 = arith.subf %120, %123 : vector<8x8xf32>
    %125 = math.exp %124 : vector<8x8xf32>
    %cst_65 = arith.constant dense<0.000000e+00> : vector<8xf32>
    %126 = vector.multi_reduction <add>, %125, %cst_65 [1] : vector<8x8xf32> to vector<8xf32>
    %127 = vector.shape_cast %126 : vector<8xf32> to vector<8x1xf32>
    %128 = tpu.reciprocal %127 {approx = true} : vector<8x1xf32> -> vector<8x1xf32>
    %129 = vector.broadcast %128 : vector<8x1xf32> to vector<8x8xf32>
    %130 = arith.mulf %125, %129 : vector<8x8xf32>
    %cst_66 = arith.constant dense<0.000000e+00> : vector<8x8xf32>
    %131 = tpu.matmul %130, %116, %cst_66 {dimension_numbers = #tpu.dot_dimension_numbers<[1], [0], [0], [1], [0, 0, 1, 1], [], []>} : vector<8x8xf32>, vector<8x8xf32>, vector<8x8xf32> -> vector<8x8xf32>
    %132 = vector.extract_strided_slice %22 {offsets = [3, 0, 0], sizes = [1, 8, 32], strides = [1, 1, 1]} : vector<4x8x32xf32> to vector<1x8x32xf32>
    %133 = vector.shape_cast %132 : vector<1x8x32xf32> to vector<8x32xf32>
    %cst_67 = arith.constant dense<0.000000e+00> : vector<8x32xf32>
    %134 = tpu.matmul %131, %133, %cst_67 {dimension_numbers = #tpu.dot_dimension_numbers<[1], [0], [0], [1], [0, 0, 1, 1], [], []>} : vector<8x8xf32>, vector<8x32xf32>, vector<8x32xf32> -> vector<8x32xf32>
    %135 = arith.addf %113, %134 : vector<8x32xf32>
    %136 = vector.broadcast %24 : vector<1x32xf32> to vector<8x32xf32>
    %137 = arith.addf %135, %136 : vector<8x32xf32>
    %138 = arith.addf %16, %137 : vector<8x32xf32>
    %cst_68 = arith.constant dense<0.000000e+00> : vector<8xf32>
    %139 = vector.multi_reduction <add>, %138, %cst_68 [1] : vector<8x32xf32> to vector<8xf32>
    %140 = vector.shape_cast %139 : vector<8xf32> to vector<8x1xf32>
    %cst_69 = arith.constant 3.200000e+01 : f32
    %141 = vector.broadcast %cst_69 : f32 to vector<8x1xf32>
    %142 = arith.divf %140, %141 : vector<8x1xf32>
    %143 = vector.broadcast %142 : vector<8x1xf32> to vector<8x32xf32>
    %144 = arith.subf %138, %143 : vector<8x32xf32>
    %145 = arith.mulf %144, %144 : vector<8x32xf32>
    %cst_70 = arith.constant dense<0.000000e+00> : vector<8xf32>
    %146 = vector.multi_reduction <add>, %145, %cst_70 [1] : vector<8x32xf32> to vector<8xf32>
    %147 = vector.shape_cast %146 : vector<8xf32> to vector<8x1xf32>
    %cst_71 = arith.constant 3.200000e+01 : f32
    %148 = vector.broadcast %cst_71 : f32 to vector<8x1xf32>
    %149 = arith.divf %147, %148 : vector<8x1xf32>
    %150 = vector.broadcast %142 : vector<8x1xf32> to vector<8x32xf32>
    %151 = arith.subf %138, %150 : vector<8x32xf32>
    %cst_72 = arith.constant 9.99999974E-6 : f32
    %152 = vector.broadcast %cst_72 : f32 to vector<8x1xf32>
    %153 = arith.addf %149, %152 : vector<8x1xf32>
    %154 = math.rsqrt %153 : vector<8x1xf32>
    %155 = vector.broadcast %154 : vector<8x1xf32> to vector<8x32xf32>
    %156 = arith.mulf %151, %155 : vector<8x32xf32>
    %157 = vector.broadcast %26 : vector<1x32xf32> to vector<8x32xf32>
    %158 = arith.mulf %156, %157 : vector<8x32xf32>
    %159 = vector.broadcast %28 : vector<1x32xf32> to vector<8x32xf32>
    %160 = arith.addf %158, %159 : vector<8x32xf32>
    %cst_73 = arith.constant dense<0.000000e+00> : vector<8x32xf32>
    %161 = tpu.matmul %160, %30, %cst_73 {dimension_numbers = #tpu.dot_dimension_numbers<[1], [0], [0], [1], [0, 0, 1, 1], [], []>} : vector<8x32xf32>, vector<32x32xf32>, vector<8x32xf32> -> vector<8x32xf32>
    %162 = vector.broadcast %32 : vector<1x32xf32> to vector<8x32xf32>
    %163 = arith.addf %161, %162 : vector<8x32xf32>
    %cst_74 = arith.constant 0.000000e+00 : f32
    %164 = vector.broadcast %cst_74 : f32 to vector<8x32xf32>
    %165 = arith.cmpf oge, %163, %164 : vector<8x32xf32>
    %cst_75 = arith.constant 0.00999999977 : f32
    %166 = vector.broadcast %cst_75 : f32 to vector<8x32xf32>
    %167 = arith.mulf %166, %163 : vector<8x32xf32>
    %168 = arith.select %165, %163, %167 : vector<8x32xi1>, vector<8x32xf32>
    %cst_76 = arith.constant dense<0.000000e+00> : vector<8x32xf32>
    %169 = tpu.matmul %168, %34, %cst_76 {dimension_numbers = #tpu.dot_dimension_numbers<[1], [0], [0], [1], [0, 0, 1, 1], [], []>} : vector<8x32xf32>, vector<32x32xf32>, vector<8x32xf32> -> vector<8x32xf32>
    %170 = vector.broadcast %36 : vector<1x32xf32> to vector<8x32xf32>
    %171 = arith.addf %169, %170 : vector<8x32xf32>
    %172 = arith.addf %160, %171 : vector<8x32xf32>
    %cst_77 = arith.constant dense<0.000000e+00> : vector<8xf32>
    %173 = vector.multi_reduction <add>, %172, %cst_77 [1] : vector<8x32xf32> to vector<8xf32>
    %174 = vector.shape_cast %173 : vector<8xf32> to vector<8x1xf32>
    %cst_78 = arith.constant 3.200000e+01 : f32
    %175 = vector.broadcast %cst_78 : f32 to vector<8x1xf32>
    %176 = arith.divf %174, %175 : vector<8x1xf32>
    %177 = vector.broadcast %176 : vector<8x1xf32> to vector<8x32xf32>
    %178 = arith.subf %172, %177 : vector<8x32xf32>
    %179 = arith.mulf %178, %178 : vector<8x32xf32>
    %cst_79 = arith.constant dense<0.000000e+00> : vector<8xf32>
    %180 = vector.multi_reduction <add>, %179, %cst_79 [1] : vector<8x32xf32> to vector<8xf32>
    %181 = vector.shape_cast %180 : vector<8xf32> to vector<8x1xf32>
    %cst_80 = arith.constant 3.200000e+01 : f32
    %182 = vector.broadcast %cst_80 : f32 to vector<8x1xf32>
    %183 = arith.divf %181, %182 : vector<8x1xf32>
    %184 = vector.broadcast %176 : vector<8x1xf32> to vector<8x32xf32>
    %185 = arith.subf %172, %184 : vector<8x32xf32>
    %cst_81 = arith.constant 9.99999974E-6 : f32
    %186 = vector.broadcast %cst_81 : f32 to vector<8x1xf32>
    %187 = arith.addf %183, %186 : vector<8x1xf32>
    %188 = math.rsqrt %187 : vector<8x1xf32>
    %189 = vector.broadcast %188 : vector<8x1xf32> to vector<8x32xf32>
    %190 = arith.mulf %185, %189 : vector<8x32xf32>
    %191 = vector.broadcast %38 : vector<1x32xf32> to vector<8x32xf32>
    %192 = arith.mulf %190, %191 : vector<8x32xf32>
    %193 = vector.broadcast %40 : vector<1x32xf32> to vector<8x32xf32>
    %194 = arith.addf %192, %193 : vector<8x32xf32>
    %c1 = arith.constant 1 : index
    %c0_82 = arith.constant 0 : index
    %c0_83 = arith.constant 0 : index
    %195 = vector.load %arg4[%c1, %c0_82, %c0_83] : memref<6x32x96xf32, #tpu.memory_space<vmem>>, vector<1x32x96xf32>
    %196 = vector.shape_cast %195 : vector<1x32x96xf32> to vector<32x96xf32>
    %c1_84 = arith.constant 1 : index
    %c0_85 = arith.constant 0 : index
    %c0_86 = arith.constant 0 : index
    %197 = vector.load %arg5[%c1_84, %c0_85, %c0_86] : memref<6x1x96xf32, #tpu.memory_space<vmem>>, vector<1x1x96xf32>
    %198 = vector.shape_cast %197 : vector<1x1x96xf32> to vector<1x96xf32>
    %c1_87 = arith.constant 1 : index
    %c0_88 = arith.constant 0 : index
    %c0_89 = arith.constant 0 : index
    %c0_90 = arith.constant 0 : index
    %199 = vector.load %arg6[%c1_87, %c0_88, %c0_89, %c0_90] : memref<6x4x8x32xf32, #tpu.memory_space<vmem>>, vector<1x4x8x32xf32>
    %200 = vector.shape_cast %199 : vector<1x4x8x32xf32> to vector<4x8x32xf32>
    %c1_91 = arith.constant 1 : index
    %c0_92 = arith.constant 0 : index
    %c0_93 = arith.constant 0 : index
    %201 = vector.load %arg7[%c1_91, %c0_92, %c0_93] : memref<6x1x32xf32, #tpu.memory_space<vmem>>, vector<1x1x32xf32>
    %202 = vector.shape_cast %201 : vector<1x1x32xf32> to vector<1x32xf32>
    %c1_94 = arith.constant 1 : index
    %c0_95 = arith.constant 0 : index
    %c0_96 = arith.constant 0 : index
    %203 = vector.load %arg8[%c1_94, %c0_95, %c0_96] : memref<6x1x32xf32, #tpu.memory_space<vmem>>, vector<1x1x32xf32>
    %204 = vector.shape_cast %203 : vector<1x1x32xf32> to vector<1x32xf32>
    %c1_97 = arith.constant 1 : index
    %c0_98 = arith.constant 0 : index
    %c0_99 = arith.constant 0 : index
    %205 = vector.load %arg9[%c1_97, %c0_98, %c0_99] : memref<6x1x32xf32, #tpu.memory_space<vmem>>, vector<1x1x32xf32>
    %206 = vector.shape_cast %205 : vector<1x1x32xf32> to vector<1x32xf32>
    %c1_100 = arith.constant 1 : index
    %c0_101 = arith.constant 0 : index
    %c0_102 = arith.constant 0 : index
    %207 = vector.load %arg10[%c1_100, %c0_101, %c0_102] : memref<6x32x32xf32, #tpu.memory_space<vmem>>, vector<1x32x32xf32>
    %208 = vector.shape_cast %207 : vector<1x32x32xf32> to vector<32x32xf32>
    %c1_103 = arith.constant 1 : index
    %c0_104 = arith.constant 0 : index
    %c0_105 = arith.constant 0 : index
    %209 = vector.load %arg11[%c1_103, %c0_104, %c0_105] : memref<6x1x32xf32, #tpu.memory_space<vmem>>, vector<1x1x32xf32>
    %210 = vector.shape_cast %209 : vector<1x1x32xf32> to vector<1x32xf32>
    %c1_106 = arith.constant 1 : index
    %c0_107 = arith.constant 0 : index
    %c0_108 = arith.constant 0 : index
    %211 = vector.load %arg12[%c1_106, %c0_107, %c0_108] : memref<6x32x32xf32, #tpu.memory_space<vmem>>, vector<1x32x32xf32>
    %212 = vector.shape_cast %211 : vector<1x32x32xf32> to vector<32x32xf32>
    %c1_109 = arith.constant 1 : index
    %c0_110 = arith.constant 0 : index
    %c0_111 = arith.constant 0 : index
    %213 = vector.load %arg13[%c1_109, %c0_110, %c0_111] : memref<6x1x32xf32, #tpu.memory_space<vmem>>, vector<1x1x32xf32>
    %214 = vector.shape_cast %213 : vector<1x1x32xf32> to vector<1x32xf32>
    %c1_112 = arith.constant 1 : index
    %c0_113 = arith.constant 0 : index
    %c0_114 = arith.constant 0 : index
    %215 = vector.load %arg14[%c1_112, %c0_113, %c0_114] : memref<6x1x32xf32, #tpu.memory_space<vmem>>, vector<1x1x32xf32>
    %216 = vector.shape_cast %215 : vector<1x1x32xf32> to vector<1x32xf32>
    %c1_115 = arith.constant 1 : index
    %c0_116 = arith.constant 0 : index
    %c0_117 = arith.constant 0 : index
    %217 = vector.load %arg15[%c1_115, %c0_116, %c0_117] : memref<6x1x32xf32, #tpu.memory_space<vmem>>, vector<1x1x32xf32>
    %218 = vector.shape_cast %217 : vector<1x1x32xf32> to vector<1x32xf32>
    %cst_118 = arith.constant dense<0.000000e+00> : vector<8x96xf32>
    %219 = tpu.matmul %194, %196, %cst_118 {dimension_numbers = #tpu.dot_dimension_numbers<[1], [0], [0], [1], [0, 0, 1, 1], [], []>} : vector<8x32xf32>, vector<32x96xf32>, vector<8x96xf32> -> vector<8x96xf32>
    %220 = vector.broadcast %198 : vector<1x96xf32> to vector<8x96xf32>
    %221 = arith.addf %219, %220 : vector<8x96xf32>
    %222 = vector.extract_strided_slice %221 {offsets = [0, 0], sizes = [8, 32], strides = [1, 1]} : vector<8x96xf32> to vector<8x32xf32>
    %223 = vector.extract_strided_slice %221 {offsets = [0, 32], sizes = [8, 32], strides = [1, 1]} : vector<8x96xf32> to vector<8x32xf32>
    %224 = vector.extract_strided_slice %221 {offsets = [0, 64], sizes = [8, 32], strides = [1, 1]} : vector<8x96xf32> to vector<8x32xf32>
    %cst_119 = arith.constant 0.000000e+00 : f32
    %225 = vector.broadcast %cst_119 : f32 to vector<8x32xf32>
    %226 = vector.extract_strided_slice %222 {offsets = [0, 0], sizes = [8, 8], strides = [1, 1]} : vector<8x32xf32> to vector<8x8xf32>
    %227 = vector.extract_strided_slice %223 {offsets = [0, 0], sizes = [8, 8], strides = [1, 1]} : vector<8x32xf32> to vector<8x8xf32>
    %228 = vector.extract_strided_slice %224 {offsets = [0, 0], sizes = [8, 8], strides = [1, 1]} : vector<8x32xf32> to vector<8x8xf32>
    %229 = tpu.transpose %227, [1, 0] : vector<8x8xf32> -> vector<8x8xf32>
    %cst_120 = arith.constant dense<0.000000e+00> : vector<8x8xf32>
    %230 = tpu.matmul %226, %229, %cst_120 {dimension_numbers = #tpu.dot_dimension_numbers<[1], [0], [0], [1], [0, 0, 1, 1], [], []>} : vector<8x8xf32>, vector<8x8xf32>, vector<8x8xf32> -> vector<8x8xf32>
    %cst_121 = arith.constant 0.353553385 : f32
    %231 = vector.broadcast %cst_121 : f32 to vector<8x8xf32>
    %232 = arith.mulf %230, %231 : vector<8x8xf32>
    %cst_122 = arith.constant dense<0xFF800000> : vector<8xf32>
    %233 = vector.multi_reduction <maximumf>, %232, %cst_122 [1] : vector<8x8xf32> to vector<8xf32>
    %234 = vector.shape_cast %233 : vector<8xf32> to vector<8x1xf32>
    %235 = vector.broadcast %234 : vector<8x1xf32> to vector<8x8xf32>
    %236 = arith.subf %232, %235 : vector<8x8xf32>
    %237 = math.exp %236 : vector<8x8xf32>
    %cst_123 = arith.constant dense<0.000000e+00> : vector<8xf32>
    %238 = vector.multi_reduction <add>, %237, %cst_123 [1] : vector<8x8xf32> to vector<8xf32>
    %239 = vector.shape_cast %238 : vector<8xf32> to vector<8x1xf32>
    %240 = tpu.reciprocal %239 {approx = true} : vector<8x1xf32> -> vector<8x1xf32>
    %241 = vector.broadcast %240 : vector<8x1xf32> to vector<8x8xf32>
    %242 = arith.mulf %237, %241 : vector<8x8xf32>
    %cst_124 = arith.constant dense<0.000000e+00> : vector<8x8xf32>
    %243 = tpu.matmul %242, %228, %cst_124 {dimension_numbers = #tpu.dot_dimension_numbers<[1], [0], [0], [1], [0, 0, 1, 1], [], []>} : vector<8x8xf32>, vector<8x8xf32>, vector<8x8xf32> -> vector<8x8xf32>
    %244 = vector.extract_strided_slice %200 {offsets = [0, 0, 0], sizes = [1, 8, 32], strides = [1, 1, 1]} : vector<4x8x32xf32> to vector<1x8x32xf32>
    %245 = vector.shape_cast %244 : vector<1x8x32xf32> to vector<8x32xf32>
    %cst_125 = arith.constant dense<0.000000e+00> : vector<8x32xf32>
    %246 = tpu.matmul %243, %245, %cst_125 {dimension_numbers = #tpu.dot_dimension_numbers<[1], [0], [0], [1], [0, 0, 1, 1], [], []>} : vector<8x8xf32>, vector<8x32xf32>, vector<8x32xf32> -> vector<8x32xf32>
    %247 = arith.addf %225, %246 : vector<8x32xf32>
    %248 = vector.extract_strided_slice %222 {offsets = [0, 8], sizes = [8, 8], strides = [1, 1]} : vector<8x32xf32> to vector<8x8xf32>
    %249 = vector.extract_strided_slice %223 {offsets = [0, 8], sizes = [8, 8], strides = [1, 1]} : vector<8x32xf32> to vector<8x8xf32>
    %250 = vector.extract_strided_slice %224 {offsets = [0, 8], sizes = [8, 8], strides = [1, 1]} : vector<8x32xf32> to vector<8x8xf32>
    %251 = tpu.transpose %249, [1, 0] : vector<8x8xf32> -> vector<8x8xf32>
    %cst_126 = arith.constant dense<0.000000e+00> : vector<8x8xf32>
    %252 = tpu.matmul %248, %251, %cst_126 {dimension_numbers = #tpu.dot_dimension_numbers<[1], [0], [0], [1], [0, 0, 1, 1], [], []>} : vector<8x8xf32>, vector<8x8xf32>, vector<8x8xf32> -> vector<8x8xf32>
    %cst_127 = arith.constant 0.353553385 : f32
    %253 = vector.broadcast %cst_127 : f32 to vector<8x8xf32>
    %254 = arith.mulf %252, %253 : vector<8x8xf32>
    %cst_128 = arith.constant dense<0xFF800000> : vector<8xf32>
    %255 = vector.multi_reduction <maximumf>, %254, %cst_128 [1] : vector<8x8xf32> to vector<8xf32>
    %256 = vector.shape_cast %255 : vector<8xf32> to vector<8x1xf32>
    %257 = vector.broadcast %256 : vector<8x1xf32> to vector<8x8xf32>
    %258 = arith.subf %254, %257 : vector<8x8xf32>
    %259 = math.exp %258 : vector<8x8xf32>
    %cst_129 = arith.constant dense<0.000000e+00> : vector<8xf32>
    %260 = vector.multi_reduction <add>, %259, %cst_129 [1] : vector<8x8xf32> to vector<8xf32>
    %261 = vector.shape_cast %260 : vector<8xf32> to vector<8x1xf32>
    %262 = tpu.reciprocal %261 {approx = true} : vector<8x1xf32> -> vector<8x1xf32>
    %263 = vector.broadcast %262 : vector<8x1xf32> to vector<8x8xf32>
    %264 = arith.mulf %259, %263 : vector<8x8xf32>
    %cst_130 = arith.constant dense<0.000000e+00> : vector<8x8xf32>
    %265 = tpu.matmul %264, %250, %cst_130 {dimension_numbers = #tpu.dot_dimension_numbers<[1], [0], [0], [1], [0, 0, 1, 1], [], []>} : vector<8x8xf32>, vector<8x8xf32>, vector<8x8xf32> -> vector<8x8xf32>
    %266 = vector.extract_strided_slice %200 {offsets = [1, 0, 0], sizes = [1, 8, 32], strides = [1, 1, 1]} : vector<4x8x32xf32> to vector<1x8x32xf32>
    %267 = vector.shape_cast %266 : vector<1x8x32xf32> to vector<8x32xf32>
    %cst_131 = arith.constant dense<0.000000e+00> : vector<8x32xf32>
    %268 = tpu.matmul %265, %267, %cst_131 {dimension_numbers = #tpu.dot_dimension_numbers<[1], [0], [0], [1], [0, 0, 1, 1], [], []>} : vector<8x8xf32>, vector<8x32xf32>, vector<8x32xf32> -> vector<8x32xf32>
    %269 = arith.addf %247, %268 : vector<8x32xf32>
    %270 = vector.extract_strided_slice %222 {offsets = [0, 16], sizes = [8, 8], strides = [1, 1]} : vector<8x32xf32> to vector<8x8xf32>
    %271 = vector.extract_strided_slice %223 {offsets = [0, 16], sizes = [8, 8], strides = [1, 1]} : vector<8x32xf32> to vector<8x8xf32>
    %272 = vector.extract_strided_slice %224 {offsets = [0, 16], sizes = [8, 8], strides = [1, 1]} : vector<8x32xf32> to vector<8x8xf32>
    %273 = tpu.transpose %271, [1, 0] : vector<8x8xf32> -> vector<8x8xf32>
    %cst_132 = arith.constant dense<0.000000e+00> : vector<8x8xf32>
    %274 = tpu.matmul %270, %273, %cst_132 {dimension_numbers = #tpu.dot_dimension_numbers<[1], [0], [0], [1], [0, 0, 1, 1], [], []>} : vector<8x8xf32>, vector<8x8xf32>, vector<8x8xf32> -> vector<8x8xf32>
    %cst_133 = arith.constant 0.353553385 : f32
    %275 = vector.broadcast %cst_133 : f32 to vector<8x8xf32>
    %276 = arith.mulf %274, %275 : vector<8x8xf32>
    %cst_134 = arith.constant dense<0xFF800000> : vector<8xf32>
    %277 = vector.multi_reduction <maximumf>, %276, %cst_134 [1] : vector<8x8xf32> to vector<8xf32>
    %278 = vector.shape_cast %277 : vector<8xf32> to vector<8x1xf32>
    %279 = vector.broadcast %278 : vector<8x1xf32> to vector<8x8xf32>
    %280 = arith.subf %276, %279 : vector<8x8xf32>
    %281 = math.exp %280 : vector<8x8xf32>
    %cst_135 = arith.constant dense<0.000000e+00> : vector<8xf32>
    %282 = vector.multi_reduction <add>, %281, %cst_135 [1] : vector<8x8xf32> to vector<8xf32>
    %283 = vector.shape_cast %282 : vector<8xf32> to vector<8x1xf32>
    %284 = tpu.reciprocal %283 {approx = true} : vector<8x1xf32> -> vector<8x1xf32>
    %285 = vector.broadcast %284 : vector<8x1xf32> to vector<8x8xf32>
    %286 = arith.mulf %281, %285 : vector<8x8xf32>
    %cst_136 = arith.constant dense<0.000000e+00> : vector<8x8xf32>
    %287 = tpu.matmul %286, %272, %cst_136 {dimension_numbers = #tpu.dot_dimension_numbers<[1], [0], [0], [1], [0, 0, 1, 1], [], []>} : vector<8x8xf32>, vector<8x8xf32>, vector<8x8xf32> -> vector<8x8xf32>
    %288 = vector.extract_strided_slice %200 {offsets = [2, 0, 0], sizes = [1, 8, 32], strides = [1, 1, 1]} : vector<4x8x32xf32> to vector<1x8x32xf32>
    %289 = vector.shape_cast %288 : vector<1x8x32xf32> to vector<8x32xf32>
    %cst_137 = arith.constant dense<0.000000e+00> : vector<8x32xf32>
    %290 = tpu.matmul %287, %289, %cst_137 {dimension_numbers = #tpu.dot_dimension_numbers<[1], [0], [0], [1], [0, 0, 1, 1], [], []>} : vector<8x8xf32>, vector<8x32xf32>, vector<8x32xf32> -> vector<8x32xf32>
    %291 = arith.addf %269, %290 : vector<8x32xf32>
    %292 = vector.extract_strided_slice %222 {offsets = [0, 24], sizes = [8, 8], strides = [1, 1]} : vector<8x32xf32> to vector<8x8xf32>
    %293 = vector.extract_strided_slice %223 {offsets = [0, 24], sizes = [8, 8], strides = [1, 1]} : vector<8x32xf32> to vector<8x8xf32>
    %294 = vector.extract_strided_slice %224 {offsets = [0, 24], sizes = [8, 8], strides = [1, 1]} : vector<8x32xf32> to vector<8x8xf32>
    %295 = tpu.transpose %293, [1, 0] : vector<8x8xf32> -> vector<8x8xf32>
    %cst_138 = arith.constant dense<0.000000e+00> : vector<8x8xf32>
    %296 = tpu.matmul %292, %295, %cst_138 {dimension_numbers = #tpu.dot_dimension_numbers<[1], [0], [0], [1], [0, 0, 1, 1], [], []>} : vector<8x8xf32>, vector<8x8xf32>, vector<8x8xf32> -> vector<8x8xf32>
    %cst_139 = arith.constant 0.353553385 : f32
    %297 = vector.broadcast %cst_139 : f32 to vector<8x8xf32>
    %298 = arith.mulf %296, %297 : vector<8x8xf32>
    %cst_140 = arith.constant dense<0xFF800000> : vector<8xf32>
    %299 = vector.multi_reduction <maximumf>, %298, %cst_140 [1] : vector<8x8xf32> to vector<8xf32>
    %300 = vector.shape_cast %299 : vector<8xf32> to vector<8x1xf32>
    %301 = vector.broadcast %300 : vector<8x1xf32> to vector<8x8xf32>
    %302 = arith.subf %298, %301 : vector<8x8xf32>
    %303 = math.exp %302 : vector<8x8xf32>
    %cst_141 = arith.constant dense<0.000000e+00> : vector<8xf32>
    %304 = vector.multi_reduction <add>, %303, %cst_141 [1] : vector<8x8xf32> to vector<8xf32>
    %305 = vector.shape_cast %304 : vector<8xf32> to vector<8x1xf32>
    %306 = tpu.reciprocal %305 {approx = true} : vector<8x1xf32> -> vector<8x1xf32>
    %307 = vector.broadcast %306 : vector<8x1xf32> to vector<8x8xf32>
    %308 = arith.mulf %303, %307 : vector<8x8xf32>
    %cst_142 = arith.constant dense<0.000000e+00> : vector<8x8xf32>
    %309 = tpu.matmul %308, %294, %cst_142 {dimension_numbers = #tpu.dot_dimension_numbers<[1], [0], [0], [1], [0, 0, 1, 1], [], []>} : vector<8x8xf32>, vector<8x8xf32>, vector<8x8xf32> -> vector<8x8xf32>
    %310 = vector.extract_strided_slice %200 {offsets = [3, 0, 0], sizes = [1, 8, 32], strides = [1, 1, 1]} : vector<4x8x32xf32> to vector<1x8x32xf32>
    %311 = vector.shape_cast %310 : vector<1x8x32xf32> to vector<8x32xf32>
    %cst_143 = arith.constant dense<0.000000e+00> : vector<8x32xf32>
    %312 = tpu.matmul %309, %311, %cst_143 {dimension_numbers = #tpu.dot_dimension_numbers<[1], [0], [0], [1], [0, 0, 1, 1], [], []>} : vector<8x8xf32>, vector<8x32xf32>, vector<8x32xf32> -> vector<8x32xf32>
    %313 = arith.addf %291, %312 : vector<8x32xf32>
    %314 = vector.broadcast %202 : vector<1x32xf32> to vector<8x32xf32>
    %315 = arith.addf %313, %314 : vector<8x32xf32>
    %316 = arith.addf %194, %315 : vector<8x32xf32>
    %cst_144 = arith.constant dense<0.000000e+00> : vector<8xf32>
    %317 = vector.multi_reduction <add>, %316, %cst_144 [1] : vector<8x32xf32> to vector<8xf32>
    %318 = vector.shape_cast %317 : vector<8xf32> to vector<8x1xf32>
    %cst_145 = arith.constant 3.200000e+01 : f32
    %319 = vector.broadcast %cst_145 : f32 to vector<8x1xf32>
    %320 = arith.divf %318, %319 : vector<8x1xf32>
    %321 = vector.broadcast %320 : vector<8x1xf32> to vector<8x32xf32>
    %322 = arith.subf %316, %321 : vector<8x32xf32>
    %323 = arith.mulf %322, %322 : vector<8x32xf32>
    %cst_146 = arith.constant dense<0.000000e+00> : vector<8xf32>
    %324 = vector.multi_reduction <add>, %323, %cst_146 [1] : vector<8x32xf32> to vector<8xf32>
    %325 = vector.shape_cast %324 : vector<8xf32> to vector<8x1xf32>
    %cst_147 = arith.constant 3.200000e+01 : f32
    %326 = vector.broadcast %cst_147 : f32 to vector<8x1xf32>
    %327 = arith.divf %325, %326 : vector<8x1xf32>
    %328 = vector.broadcast %320 : vector<8x1xf32> to vector<8x32xf32>
    %329 = arith.subf %316, %328 : vector<8x32xf32>
    %cst_148 = arith.constant 9.99999974E-6 : f32
    %330 = vector.broadcast %cst_148 : f32 to vector<8x1xf32>
    %331 = arith.addf %327, %330 : vector<8x1xf32>
    %332 = math.rsqrt %331 : vector<8x1xf32>
    %333 = vector.broadcast %332 : vector<8x1xf32> to vector<8x32xf32>
    %334 = arith.mulf %329, %333 : vector<8x32xf32>
    %335 = vector.broadcast %204 : vector<1x32xf32> to vector<8x32xf32>
    %336 = arith.mulf %334, %335 : vector<8x32xf32>
    %337 = vector.broadcast %206 : vector<1x32xf32> to vector<8x32xf32>
    %338 = arith.addf %336, %337 : vector<8x32xf32>
    %cst_149 = arith.constant dense<0.000000e+00> : vector<8x32xf32>
    %339 = tpu.matmul %338, %208, %cst_149 {dimension_numbers = #tpu.dot_dimension_numbers<[1], [0], [0], [1], [0, 0, 1, 1], [], []>} : vector<8x32xf32>, vector<32x32xf32>, vector<8x32xf32> -> vector<8x32xf32>
    %340 = vector.broadcast %210 : vector<1x32xf32> to vector<8x32xf32>
    %341 = arith.addf %339, %340 : vector<8x32xf32>
    %cst_150 = arith.constant 0.000000e+00 : f32
    %342 = vector.broadcast %cst_150 : f32 to vector<8x32xf32>
    %343 = arith.cmpf oge, %341, %342 : vector<8x32xf32>
    %cst_151 = arith.constant 0.00999999977 : f32
    %344 = vector.broadcast %cst_151 : f32 to vector<8x32xf32>
    %345 = arith.mulf %344, %341 : vector<8x32xf32>
    %346 = arith.select %343, %341, %345 : vector<8x32xi1>, vector<8x32xf32>
    %cst_152 = arith.constant dense<0.000000e+00> : vector<8x32xf32>
    %347 = tpu.matmul %346, %212, %cst_152 {dimension_numbers = #tpu.dot_dimension_numbers<[1], [0], [0], [1], [0, 0, 1, 1], [], []>} : vector<8x32xf32>, vector<32x32xf32>, vector<8x32xf32> -> vector<8x32xf32>
    %348 = vector.broadcast %214 : vector<1x32xf32> to vector<8x32xf32>
    %349 = arith.addf %347, %348 : vector<8x32xf32>
    %350 = arith.addf %338, %349 : vector<8x32xf32>
    %cst_153 = arith.constant dense<0.000000e+00> : vector<8xf32>
    %351 = vector.multi_reduction <add>, %350, %cst_153 [1] : vector<8x32xf32> to vector<8xf32>
    %352 = vector.shape_cast %351 : vector<8xf32> to vector<8x1xf32>
    %cst_154 = arith.constant 3.200000e+01 : f32
    %353 = vector.broadcast %cst_154 : f32 to vector<8x1xf32>
    %354 = arith.divf %352, %353 : vector<8x1xf32>
    %355 = vector.broadcast %354 : vector<8x1xf32> to vector<8x32xf32>
    %356 = arith.subf %350, %355 : vector<8x32xf32>
    %357 = arith.mulf %356, %356 : vector<8x32xf32>
    %cst_155 = arith.constant dense<0.000000e+00> : vector<8xf32>
    %358 = vector.multi_reduction <add>, %357, %cst_155 [1] : vector<8x32xf32> to vector<8xf32>
    %359 = vector.shape_cast %358 : vector<8xf32> to vector<8x1xf32>
    %cst_156 = arith.constant 3.200000e+01 : f32
    %360 = vector.broadcast %cst_156 : f32 to vector<8x1xf32>
    %361 = arith.divf %359, %360 : vector<8x1xf32>
    %362 = vector.broadcast %354 : vector<8x1xf32> to vector<8x32xf32>
    %363 = arith.subf %350, %362 : vector<8x32xf32>
    %cst_157 = arith.constant 9.99999974E-6 : f32
    %364 = vector.broadcast %cst_157 : f32 to vector<8x1xf32>
    %365 = arith.addf %361, %364 : vector<8x1xf32>
    %366 = math.rsqrt %365 : vector<8x1xf32>
    %367 = vector.broadcast %366 : vector<8x1xf32> to vector<8x32xf32>
    %368 = arith.mulf %363, %367 : vector<8x32xf32>
    %369 = vector.broadcast %216 : vector<1x32xf32> to vector<8x32xf32>
    %370 = arith.mulf %368, %369 : vector<8x32xf32>
    %371 = vector.broadcast %218 : vector<1x32xf32> to vector<8x32xf32>
    %372 = arith.addf %370, %371 : vector<8x32xf32>
    %c2 = arith.constant 2 : index
    %c0_158 = arith.constant 0 : index
    %c0_159 = arith.constant 0 : index
    %373 = vector.load %arg4[%c2, %c0_158, %c0_159] : memref<6x32x96xf32, #tpu.memory_space<vmem>>, vector<1x32x96xf32>
    %374 = vector.shape_cast %373 : vector<1x32x96xf32> to vector<32x96xf32>
    %c2_160 = arith.constant 2 : index
    %c0_161 = arith.constant 0 : index
    %c0_162 = arith.constant 0 : index
    %375 = vector.load %arg5[%c2_160, %c0_161, %c0_162] : memref<6x1x96xf32, #tpu.memory_space<vmem>>, vector<1x1x96xf32>
    %376 = vector.shape_cast %375 : vector<1x1x96xf32> to vector<1x96xf32>
    %c2_163 = arith.constant 2 : index
    %c0_164 = arith.constant 0 : index
    %c0_165 = arith.constant 0 : index
    %c0_166 = arith.constant 0 : index
    %377 = vector.load %arg6[%c2_163, %c0_164, %c0_165, %c0_166] : memref<6x4x8x32xf32, #tpu.memory_space<vmem>>, vector<1x4x8x32xf32>
    %378 = vector.shape_cast %377 : vector<1x4x8x32xf32> to vector<4x8x32xf32>
    %c2_167 = arith.constant 2 : index
    %c0_168 = arith.constant 0 : index
    %c0_169 = arith.constant 0 : index
    %379 = vector.load %arg7[%c2_167, %c0_168, %c0_169] : memref<6x1x32xf32, #tpu.memory_space<vmem>>, vector<1x1x32xf32>
    %380 = vector.shape_cast %379 : vector<1x1x32xf32> to vector<1x32xf32>
    %c2_170 = arith.constant 2 : index
    %c0_171 = arith.constant 0 : index
    %c0_172 = arith.constant 0 : index
    %381 = vector.load %arg8[%c2_170, %c0_171, %c0_172] : memref<6x1x32xf32, #tpu.memory_space<vmem>>, vector<1x1x32xf32>
    %382 = vector.shape_cast %381 : vector<1x1x32xf32> to vector<1x32xf32>
    %c2_173 = arith.constant 2 : index
    %c0_174 = arith.constant 0 : index
    %c0_175 = arith.constant 0 : index
    %383 = vector.load %arg9[%c2_173, %c0_174, %c0_175] : memref<6x1x32xf32, #tpu.memory_space<vmem>>, vector<1x1x32xf32>
    %384 = vector.shape_cast %383 : vector<1x1x32xf32> to vector<1x32xf32>
    %c2_176 = arith.constant 2 : index
    %c0_177 = arith.constant 0 : index
    %c0_178 = arith.constant 0 : index
    %385 = vector.load %arg10[%c2_176, %c0_177, %c0_178] : memref<6x32x32xf32, #tpu.memory_space<vmem>>, vector<1x32x32xf32>
    %386 = vector.shape_cast %385 : vector<1x32x32xf32> to vector<32x32xf32>
    %c2_179 = arith.constant 2 : index
    %c0_180 = arith.constant 0 : index
    %c0_181 = arith.constant 0 : index
    %387 = vector.load %arg11[%c2_179, %c0_180, %c0_181] : memref<6x1x32xf32, #tpu.memory_space<vmem>>, vector<1x1x32xf32>
    %388 = vector.shape_cast %387 : vector<1x1x32xf32> to vector<1x32xf32>
    %c2_182 = arith.constant 2 : index
    %c0_183 = arith.constant 0 : index
    %c0_184 = arith.constant 0 : index
    %389 = vector.load %arg12[%c2_182, %c0_183, %c0_184] : memref<6x32x32xf32, #tpu.memory_space<vmem>>, vector<1x32x32xf32>
    %390 = vector.shape_cast %389 : vector<1x32x32xf32> to vector<32x32xf32>
    %c2_185 = arith.constant 2 : index
    %c0_186 = arith.constant 0 : index
    %c0_187 = arith.constant 0 : index
    %391 = vector.load %arg13[%c2_185, %c0_186, %c0_187] : memref<6x1x32xf32, #tpu.memory_space<vmem>>, vector<1x1x32xf32>
    %392 = vector.shape_cast %391 : vector<1x1x32xf32> to vector<1x32xf32>
    %c2_188 = arith.constant 2 : index
    %c0_189 = arith.constant 0 : index
    %c0_190 = arith.constant 0 : index
    %393 = vector.load %arg14[%c2_188, %c0_189, %c0_190] : memref<6x1x32xf32, #tpu.memory_space<vmem>>, vector<1x1x32xf32>
    %394 = vector.shape_cast %393 : vector<1x1x32xf32> to vector<1x32xf32>
    %c2_191 = arith.constant 2 : index
    %c0_192 = arith.constant 0 : index
    %c0_193 = arith.constant 0 : index
    %395 = vector.load %arg15[%c2_191, %c0_192, %c0_193] : memref<6x1x32xf32, #tpu.memory_space<vmem>>, vector<1x1x32xf32>
    %396 = vector.shape_cast %395 : vector<1x1x32xf32> to vector<1x32xf32>
    %cst_194 = arith.constant dense<0.000000e+00> : vector<8x96xf32>
    %397 = tpu.matmul %372, %374, %cst_194 {dimension_numbers = #tpu.dot_dimension_numbers<[1], [0], [0], [1], [0, 0, 1, 1], [], []>} : vector<8x32xf32>, vector<32x96xf32>, vector<8x96xf32> -> vector<8x96xf32>
    %398 = vector.broadcast %376 : vector<1x96xf32> to vector<8x96xf32>
    %399 = arith.addf %397, %398 : vector<8x96xf32>
    %400 = vector.extract_strided_slice %399 {offsets = [0, 0], sizes = [8, 32], strides = [1, 1]} : vector<8x96xf32> to vector<8x32xf32>
    %401 = vector.extract_strided_slice %399 {offsets = [0, 32], sizes = [8, 32], strides = [1, 1]} : vector<8x96xf32> to vector<8x32xf32>
    %402 = vector.extract_strided_slice %399 {offsets = [0, 64], sizes = [8, 32], strides = [1, 1]} : vector<8x96xf32> to vector<8x32xf32>
    %cst_195 = arith.constant 0.000000e+00 : f32
    %403 = vector.broadcast %cst_195 : f32 to vector<8x32xf32>
    %404 = vector.extract_strided_slice %400 {offsets = [0, 0], sizes = [8, 8], strides = [1, 1]} : vector<8x32xf32> to vector<8x8xf32>
    %405 = vector.extract_strided_slice %401 {offsets = [0, 0], sizes = [8, 8], strides = [1, 1]} : vector<8x32xf32> to vector<8x8xf32>
    %406 = vector.extract_strided_slice %402 {offsets = [0, 0], sizes = [8, 8], strides = [1, 1]} : vector<8x32xf32> to vector<8x8xf32>
    %407 = tpu.transpose %405, [1, 0] : vector<8x8xf32> -> vector<8x8xf32>
    %cst_196 = arith.constant dense<0.000000e+00> : vector<8x8xf32>
    %408 = tpu.matmul %404, %407, %cst_196 {dimension_numbers = #tpu.dot_dimension_numbers<[1], [0], [0], [1], [0, 0, 1, 1], [], []>} : vector<8x8xf32>, vector<8x8xf32>, vector<8x8xf32> -> vector<8x8xf32>
    %cst_197 = arith.constant 0.353553385 : f32
    %409 = vector.broadcast %cst_197 : f32 to vector<8x8xf32>
    %410 = arith.mulf %408, %409 : vector<8x8xf32>
    %cst_198 = arith.constant dense<0xFF800000> : vector<8xf32>
    %411 = vector.multi_reduction <maximumf>, %410, %cst_198 [1] : vector<8x8xf32> to vector<8xf32>
    %412 = vector.shape_cast %411 : vector<8xf32> to vector<8x1xf32>
    %413 = vector.broadcast %412 : vector<8x1xf32> to vector<8x8xf32>
    %414 = arith.subf %410, %413 : vector<8x8xf32>
    %415 = math.exp %414 : vector<8x8xf32>
    %cst_199 = arith.constant dense<0.000000e+00> : vector<8xf32>
    %416 = vector.multi_reduction <add>, %415, %cst_199 [1] : vector<8x8xf32> to vector<8xf32>
    %417 = vector.shape_cast %416 : vector<8xf32> to vector<8x1xf32>
    %418 = tpu.reciprocal %417 {approx = true} : vector<8x1xf32> -> vector<8x1xf32>
    %419 = vector.broadcast %418 : vector<8x1xf32> to vector<8x8xf32>
    %420 = arith.mulf %415, %419 : vector<8x8xf32>
    %cst_200 = arith.constant dense<0.000000e+00> : vector<8x8xf32>
    %421 = tpu.matmul %420, %406, %cst_200 {dimension_numbers = #tpu.dot_dimension_numbers<[1], [0], [0], [1], [0, 0, 1, 1], [], []>} : vector<8x8xf32>, vector<8x8xf32>, vector<8x8xf32> -> vector<8x8xf32>
    %422 = vector.extract_strided_slice %378 {offsets = [0, 0, 0], sizes = [1, 8, 32], strides = [1, 1, 1]} : vector<4x8x32xf32> to vector<1x8x32xf32>
    %423 = vector.shape_cast %422 : vector<1x8x32xf32> to vector<8x32xf32>
    %cst_201 = arith.constant dense<0.000000e+00> : vector<8x32xf32>
    %424 = tpu.matmul %421, %423, %cst_201 {dimension_numbers = #tpu.dot_dimension_numbers<[1], [0], [0], [1], [0, 0, 1, 1], [], []>} : vector<8x8xf32>, vector<8x32xf32>, vector<8x32xf32> -> vector<8x32xf32>
    %425 = arith.addf %403, %424 : vector<8x32xf32>
    %426 = vector.extract_strided_slice %400 {offsets = [0, 8], sizes = [8, 8], strides = [1, 1]} : vector<8x32xf32> to vector<8x8xf32>
    %427 = vector.extract_strided_slice %401 {offsets = [0, 8], sizes = [8, 8], strides = [1, 1]} : vector<8x32xf32> to vector<8x8xf32>
    %428 = vector.extract_strided_slice %402 {offsets = [0, 8], sizes = [8, 8], strides = [1, 1]} : vector<8x32xf32> to vector<8x8xf32>
    %429 = tpu.transpose %427, [1, 0] : vector<8x8xf32> -> vector<8x8xf32>
    %cst_202 = arith.constant dense<0.000000e+00> : vector<8x8xf32>
    %430 = tpu.matmul %426, %429, %cst_202 {dimension_numbers = #tpu.dot_dimension_numbers<[1], [0], [0], [1], [0, 0, 1, 1], [], []>} : vector<8x8xf32>, vector<8x8xf32>, vector<8x8xf32> -> vector<8x8xf32>
    %cst_203 = arith.constant 0.353553385 : f32
    %431 = vector.broadcast %cst_203 : f32 to vector<8x8xf32>
    %432 = arith.mulf %430, %431 : vector<8x8xf32>
    %cst_204 = arith.constant dense<0xFF800000> : vector<8xf32>
    %433 = vector.multi_reduction <maximumf>, %432, %cst_204 [1] : vector<8x8xf32> to vector<8xf32>
    %434 = vector.shape_cast %433 : vector<8xf32> to vector<8x1xf32>
    %435 = vector.broadcast %434 : vector<8x1xf32> to vector<8x8xf32>
    %436 = arith.subf %432, %435 : vector<8x8xf32>
    %437 = math.exp %436 : vector<8x8xf32>
    %cst_205 = arith.constant dense<0.000000e+00> : vector<8xf32>
    %438 = vector.multi_reduction <add>, %437, %cst_205 [1] : vector<8x8xf32> to vector<8xf32>
    %439 = vector.shape_cast %438 : vector<8xf32> to vector<8x1xf32>
    %440 = tpu.reciprocal %439 {approx = true} : vector<8x1xf32> -> vector<8x1xf32>
    %441 = vector.broadcast %440 : vector<8x1xf32> to vector<8x8xf32>
    %442 = arith.mulf %437, %441 : vector<8x8xf32>
    %cst_206 = arith.constant dense<0.000000e+00> : vector<8x8xf32>
    %443 = tpu.matmul %442, %428, %cst_206 {dimension_numbers = #tpu.dot_dimension_numbers<[1], [0], [0], [1], [0, 0, 1, 1], [], []>} : vector<8x8xf32>, vector<8x8xf32>, vector<8x8xf32> -> vector<8x8xf32>
    %444 = vector.extract_strided_slice %378 {offsets = [1, 0, 0], sizes = [1, 8, 32], strides = [1, 1, 1]} : vector<4x8x32xf32> to vector<1x8x32xf32>
    %445 = vector.shape_cast %444 : vector<1x8x32xf32> to vector<8x32xf32>
    %cst_207 = arith.constant dense<0.000000e+00> : vector<8x32xf32>
    %446 = tpu.matmul %443, %445, %cst_207 {dimension_numbers = #tpu.dot_dimension_numbers<[1], [0], [0], [1], [0, 0, 1, 1], [], []>} : vector<8x8xf32>, vector<8x32xf32>, vector<8x32xf32> -> vector<8x32xf32>
    %447 = arith.addf %425, %446 : vector<8x32xf32>
    %448 = vector.extract_strided_slice %400 {offsets = [0, 16], sizes = [8, 8], strides = [1, 1]} : vector<8x32xf32> to vector<8x8xf32>
    %449 = vector.extract_strided_slice %401 {offsets = [0, 16], sizes = [8, 8], strides = [1, 1]} : vector<8x32xf32> to vector<8x8xf32>
    %450 = vector.extract_strided_slice %402 {offsets = [0, 16], sizes = [8, 8], strides = [1, 1]} : vector<8x32xf32> to vector<8x8xf32>
    %451 = tpu.transpose %449, [1, 0] : vector<8x8xf32> -> vector<8x8xf32>
    %cst_208 = arith.constant dense<0.000000e+00> : vector<8x8xf32>
    %452 = tpu.matmul %448, %451, %cst_208 {dimension_numbers = #tpu.dot_dimension_numbers<[1], [0], [0], [1], [0, 0, 1, 1], [], []>} : vector<8x8xf32>, vector<8x8xf32>, vector<8x8xf32> -> vector<8x8xf32>
    %cst_209 = arith.constant 0.353553385 : f32
    %453 = vector.broadcast %cst_209 : f32 to vector<8x8xf32>
    %454 = arith.mulf %452, %453 : vector<8x8xf32>
    %cst_210 = arith.constant dense<0xFF800000> : vector<8xf32>
    %455 = vector.multi_reduction <maximumf>, %454, %cst_210 [1] : vector<8x8xf32> to vector<8xf32>
    %456 = vector.shape_cast %455 : vector<8xf32> to vector<8x1xf32>
    %457 = vector.broadcast %456 : vector<8x1xf32> to vector<8x8xf32>
    %458 = arith.subf %454, %457 : vector<8x8xf32>
    %459 = math.exp %458 : vector<8x8xf32>
    %cst_211 = arith.constant dense<0.000000e+00> : vector<8xf32>
    %460 = vector.multi_reduction <add>, %459, %cst_211 [1] : vector<8x8xf32> to vector<8xf32>
    %461 = vector.shape_cast %460 : vector<8xf32> to vector<8x1xf32>
    %462 = tpu.reciprocal %461 {approx = true} : vector<8x1xf32> -> vector<8x1xf32>
    %463 = vector.broadcast %462 : vector<8x1xf32> to vector<8x8xf32>
    %464 = arith.mulf %459, %463 : vector<8x8xf32>
    %cst_212 = arith.constant dense<0.000000e+00> : vector<8x8xf32>
    %465 = tpu.matmul %464, %450, %cst_212 {dimension_numbers = #tpu.dot_dimension_numbers<[1], [0], [0], [1], [0, 0, 1, 1], [], []>} : vector<8x8xf32>, vector<8x8xf32>, vector<8x8xf32> -> vector<8x8xf32>
    %466 = vector.extract_strided_slice %378 {offsets = [2, 0, 0], sizes = [1, 8, 32], strides = [1, 1, 1]} : vector<4x8x32xf32> to vector<1x8x32xf32>
    %467 = vector.shape_cast %466 : vector<1x8x32xf32> to vector<8x32xf32>
    %cst_213 = arith.constant dense<0.000000e+00> : vector<8x32xf32>
    %468 = tpu.matmul %465, %467, %cst_213 {dimension_numbers = #tpu.dot_dimension_numbers<[1], [0], [0], [1], [0, 0, 1, 1], [], []>} : vector<8x8xf32>, vector<8x32xf32>, vector<8x32xf32> -> vector<8x32xf32>
    %469 = arith.addf %447, %468 : vector<8x32xf32>
    %470 = vector.extract_strided_slice %400 {offsets = [0, 24], sizes = [8, 8], strides = [1, 1]} : vector<8x32xf32> to vector<8x8xf32>
    %471 = vector.extract_strided_slice %401 {offsets = [0, 24], sizes = [8, 8], strides = [1, 1]} : vector<8x32xf32> to vector<8x8xf32>
    %472 = vector.extract_strided_slice %402 {offsets = [0, 24], sizes = [8, 8], strides = [1, 1]} : vector<8x32xf32> to vector<8x8xf32>
    %473 = tpu.transpose %471, [1, 0] : vector<8x8xf32> -> vector<8x8xf32>
    %cst_214 = arith.constant dense<0.000000e+00> : vector<8x8xf32>
    %474 = tpu.matmul %470, %473, %cst_214 {dimension_numbers = #tpu.dot_dimension_numbers<[1], [0], [0], [1], [0, 0, 1, 1], [], []>} : vector<8x8xf32>, vector<8x8xf32>, vector<8x8xf32> -> vector<8x8xf32>
    %cst_215 = arith.constant 0.353553385 : f32
    %475 = vector.broadcast %cst_215 : f32 to vector<8x8xf32>
    %476 = arith.mulf %474, %475 : vector<8x8xf32>
    %cst_216 = arith.constant dense<0xFF800000> : vector<8xf32>
    %477 = vector.multi_reduction <maximumf>, %476, %cst_216 [1] : vector<8x8xf32> to vector<8xf32>
    %478 = vector.shape_cast %477 : vector<8xf32> to vector<8x1xf32>
    %479 = vector.broadcast %478 : vector<8x1xf32> to vector<8x8xf32>
    %480 = arith.subf %476, %479 : vector<8x8xf32>
    %481 = math.exp %480 : vector<8x8xf32>
    %cst_217 = arith.constant dense<0.000000e+00> : vector<8xf32>
    %482 = vector.multi_reduction <add>, %481, %cst_217 [1] : vector<8x8xf32> to vector<8xf32>
    %483 = vector.shape_cast %482 : vector<8xf32> to vector<8x1xf32>
    %484 = tpu.reciprocal %483 {approx = true} : vector<8x1xf32> -> vector<8x1xf32>
    %485 = vector.broadcast %484 : vector<8x1xf32> to vector<8x8xf32>
    %486 = arith.mulf %481, %485 : vector<8x8xf32>
    %cst_218 = arith.constant dense<0.000000e+00> : vector<8x8xf32>
    %487 = tpu.matmul %486, %472, %cst_218 {dimension_numbers = #tpu.dot_dimension_numbers<[1], [0], [0], [1], [0, 0, 1, 1], [], []>} : vector<8x8xf32>, vector<8x8xf32>, vector<8x8xf32> -> vector<8x8xf32>
    %488 = vector.extract_strided_slice %378 {offsets = [3, 0, 0], sizes = [1, 8, 32], strides = [1, 1, 1]} : vector<4x8x32xf32> to vector<1x8x32xf32>
    %489 = vector.shape_cast %488 : vector<1x8x32xf32> to vector<8x32xf32>
    %cst_219 = arith.constant dense<0.000000e+00> : vector<8x32xf32>
    %490 = tpu.matmul %487, %489, %cst_219 {dimension_numbers = #tpu.dot_dimension_numbers<[1], [0], [0], [1], [0, 0, 1, 1], [], []>} : vector<8x8xf32>, vector<8x32xf32>, vector<8x32xf32> -> vector<8x32xf32>
    %491 = arith.addf %469, %490 : vector<8x32xf32>
    %492 = vector.broadcast %380 : vector<1x32xf32> to vector<8x32xf32>
    %493 = arith.addf %491, %492 : vector<8x32xf32>
    %494 = arith.addf %372, %493 : vector<8x32xf32>
    %cst_220 = arith.constant dense<0.000000e+00> : vector<8xf32>
    %495 = vector.multi_reduction <add>, %494, %cst_220 [1] : vector<8x32xf32> to vector<8xf32>
    %496 = vector.shape_cast %495 : vector<8xf32> to vector<8x1xf32>
    %cst_221 = arith.constant 3.200000e+01 : f32
    %497 = vector.broadcast %cst_221 : f32 to vector<8x1xf32>
    %498 = arith.divf %496, %497 : vector<8x1xf32>
    %499 = vector.broadcast %498 : vector<8x1xf32> to vector<8x32xf32>
    %500 = arith.subf %494, %499 : vector<8x32xf32>
    %501 = arith.mulf %500, %500 : vector<8x32xf32>
    %cst_222 = arith.constant dense<0.000000e+00> : vector<8xf32>
    %502 = vector.multi_reduction <add>, %501, %cst_222 [1] : vector<8x32xf32> to vector<8xf32>
    %503 = vector.shape_cast %502 : vector<8xf32> to vector<8x1xf32>
    %cst_223 = arith.constant 3.200000e+01 : f32
    %504 = vector.broadcast %cst_223 : f32 to vector<8x1xf32>
    %505 = arith.divf %503, %504 : vector<8x1xf32>
    %506 = vector.broadcast %498 : vector<8x1xf32> to vector<8x32xf32>
    %507 = arith.subf %494, %506 : vector<8x32xf32>
    %cst_224 = arith.constant 9.99999974E-6 : f32
    %508 = vector.broadcast %cst_224 : f32 to vector<8x1xf32>
    %509 = arith.addf %505, %508 : vector<8x1xf32>
    %510 = math.rsqrt %509 : vector<8x1xf32>
    %511 = vector.broadcast %510 : vector<8x1xf32> to vector<8x32xf32>
    %512 = arith.mulf %507, %511 : vector<8x32xf32>
    %513 = vector.broadcast %382 : vector<1x32xf32> to vector<8x32xf32>
    %514 = arith.mulf %512, %513 : vector<8x32xf32>
    %515 = vector.broadcast %384 : vector<1x32xf32> to vector<8x32xf32>
    %516 = arith.addf %514, %515 : vector<8x32xf32>
    %cst_225 = arith.constant dense<0.000000e+00> : vector<8x32xf32>
    %517 = tpu.matmul %516, %386, %cst_225 {dimension_numbers = #tpu.dot_dimension_numbers<[1], [0], [0], [1], [0, 0, 1, 1], [], []>} : vector<8x32xf32>, vector<32x32xf32>, vector<8x32xf32> -> vector<8x32xf32>
    %518 = vector.broadcast %388 : vector<1x32xf32> to vector<8x32xf32>
    %519 = arith.addf %517, %518 : vector<8x32xf32>
    %cst_226 = arith.constant 0.000000e+00 : f32
    %520 = vector.broadcast %cst_226 : f32 to vector<8x32xf32>
    %521 = arith.cmpf oge, %519, %520 : vector<8x32xf32>
    %cst_227 = arith.constant 0.00999999977 : f32
    %522 = vector.broadcast %cst_227 : f32 to vector<8x32xf32>
    %523 = arith.mulf %522, %519 : vector<8x32xf32>
    %524 = arith.select %521, %519, %523 : vector<8x32xi1>, vector<8x32xf32>
    %cst_228 = arith.constant dense<0.000000e+00> : vector<8x32xf32>
    %525 = tpu.matmul %524, %390, %cst_228 {dimension_numbers = #tpu.dot_dimension_numbers<[1], [0], [0], [1], [0, 0, 1, 1], [], []>} : vector<8x32xf32>, vector<32x32xf32>, vector<8x32xf32> -> vector<8x32xf32>
    %526 = vector.broadcast %392 : vector<1x32xf32> to vector<8x32xf32>
    %527 = arith.addf %525, %526 : vector<8x32xf32>
    %528 = arith.addf %516, %527 : vector<8x32xf32>
    %cst_229 = arith.constant dense<0.000000e+00> : vector<8xf32>
    %529 = vector.multi_reduction <add>, %528, %cst_229 [1] : vector<8x32xf32> to vector<8xf32>
    %530 = vector.shape_cast %529 : vector<8xf32> to vector<8x1xf32>
    %cst_230 = arith.constant 3.200000e+01 : f32
    %531 = vector.broadcast %cst_230 : f32 to vector<8x1xf32>
    %532 = arith.divf %530, %531 : vector<8x1xf32>
    %533 = vector.broadcast %532 : vector<8x1xf32> to vector<8x32xf32>
    %534 = arith.subf %528, %533 : vector<8x32xf32>
    %535 = arith.mulf %534, %534 : vector<8x32xf32>
    %cst_231 = arith.constant dense<0.000000e+00> : vector<8xf32>
    %536 = vector.multi_reduction <add>, %535, %cst_231 [1] : vector<8x32xf32> to vector<8xf32>
    %537 = vector.shape_cast %536 : vector<8xf32> to vector<8x1xf32>
    %cst_232 = arith.constant 3.200000e+01 : f32
    %538 = vector.broadcast %cst_232 : f32 to vector<8x1xf32>
    %539 = arith.divf %537, %538 : vector<8x1xf32>
    %540 = vector.broadcast %532 : vector<8x1xf32> to vector<8x32xf32>
    %541 = arith.subf %528, %540 : vector<8x32xf32>
    %cst_233 = arith.constant 9.99999974E-6 : f32
    %542 = vector.broadcast %cst_233 : f32 to vector<8x1xf32>
    %543 = arith.addf %539, %542 : vector<8x1xf32>
    %544 = math.rsqrt %543 : vector<8x1xf32>
    %545 = vector.broadcast %544 : vector<8x1xf32> to vector<8x32xf32>
    %546 = arith.mulf %541, %545 : vector<8x32xf32>
    %547 = vector.broadcast %394 : vector<1x32xf32> to vector<8x32xf32>
    %548 = arith.mulf %546, %547 : vector<8x32xf32>
    %549 = vector.broadcast %396 : vector<1x32xf32> to vector<8x32xf32>
    %550 = arith.addf %548, %549 : vector<8x32xf32>
    %c3 = arith.constant 3 : index
    %c0_234 = arith.constant 0 : index
    %c0_235 = arith.constant 0 : index
    %551 = vector.load %arg4[%c3, %c0_234, %c0_235] : memref<6x32x96xf32, #tpu.memory_space<vmem>>, vector<1x32x96xf32>
    %552 = vector.shape_cast %551 : vector<1x32x96xf32> to vector<32x96xf32>
    %c3_236 = arith.constant 3 : index
    %c0_237 = arith.constant 0 : index
    %c0_238 = arith.constant 0 : index
    %553 = vector.load %arg5[%c3_236, %c0_237, %c0_238] : memref<6x1x96xf32, #tpu.memory_space<vmem>>, vector<1x1x96xf32>
    %554 = vector.shape_cast %553 : vector<1x1x96xf32> to vector<1x96xf32>
    %c3_239 = arith.constant 3 : index
    %c0_240 = arith.constant 0 : index
    %c0_241 = arith.constant 0 : index
    %c0_242 = arith.constant 0 : index
    %555 = vector.load %arg6[%c3_239, %c0_240, %c0_241, %c0_242] : memref<6x4x8x32xf32, #tpu.memory_space<vmem>>, vector<1x4x8x32xf32>
    %556 = vector.shape_cast %555 : vector<1x4x8x32xf32> to vector<4x8x32xf32>
    %c3_243 = arith.constant 3 : index
    %c0_244 = arith.constant 0 : index
    %c0_245 = arith.constant 0 : index
    %557 = vector.load %arg7[%c3_243, %c0_244, %c0_245] : memref<6x1x32xf32, #tpu.memory_space<vmem>>, vector<1x1x32xf32>
    %558 = vector.shape_cast %557 : vector<1x1x32xf32> to vector<1x32xf32>
    %c3_246 = arith.constant 3 : index
    %c0_247 = arith.constant 0 : index
    %c0_248 = arith.constant 0 : index
    %559 = vector.load %arg8[%c3_246, %c0_247, %c0_248] : memref<6x1x32xf32, #tpu.memory_space<vmem>>, vector<1x1x32xf32>
    %560 = vector.shape_cast %559 : vector<1x1x32xf32> to vector<1x32xf32>
    %c3_249 = arith.constant 3 : index
    %c0_250 = arith.constant 0 : index
    %c0_251 = arith.constant 0 : index
    %561 = vector.load %arg9[%c3_249, %c0_250, %c0_251] : memref<6x1x32xf32, #tpu.memory_space<vmem>>, vector<1x1x32xf32>
    %562 = vector.shape_cast %561 : vector<1x1x32xf32> to vector<1x32xf32>
    %c3_252 = arith.constant 3 : index
    %c0_253 = arith.constant 0 : index
    %c0_254 = arith.constant 0 : index
    %563 = vector.load %arg10[%c3_252, %c0_253, %c0_254] : memref<6x32x32xf32, #tpu.memory_space<vmem>>, vector<1x32x32xf32>
    %564 = vector.shape_cast %563 : vector<1x32x32xf32> to vector<32x32xf32>
    %c3_255 = arith.constant 3 : index
    %c0_256 = arith.constant 0 : index
    %c0_257 = arith.constant 0 : index
    %565 = vector.load %arg11[%c3_255, %c0_256, %c0_257] : memref<6x1x32xf32, #tpu.memory_space<vmem>>, vector<1x1x32xf32>
    %566 = vector.shape_cast %565 : vector<1x1x32xf32> to vector<1x32xf32>
    %c3_258 = arith.constant 3 : index
    %c0_259 = arith.constant 0 : index
    %c0_260 = arith.constant 0 : index
    %567 = vector.load %arg12[%c3_258, %c0_259, %c0_260] : memref<6x32x32xf32, #tpu.memory_space<vmem>>, vector<1x32x32xf32>
    %568 = vector.shape_cast %567 : vector<1x32x32xf32> to vector<32x32xf32>
    %c3_261 = arith.constant 3 : index
    %c0_262 = arith.constant 0 : index
    %c0_263 = arith.constant 0 : index
    %569 = vector.load %arg13[%c3_261, %c0_262, %c0_263] : memref<6x1x32xf32, #tpu.memory_space<vmem>>, vector<1x1x32xf32>
    %570 = vector.shape_cast %569 : vector<1x1x32xf32> to vector<1x32xf32>
    %c3_264 = arith.constant 3 : index
    %c0_265 = arith.constant 0 : index
    %c0_266 = arith.constant 0 : index
    %571 = vector.load %arg14[%c3_264, %c0_265, %c0_266] : memref<6x1x32xf32, #tpu.memory_space<vmem>>, vector<1x1x32xf32>
    %572 = vector.shape_cast %571 : vector<1x1x32xf32> to vector<1x32xf32>
    %c3_267 = arith.constant 3 : index
    %c0_268 = arith.constant 0 : index
    %c0_269 = arith.constant 0 : index
    %573 = vector.load %arg15[%c3_267, %c0_268, %c0_269] : memref<6x1x32xf32, #tpu.memory_space<vmem>>, vector<1x1x32xf32>
    %574 = vector.shape_cast %573 : vector<1x1x32xf32> to vector<1x32xf32>
    %cst_270 = arith.constant dense<0.000000e+00> : vector<8x96xf32>
    %575 = tpu.matmul %550, %552, %cst_270 {dimension_numbers = #tpu.dot_dimension_numbers<[1], [0], [0], [1], [0, 0, 1, 1], [], []>} : vector<8x32xf32>, vector<32x96xf32>, vector<8x96xf32> -> vector<8x96xf32>
    %576 = vector.broadcast %554 : vector<1x96xf32> to vector<8x96xf32>
    %577 = arith.addf %575, %576 : vector<8x96xf32>
    %578 = vector.extract_strided_slice %577 {offsets = [0, 0], sizes = [8, 32], strides = [1, 1]} : vector<8x96xf32> to vector<8x32xf32>
    %579 = vector.extract_strided_slice %577 {offsets = [0, 32], sizes = [8, 32], strides = [1, 1]} : vector<8x96xf32> to vector<8x32xf32>
    %580 = vector.extract_strided_slice %577 {offsets = [0, 64], sizes = [8, 32], strides = [1, 1]} : vector<8x96xf32> to vector<8x32xf32>
    %cst_271 = arith.constant 0.000000e+00 : f32
    %581 = vector.broadcast %cst_271 : f32 to vector<8x32xf32>
    %582 = vector.extract_strided_slice %578 {offsets = [0, 0], sizes = [8, 8], strides = [1, 1]} : vector<8x32xf32> to vector<8x8xf32>
    %583 = vector.extract_strided_slice %579 {offsets = [0, 0], sizes = [8, 8], strides = [1, 1]} : vector<8x32xf32> to vector<8x8xf32>
    %584 = vector.extract_strided_slice %580 {offsets = [0, 0], sizes = [8, 8], strides = [1, 1]} : vector<8x32xf32> to vector<8x8xf32>
    %585 = tpu.transpose %583, [1, 0] : vector<8x8xf32> -> vector<8x8xf32>
    %cst_272 = arith.constant dense<0.000000e+00> : vector<8x8xf32>
    %586 = tpu.matmul %582, %585, %cst_272 {dimension_numbers = #tpu.dot_dimension_numbers<[1], [0], [0], [1], [0, 0, 1, 1], [], []>} : vector<8x8xf32>, vector<8x8xf32>, vector<8x8xf32> -> vector<8x8xf32>
    %cst_273 = arith.constant 0.353553385 : f32
    %587 = vector.broadcast %cst_273 : f32 to vector<8x8xf32>
    %588 = arith.mulf %586, %587 : vector<8x8xf32>
    %cst_274 = arith.constant dense<0xFF800000> : vector<8xf32>
    %589 = vector.multi_reduction <maximumf>, %588, %cst_274 [1] : vector<8x8xf32> to vector<8xf32>
    %590 = vector.shape_cast %589 : vector<8xf32> to vector<8x1xf32>
    %591 = vector.broadcast %590 : vector<8x1xf32> to vector<8x8xf32>
    %592 = arith.subf %588, %591 : vector<8x8xf32>
    %593 = math.exp %592 : vector<8x8xf32>
    %cst_275 = arith.constant dense<0.000000e+00> : vector<8xf32>
    %594 = vector.multi_reduction <add>, %593, %cst_275 [1] : vector<8x8xf32> to vector<8xf32>
    %595 = vector.shape_cast %594 : vector<8xf32> to vector<8x1xf32>
    %596 = tpu.reciprocal %595 {approx = true} : vector<8x1xf32> -> vector<8x1xf32>
    %597 = vector.broadcast %596 : vector<8x1xf32> to vector<8x8xf32>
    %598 = arith.mulf %593, %597 : vector<8x8xf32>
    %cst_276 = arith.constant dense<0.000000e+00> : vector<8x8xf32>
    %599 = tpu.matmul %598, %584, %cst_276 {dimension_numbers = #tpu.dot_dimension_numbers<[1], [0], [0], [1], [0, 0, 1, 1], [], []>} : vector<8x8xf32>, vector<8x8xf32>, vector<8x8xf32> -> vector<8x8xf32>
    %600 = vector.extract_strided_slice %556 {offsets = [0, 0, 0], sizes = [1, 8, 32], strides = [1, 1, 1]} : vector<4x8x32xf32> to vector<1x8x32xf32>
    %601 = vector.shape_cast %600 : vector<1x8x32xf32> to vector<8x32xf32>
    %cst_277 = arith.constant dense<0.000000e+00> : vector<8x32xf32>
    %602 = tpu.matmul %599, %601, %cst_277 {dimension_numbers = #tpu.dot_dimension_numbers<[1], [0], [0], [1], [0, 0, 1, 1], [], []>} : vector<8x8xf32>, vector<8x32xf32>, vector<8x32xf32> -> vector<8x32xf32>
    %603 = arith.addf %581, %602 : vector<8x32xf32>
    %604 = vector.extract_strided_slice %578 {offsets = [0, 8], sizes = [8, 8], strides = [1, 1]} : vector<8x32xf32> to vector<8x8xf32>
    %605 = vector.extract_strided_slice %579 {offsets = [0, 8], sizes = [8, 8], strides = [1, 1]} : vector<8x32xf32> to vector<8x8xf32>
    %606 = vector.extract_strided_slice %580 {offsets = [0, 8], sizes = [8, 8], strides = [1, 1]} : vector<8x32xf32> to vector<8x8xf32>
    %607 = tpu.transpose %605, [1, 0] : vector<8x8xf32> -> vector<8x8xf32>
    %cst_278 = arith.constant dense<0.000000e+00> : vector<8x8xf32>
    %608 = tpu.matmul %604, %607, %cst_278 {dimension_numbers = #tpu.dot_dimension_numbers<[1], [0], [0], [1], [0, 0, 1, 1], [], []>} : vector<8x8xf32>, vector<8x8xf32>, vector<8x8xf32> -> vector<8x8xf32>
    %cst_279 = arith.constant 0.353553385 : f32
    %609 = vector.broadcast %cst_279 : f32 to vector<8x8xf32>
    %610 = arith.mulf %608, %609 : vector<8x8xf32>
    %cst_280 = arith.constant dense<0xFF800000> : vector<8xf32>
    %611 = vector.multi_reduction <maximumf>, %610, %cst_280 [1] : vector<8x8xf32> to vector<8xf32>
    %612 = vector.shape_cast %611 : vector<8xf32> to vector<8x1xf32>
    %613 = vector.broadcast %612 : vector<8x1xf32> to vector<8x8xf32>
    %614 = arith.subf %610, %613 : vector<8x8xf32>
    %615 = math.exp %614 : vector<8x8xf32>
    %cst_281 = arith.constant dense<0.000000e+00> : vector<8xf32>
    %616 = vector.multi_reduction <add>, %615, %cst_281 [1] : vector<8x8xf32> to vector<8xf32>
    %617 = vector.shape_cast %616 : vector<8xf32> to vector<8x1xf32>
    %618 = tpu.reciprocal %617 {approx = true} : vector<8x1xf32> -> vector<8x1xf32>
    %619 = vector.broadcast %618 : vector<8x1xf32> to vector<8x8xf32>
    %620 = arith.mulf %615, %619 : vector<8x8xf32>
    %cst_282 = arith.constant dense<0.000000e+00> : vector<8x8xf32>
    %621 = tpu.matmul %620, %606, %cst_282 {dimension_numbers = #tpu.dot_dimension_numbers<[1], [0], [0], [1], [0, 0, 1, 1], [], []>} : vector<8x8xf32>, vector<8x8xf32>, vector<8x8xf32> -> vector<8x8xf32>
    %622 = vector.extract_strided_slice %556 {offsets = [1, 0, 0], sizes = [1, 8, 32], strides = [1, 1, 1]} : vector<4x8x32xf32> to vector<1x8x32xf32>
    %623 = vector.shape_cast %622 : vector<1x8x32xf32> to vector<8x32xf32>
    %cst_283 = arith.constant dense<0.000000e+00> : vector<8x32xf32>
    %624 = tpu.matmul %621, %623, %cst_283 {dimension_numbers = #tpu.dot_dimension_numbers<[1], [0], [0], [1], [0, 0, 1, 1], [], []>} : vector<8x8xf32>, vector<8x32xf32>, vector<8x32xf32> -> vector<8x32xf32>
    %625 = arith.addf %603, %624 : vector<8x32xf32>
    %626 = vector.extract_strided_slice %578 {offsets = [0, 16], sizes = [8, 8], strides = [1, 1]} : vector<8x32xf32> to vector<8x8xf32>
    %627 = vector.extract_strided_slice %579 {offsets = [0, 16], sizes = [8, 8], strides = [1, 1]} : vector<8x32xf32> to vector<8x8xf32>
    %628 = vector.extract_strided_slice %580 {offsets = [0, 16], sizes = [8, 8], strides = [1, 1]} : vector<8x32xf32> to vector<8x8xf32>
    %629 = tpu.transpose %627, [1, 0] : vector<8x8xf32> -> vector<8x8xf32>
    %cst_284 = arith.constant dense<0.000000e+00> : vector<8x8xf32>
    %630 = tpu.matmul %626, %629, %cst_284 {dimension_numbers = #tpu.dot_dimension_numbers<[1], [0], [0], [1], [0, 0, 1, 1], [], []>} : vector<8x8xf32>, vector<8x8xf32>, vector<8x8xf32> -> vector<8x8xf32>
    %cst_285 = arith.constant 0.353553385 : f32
    %631 = vector.broadcast %cst_285 : f32 to vector<8x8xf32>
    %632 = arith.mulf %630, %631 : vector<8x8xf32>
    %cst_286 = arith.constant dense<0xFF800000> : vector<8xf32>
    %633 = vector.multi_reduction <maximumf>, %632, %cst_286 [1] : vector<8x8xf32> to vector<8xf32>
    %634 = vector.shape_cast %633 : vector<8xf32> to vector<8x1xf32>
    %635 = vector.broadcast %634 : vector<8x1xf32> to vector<8x8xf32>
    %636 = arith.subf %632, %635 : vector<8x8xf32>
    %637 = math.exp %636 : vector<8x8xf32>
    %cst_287 = arith.constant dense<0.000000e+00> : vector<8xf32>
    %638 = vector.multi_reduction <add>, %637, %cst_287 [1] : vector<8x8xf32> to vector<8xf32>
    %639 = vector.shape_cast %638 : vector<8xf32> to vector<8x1xf32>
    %640 = tpu.reciprocal %639 {approx = true} : vector<8x1xf32> -> vector<8x1xf32>
    %641 = vector.broadcast %640 : vector<8x1xf32> to vector<8x8xf32>
    %642 = arith.mulf %637, %641 : vector<8x8xf32>
    %cst_288 = arith.constant dense<0.000000e+00> : vector<8x8xf32>
    %643 = tpu.matmul %642, %628, %cst_288 {dimension_numbers = #tpu.dot_dimension_numbers<[1], [0], [0], [1], [0, 0, 1, 1], [], []>} : vector<8x8xf32>, vector<8x8xf32>, vector<8x8xf32> -> vector<8x8xf32>
    %644 = vector.extract_strided_slice %556 {offsets = [2, 0, 0], sizes = [1, 8, 32], strides = [1, 1, 1]} : vector<4x8x32xf32> to vector<1x8x32xf32>
    %645 = vector.shape_cast %644 : vector<1x8x32xf32> to vector<8x32xf32>
    %cst_289 = arith.constant dense<0.000000e+00> : vector<8x32xf32>
    %646 = tpu.matmul %643, %645, %cst_289 {dimension_numbers = #tpu.dot_dimension_numbers<[1], [0], [0], [1], [0, 0, 1, 1], [], []>} : vector<8x8xf32>, vector<8x32xf32>, vector<8x32xf32> -> vector<8x32xf32>
    %647 = arith.addf %625, %646 : vector<8x32xf32>
    %648 = vector.extract_strided_slice %578 {offsets = [0, 24], sizes = [8, 8], strides = [1, 1]} : vector<8x32xf32> to vector<8x8xf32>
    %649 = vector.extract_strided_slice %579 {offsets = [0, 24], sizes = [8, 8], strides = [1, 1]} : vector<8x32xf32> to vector<8x8xf32>
    %650 = vector.extract_strided_slice %580 {offsets = [0, 24], sizes = [8, 8], strides = [1, 1]} : vector<8x32xf32> to vector<8x8xf32>
    %651 = tpu.transpose %649, [1, 0] : vector<8x8xf32> -> vector<8x8xf32>
    %cst_290 = arith.constant dense<0.000000e+00> : vector<8x8xf32>
    %652 = tpu.matmul %648, %651, %cst_290 {dimension_numbers = #tpu.dot_dimension_numbers<[1], [0], [0], [1], [0, 0, 1, 1], [], []>} : vector<8x8xf32>, vector<8x8xf32>, vector<8x8xf32> -> vector<8x8xf32>
    %cst_291 = arith.constant 0.353553385 : f32
    %653 = vector.broadcast %cst_291 : f32 to vector<8x8xf32>
    %654 = arith.mulf %652, %653 : vector<8x8xf32>
    %cst_292 = arith.constant dense<0xFF800000> : vector<8xf32>
    %655 = vector.multi_reduction <maximumf>, %654, %cst_292 [1] : vector<8x8xf32> to vector<8xf32>
    %656 = vector.shape_cast %655 : vector<8xf32> to vector<8x1xf32>
    %657 = vector.broadcast %656 : vector<8x1xf32> to vector<8x8xf32>
    %658 = arith.subf %654, %657 : vector<8x8xf32>
    %659 = math.exp %658 : vector<8x8xf32>
    %cst_293 = arith.constant dense<0.000000e+00> : vector<8xf32>
    %660 = vector.multi_reduction <add>, %659, %cst_293 [1] : vector<8x8xf32> to vector<8xf32>
    %661 = vector.shape_cast %660 : vector<8xf32> to vector<8x1xf32>
    %662 = tpu.reciprocal %661 {approx = true} : vector<8x1xf32> -> vector<8x1xf32>
    %663 = vector.broadcast %662 : vector<8x1xf32> to vector<8x8xf32>
    %664 = arith.mulf %659, %663 : vector<8x8xf32>
    %cst_294 = arith.constant dense<0.000000e+00> : vector<8x8xf32>
    %665 = tpu.matmul %664, %650, %cst_294 {dimension_numbers = #tpu.dot_dimension_numbers<[1], [0], [0], [1], [0, 0, 1, 1], [], []>} : vector<8x8xf32>, vector<8x8xf32>, vector<8x8xf32> -> vector<8x8xf32>
    %666 = vector.extract_strided_slice %556 {offsets = [3, 0, 0], sizes = [1, 8, 32], strides = [1, 1, 1]} : vector<4x8x32xf32> to vector<1x8x32xf32>
    %667 = vector.shape_cast %666 : vector<1x8x32xf32> to vector<8x32xf32>
    %cst_295 = arith.constant dense<0.000000e+00> : vector<8x32xf32>
    %668 = tpu.matmul %665, %667, %cst_295 {dimension_numbers = #tpu.dot_dimension_numbers<[1], [0], [0], [1], [0, 0, 1, 1], [], []>} : vector<8x8xf32>, vector<8x32xf32>, vector<8x32xf32> -> vector<8x32xf32>
    %669 = arith.addf %647, %668 : vector<8x32xf32>
    %670 = vector.broadcast %558 : vector<1x32xf32> to vector<8x32xf32>
    %671 = arith.addf %669, %670 : vector<8x32xf32>
    %672 = arith.addf %550, %671 : vector<8x32xf32>
    %cst_296 = arith.constant dense<0.000000e+00> : vector<8xf32>
    %673 = vector.multi_reduction <add>, %672, %cst_296 [1] : vector<8x32xf32> to vector<8xf32>
    %674 = vector.shape_cast %673 : vector<8xf32> to vector<8x1xf32>
    %cst_297 = arith.constant 3.200000e+01 : f32
    %675 = vector.broadcast %cst_297 : f32 to vector<8x1xf32>
    %676 = arith.divf %674, %675 : vector<8x1xf32>
    %677 = vector.broadcast %676 : vector<8x1xf32> to vector<8x32xf32>
    %678 = arith.subf %672, %677 : vector<8x32xf32>
    %679 = arith.mulf %678, %678 : vector<8x32xf32>
    %cst_298 = arith.constant dense<0.000000e+00> : vector<8xf32>
    %680 = vector.multi_reduction <add>, %679, %cst_298 [1] : vector<8x32xf32> to vector<8xf32>
    %681 = vector.shape_cast %680 : vector<8xf32> to vector<8x1xf32>
    %cst_299 = arith.constant 3.200000e+01 : f32
    %682 = vector.broadcast %cst_299 : f32 to vector<8x1xf32>
    %683 = arith.divf %681, %682 : vector<8x1xf32>
    %684 = vector.broadcast %676 : vector<8x1xf32> to vector<8x32xf32>
    %685 = arith.subf %672, %684 : vector<8x32xf32>
    %cst_300 = arith.constant 9.99999974E-6 : f32
    %686 = vector.broadcast %cst_300 : f32 to vector<8x1xf32>
    %687 = arith.addf %683, %686 : vector<8x1xf32>
    %688 = math.rsqrt %687 : vector<8x1xf32>
    %689 = vector.broadcast %688 : vector<8x1xf32> to vector<8x32xf32>
    %690 = arith.mulf %685, %689 : vector<8x32xf32>
    %691 = vector.broadcast %560 : vector<1x32xf32> to vector<8x32xf32>
    %692 = arith.mulf %690, %691 : vector<8x32xf32>
    %693 = vector.broadcast %562 : vector<1x32xf32> to vector<8x32xf32>
    %694 = arith.addf %692, %693 : vector<8x32xf32>
    %cst_301 = arith.constant dense<0.000000e+00> : vector<8x32xf32>
    %695 = tpu.matmul %694, %564, %cst_301 {dimension_numbers = #tpu.dot_dimension_numbers<[1], [0], [0], [1], [0, 0, 1, 1], [], []>} : vector<8x32xf32>, vector<32x32xf32>, vector<8x32xf32> -> vector<8x32xf32>
    %696 = vector.broadcast %566 : vector<1x32xf32> to vector<8x32xf32>
    %697 = arith.addf %695, %696 : vector<8x32xf32>
    %cst_302 = arith.constant 0.000000e+00 : f32
    %698 = vector.broadcast %cst_302 : f32 to vector<8x32xf32>
    %699 = arith.cmpf oge, %697, %698 : vector<8x32xf32>
    %cst_303 = arith.constant 0.00999999977 : f32
    %700 = vector.broadcast %cst_303 : f32 to vector<8x32xf32>
    %701 = arith.mulf %700, %697 : vector<8x32xf32>
    %702 = arith.select %699, %697, %701 : vector<8x32xi1>, vector<8x32xf32>
    %cst_304 = arith.constant dense<0.000000e+00> : vector<8x32xf32>
    %703 = tpu.matmul %702, %568, %cst_304 {dimension_numbers = #tpu.dot_dimension_numbers<[1], [0], [0], [1], [0, 0, 1, 1], [], []>} : vector<8x32xf32>, vector<32x32xf32>, vector<8x32xf32> -> vector<8x32xf32>
    %704 = vector.broadcast %570 : vector<1x32xf32> to vector<8x32xf32>
    %705 = arith.addf %703, %704 : vector<8x32xf32>
    %706 = arith.addf %694, %705 : vector<8x32xf32>
    %cst_305 = arith.constant dense<0.000000e+00> : vector<8xf32>
    %707 = vector.multi_reduction <add>, %706, %cst_305 [1] : vector<8x32xf32> to vector<8xf32>
    %708 = vector.shape_cast %707 : vector<8xf32> to vector<8x1xf32>
    %cst_306 = arith.constant 3.200000e+01 : f32
    %709 = vector.broadcast %cst_306 : f32 to vector<8x1xf32>
    %710 = arith.divf %708, %709 : vector<8x1xf32>
    %711 = vector.broadcast %710 : vector<8x1xf32> to vector<8x32xf32>
    %712 = arith.subf %706, %711 : vector<8x32xf32>
    %713 = arith.mulf %712, %712 : vector<8x32xf32>
    %cst_307 = arith.constant dense<0.000000e+00> : vector<8xf32>
    %714 = vector.multi_reduction <add>, %713, %cst_307 [1] : vector<8x32xf32> to vector<8xf32>
    %715 = vector.shape_cast %714 : vector<8xf32> to vector<8x1xf32>
    %cst_308 = arith.constant 3.200000e+01 : f32
    %716 = vector.broadcast %cst_308 : f32 to vector<8x1xf32>
    %717 = arith.divf %715, %716 : vector<8x1xf32>
    %718 = vector.broadcast %710 : vector<8x1xf32> to vector<8x32xf32>
    %719 = arith.subf %706, %718 : vector<8x32xf32>
    %cst_309 = arith.constant 9.99999974E-6 : f32
    %720 = vector.broadcast %cst_309 : f32 to vector<8x1xf32>
    %721 = arith.addf %717, %720 : vector<8x1xf32>
    %722 = math.rsqrt %721 : vector<8x1xf32>
    %723 = vector.broadcast %722 : vector<8x1xf32> to vector<8x32xf32>
    %724 = arith.mulf %719, %723 : vector<8x32xf32>
    %725 = vector.broadcast %572 : vector<1x32xf32> to vector<8x32xf32>
    %726 = arith.mulf %724, %725 : vector<8x32xf32>
    %727 = vector.broadcast %574 : vector<1x32xf32> to vector<8x32xf32>
    %728 = arith.addf %726, %727 : vector<8x32xf32>
    %c4 = arith.constant 4 : index
    %c0_310 = arith.constant 0 : index
    %c0_311 = arith.constant 0 : index
    %729 = vector.load %arg4[%c4, %c0_310, %c0_311] : memref<6x32x96xf32, #tpu.memory_space<vmem>>, vector<1x32x96xf32>
    %730 = vector.shape_cast %729 : vector<1x32x96xf32> to vector<32x96xf32>
    %c4_312 = arith.constant 4 : index
    %c0_313 = arith.constant 0 : index
    %c0_314 = arith.constant 0 : index
    %731 = vector.load %arg5[%c4_312, %c0_313, %c0_314] : memref<6x1x96xf32, #tpu.memory_space<vmem>>, vector<1x1x96xf32>
    %732 = vector.shape_cast %731 : vector<1x1x96xf32> to vector<1x96xf32>
    %c4_315 = arith.constant 4 : index
    %c0_316 = arith.constant 0 : index
    %c0_317 = arith.constant 0 : index
    %c0_318 = arith.constant 0 : index
    %733 = vector.load %arg6[%c4_315, %c0_316, %c0_317, %c0_318] : memref<6x4x8x32xf32, #tpu.memory_space<vmem>>, vector<1x4x8x32xf32>
    %734 = vector.shape_cast %733 : vector<1x4x8x32xf32> to vector<4x8x32xf32>
    %c4_319 = arith.constant 4 : index
    %c0_320 = arith.constant 0 : index
    %c0_321 = arith.constant 0 : index
    %735 = vector.load %arg7[%c4_319, %c0_320, %c0_321] : memref<6x1x32xf32, #tpu.memory_space<vmem>>, vector<1x1x32xf32>
    %736 = vector.shape_cast %735 : vector<1x1x32xf32> to vector<1x32xf32>
    %c4_322 = arith.constant 4 : index
    %c0_323 = arith.constant 0 : index
    %c0_324 = arith.constant 0 : index
    %737 = vector.load %arg8[%c4_322, %c0_323, %c0_324] : memref<6x1x32xf32, #tpu.memory_space<vmem>>, vector<1x1x32xf32>
    %738 = vector.shape_cast %737 : vector<1x1x32xf32> to vector<1x32xf32>
    %c4_325 = arith.constant 4 : index
    %c0_326 = arith.constant 0 : index
    %c0_327 = arith.constant 0 : index
    %739 = vector.load %arg9[%c4_325, %c0_326, %c0_327] : memref<6x1x32xf32, #tpu.memory_space<vmem>>, vector<1x1x32xf32>
    %740 = vector.shape_cast %739 : vector<1x1x32xf32> to vector<1x32xf32>
    %c4_328 = arith.constant 4 : index
    %c0_329 = arith.constant 0 : index
    %c0_330 = arith.constant 0 : index
    %741 = vector.load %arg10[%c4_328, %c0_329, %c0_330] : memref<6x32x32xf32, #tpu.memory_space<vmem>>, vector<1x32x32xf32>
    %742 = vector.shape_cast %741 : vector<1x32x32xf32> to vector<32x32xf32>
    %c4_331 = arith.constant 4 : index
    %c0_332 = arith.constant 0 : index
    %c0_333 = arith.constant 0 : index
    %743 = vector.load %arg11[%c4_331, %c0_332, %c0_333] : memref<6x1x32xf32, #tpu.memory_space<vmem>>, vector<1x1x32xf32>
    %744 = vector.shape_cast %743 : vector<1x1x32xf32> to vector<1x32xf32>
    %c4_334 = arith.constant 4 : index
    %c0_335 = arith.constant 0 : index
    %c0_336 = arith.constant 0 : index
    %745 = vector.load %arg12[%c4_334, %c0_335, %c0_336] : memref<6x32x32xf32, #tpu.memory_space<vmem>>, vector<1x32x32xf32>
    %746 = vector.shape_cast %745 : vector<1x32x32xf32> to vector<32x32xf32>
    %c4_337 = arith.constant 4 : index
    %c0_338 = arith.constant 0 : index
    %c0_339 = arith.constant 0 : index
    %747 = vector.load %arg13[%c4_337, %c0_338, %c0_339] : memref<6x1x32xf32, #tpu.memory_space<vmem>>, vector<1x1x32xf32>
    %748 = vector.shape_cast %747 : vector<1x1x32xf32> to vector<1x32xf32>
    %c4_340 = arith.constant 4 : index
    %c0_341 = arith.constant 0 : index
    %c0_342 = arith.constant 0 : index
    %749 = vector.load %arg14[%c4_340, %c0_341, %c0_342] : memref<6x1x32xf32, #tpu.memory_space<vmem>>, vector<1x1x32xf32>
    %750 = vector.shape_cast %749 : vector<1x1x32xf32> to vector<1x32xf32>
    %c4_343 = arith.constant 4 : index
    %c0_344 = arith.constant 0 : index
    %c0_345 = arith.constant 0 : index
    %751 = vector.load %arg15[%c4_343, %c0_344, %c0_345] : memref<6x1x32xf32, #tpu.memory_space<vmem>>, vector<1x1x32xf32>
    %752 = vector.shape_cast %751 : vector<1x1x32xf32> to vector<1x32xf32>
    %cst_346 = arith.constant dense<0.000000e+00> : vector<8x96xf32>
    %753 = tpu.matmul %728, %730, %cst_346 {dimension_numbers = #tpu.dot_dimension_numbers<[1], [0], [0], [1], [0, 0, 1, 1], [], []>} : vector<8x32xf32>, vector<32x96xf32>, vector<8x96xf32> -> vector<8x96xf32>
    %754 = vector.broadcast %732 : vector<1x96xf32> to vector<8x96xf32>
    %755 = arith.addf %753, %754 : vector<8x96xf32>
    %756 = vector.extract_strided_slice %755 {offsets = [0, 0], sizes = [8, 32], strides = [1, 1]} : vector<8x96xf32> to vector<8x32xf32>
    %757 = vector.extract_strided_slice %755 {offsets = [0, 32], sizes = [8, 32], strides = [1, 1]} : vector<8x96xf32> to vector<8x32xf32>
    %758 = vector.extract_strided_slice %755 {offsets = [0, 64], sizes = [8, 32], strides = [1, 1]} : vector<8x96xf32> to vector<8x32xf32>
    %cst_347 = arith.constant 0.000000e+00 : f32
    %759 = vector.broadcast %cst_347 : f32 to vector<8x32xf32>
    %760 = vector.extract_strided_slice %756 {offsets = [0, 0], sizes = [8, 8], strides = [1, 1]} : vector<8x32xf32> to vector<8x8xf32>
    %761 = vector.extract_strided_slice %757 {offsets = [0, 0], sizes = [8, 8], strides = [1, 1]} : vector<8x32xf32> to vector<8x8xf32>
    %762 = vector.extract_strided_slice %758 {offsets = [0, 0], sizes = [8, 8], strides = [1, 1]} : vector<8x32xf32> to vector<8x8xf32>
    %763 = tpu.transpose %761, [1, 0] : vector<8x8xf32> -> vector<8x8xf32>
    %cst_348 = arith.constant dense<0.000000e+00> : vector<8x8xf32>
    %764 = tpu.matmul %760, %763, %cst_348 {dimension_numbers = #tpu.dot_dimension_numbers<[1], [0], [0], [1], [0, 0, 1, 1], [], []>} : vector<8x8xf32>, vector<8x8xf32>, vector<8x8xf32> -> vector<8x8xf32>
    %cst_349 = arith.constant 0.353553385 : f32
    %765 = vector.broadcast %cst_349 : f32 to vector<8x8xf32>
    %766 = arith.mulf %764, %765 : vector<8x8xf32>
    %cst_350 = arith.constant dense<0xFF800000> : vector<8xf32>
    %767 = vector.multi_reduction <maximumf>, %766, %cst_350 [1] : vector<8x8xf32> to vector<8xf32>
    %768 = vector.shape_cast %767 : vector<8xf32> to vector<8x1xf32>
    %769 = vector.broadcast %768 : vector<8x1xf32> to vector<8x8xf32>
    %770 = arith.subf %766, %769 : vector<8x8xf32>
    %771 = math.exp %770 : vector<8x8xf32>
    %cst_351 = arith.constant dense<0.000000e+00> : vector<8xf32>
    %772 = vector.multi_reduction <add>, %771, %cst_351 [1] : vector<8x8xf32> to vector<8xf32>
    %773 = vector.shape_cast %772 : vector<8xf32> to vector<8x1xf32>
    %774 = tpu.reciprocal %773 {approx = true} : vector<8x1xf32> -> vector<8x1xf32>
    %775 = vector.broadcast %774 : vector<8x1xf32> to vector<8x8xf32>
    %776 = arith.mulf %771, %775 : vector<8x8xf32>
    %cst_352 = arith.constant dense<0.000000e+00> : vector<8x8xf32>
    %777 = tpu.matmul %776, %762, %cst_352 {dimension_numbers = #tpu.dot_dimension_numbers<[1], [0], [0], [1], [0, 0, 1, 1], [], []>} : vector<8x8xf32>, vector<8x8xf32>, vector<8x8xf32> -> vector<8x8xf32>
    %778 = vector.extract_strided_slice %734 {offsets = [0, 0, 0], sizes = [1, 8, 32], strides = [1, 1, 1]} : vector<4x8x32xf32> to vector<1x8x32xf32>
    %779 = vector.shape_cast %778 : vector<1x8x32xf32> to vector<8x32xf32>
    %cst_353 = arith.constant dense<0.000000e+00> : vector<8x32xf32>
    %780 = tpu.matmul %777, %779, %cst_353 {dimension_numbers = #tpu.dot_dimension_numbers<[1], [0], [0], [1], [0, 0, 1, 1], [], []>} : vector<8x8xf32>, vector<8x32xf32>, vector<8x32xf32> -> vector<8x32xf32>
    %781 = arith.addf %759, %780 : vector<8x32xf32>
    %782 = vector.extract_strided_slice %756 {offsets = [0, 8], sizes = [8, 8], strides = [1, 1]} : vector<8x32xf32> to vector<8x8xf32>
    %783 = vector.extract_strided_slice %757 {offsets = [0, 8], sizes = [8, 8], strides = [1, 1]} : vector<8x32xf32> to vector<8x8xf32>
    %784 = vector.extract_strided_slice %758 {offsets = [0, 8], sizes = [8, 8], strides = [1, 1]} : vector<8x32xf32> to vector<8x8xf32>
    %785 = tpu.transpose %783, [1, 0] : vector<8x8xf32> -> vector<8x8xf32>
    %cst_354 = arith.constant dense<0.000000e+00> : vector<8x8xf32>
    %786 = tpu.matmul %782, %785, %cst_354 {dimension_numbers = #tpu.dot_dimension_numbers<[1], [0], [0], [1], [0, 0, 1, 1], [], []>} : vector<8x8xf32>, vector<8x8xf32>, vector<8x8xf32> -> vector<8x8xf32>
    %cst_355 = arith.constant 0.353553385 : f32
    %787 = vector.broadcast %cst_355 : f32 to vector<8x8xf32>
    %788 = arith.mulf %786, %787 : vector<8x8xf32>
    %cst_356 = arith.constant dense<0xFF800000> : vector<8xf32>
    %789 = vector.multi_reduction <maximumf>, %788, %cst_356 [1] : vector<8x8xf32> to vector<8xf32>
    %790 = vector.shape_cast %789 : vector<8xf32> to vector<8x1xf32>
    %791 = vector.broadcast %790 : vector<8x1xf32> to vector<8x8xf32>
    %792 = arith.subf %788, %791 : vector<8x8xf32>
    %793 = math.exp %792 : vector<8x8xf32>
    %cst_357 = arith.constant dense<0.000000e+00> : vector<8xf32>
    %794 = vector.multi_reduction <add>, %793, %cst_357 [1] : vector<8x8xf32> to vector<8xf32>
    %795 = vector.shape_cast %794 : vector<8xf32> to vector<8x1xf32>
    %796 = tpu.reciprocal %795 {approx = true} : vector<8x1xf32> -> vector<8x1xf32>
    %797 = vector.broadcast %796 : vector<8x1xf32> to vector<8x8xf32>
    %798 = arith.mulf %793, %797 : vector<8x8xf32>
    %cst_358 = arith.constant dense<0.000000e+00> : vector<8x8xf32>
    %799 = tpu.matmul %798, %784, %cst_358 {dimension_numbers = #tpu.dot_dimension_numbers<[1], [0], [0], [1], [0, 0, 1, 1], [], []>} : vector<8x8xf32>, vector<8x8xf32>, vector<8x8xf32> -> vector<8x8xf32>
    %800 = vector.extract_strided_slice %734 {offsets = [1, 0, 0], sizes = [1, 8, 32], strides = [1, 1, 1]} : vector<4x8x32xf32> to vector<1x8x32xf32>
    %801 = vector.shape_cast %800 : vector<1x8x32xf32> to vector<8x32xf32>
    %cst_359 = arith.constant dense<0.000000e+00> : vector<8x32xf32>
    %802 = tpu.matmul %799, %801, %cst_359 {dimension_numbers = #tpu.dot_dimension_numbers<[1], [0], [0], [1], [0, 0, 1, 1], [], []>} : vector<8x8xf32>, vector<8x32xf32>, vector<8x32xf32> -> vector<8x32xf32>
    %803 = arith.addf %781, %802 : vector<8x32xf32>
    %804 = vector.extract_strided_slice %756 {offsets = [0, 16], sizes = [8, 8], strides = [1, 1]} : vector<8x32xf32> to vector<8x8xf32>
    %805 = vector.extract_strided_slice %757 {offsets = [0, 16], sizes = [8, 8], strides = [1, 1]} : vector<8x32xf32> to vector<8x8xf32>
    %806 = vector.extract_strided_slice %758 {offsets = [0, 16], sizes = [8, 8], strides = [1, 1]} : vector<8x32xf32> to vector<8x8xf32>
    %807 = tpu.transpose %805, [1, 0] : vector<8x8xf32> -> vector<8x8xf32>
    %cst_360 = arith.constant dense<0.000000e+00> : vector<8x8xf32>
    %808 = tpu.matmul %804, %807, %cst_360 {dimension_numbers = #tpu.dot_dimension_numbers<[1], [0], [0], [1], [0, 0, 1, 1], [], []>} : vector<8x8xf32>, vector<8x8xf32>, vector<8x8xf32> -> vector<8x8xf32>
    %cst_361 = arith.constant 0.353553385 : f32
    %809 = vector.broadcast %cst_361 : f32 to vector<8x8xf32>
    %810 = arith.mulf %808, %809 : vector<8x8xf32>
    %cst_362 = arith.constant dense<0xFF800000> : vector<8xf32>
    %811 = vector.multi_reduction <maximumf>, %810, %cst_362 [1] : vector<8x8xf32> to vector<8xf32>
    %812 = vector.shape_cast %811 : vector<8xf32> to vector<8x1xf32>
    %813 = vector.broadcast %812 : vector<8x1xf32> to vector<8x8xf32>
    %814 = arith.subf %810, %813 : vector<8x8xf32>
    %815 = math.exp %814 : vector<8x8xf32>
    %cst_363 = arith.constant dense<0.000000e+00> : vector<8xf32>
    %816 = vector.multi_reduction <add>, %815, %cst_363 [1] : vector<8x8xf32> to vector<8xf32>
    %817 = vector.shape_cast %816 : vector<8xf32> to vector<8x1xf32>
    %818 = tpu.reciprocal %817 {approx = true} : vector<8x1xf32> -> vector<8x1xf32>
    %819 = vector.broadcast %818 : vector<8x1xf32> to vector<8x8xf32>
    %820 = arith.mulf %815, %819 : vector<8x8xf32>
    %cst_364 = arith.constant dense<0.000000e+00> : vector<8x8xf32>
    %821 = tpu.matmul %820, %806, %cst_364 {dimension_numbers = #tpu.dot_dimension_numbers<[1], [0], [0], [1], [0, 0, 1, 1], [], []>} : vector<8x8xf32>, vector<8x8xf32>, vector<8x8xf32> -> vector<8x8xf32>
    %822 = vector.extract_strided_slice %734 {offsets = [2, 0, 0], sizes = [1, 8, 32], strides = [1, 1, 1]} : vector<4x8x32xf32> to vector<1x8x32xf32>
    %823 = vector.shape_cast %822 : vector<1x8x32xf32> to vector<8x32xf32>
    %cst_365 = arith.constant dense<0.000000e+00> : vector<8x32xf32>
    %824 = tpu.matmul %821, %823, %cst_365 {dimension_numbers = #tpu.dot_dimension_numbers<[1], [0], [0], [1], [0, 0, 1, 1], [], []>} : vector<8x8xf32>, vector<8x32xf32>, vector<8x32xf32> -> vector<8x32xf32>
    %825 = arith.addf %803, %824 : vector<8x32xf32>
    %826 = vector.extract_strided_slice %756 {offsets = [0, 24], sizes = [8, 8], strides = [1, 1]} : vector<8x32xf32> to vector<8x8xf32>
    %827 = vector.extract_strided_slice %757 {offsets = [0, 24], sizes = [8, 8], strides = [1, 1]} : vector<8x32xf32> to vector<8x8xf32>
    %828 = vector.extract_strided_slice %758 {offsets = [0, 24], sizes = [8, 8], strides = [1, 1]} : vector<8x32xf32> to vector<8x8xf32>
    %829 = tpu.transpose %827, [1, 0] : vector<8x8xf32> -> vector<8x8xf32>
    %cst_366 = arith.constant dense<0.000000e+00> : vector<8x8xf32>
    %830 = tpu.matmul %826, %829, %cst_366 {dimension_numbers = #tpu.dot_dimension_numbers<[1], [0], [0], [1], [0, 0, 1, 1], [], []>} : vector<8x8xf32>, vector<8x8xf32>, vector<8x8xf32> -> vector<8x8xf32>
    %cst_367 = arith.constant 0.353553385 : f32
    %831 = vector.broadcast %cst_367 : f32 to vector<8x8xf32>
    %832 = arith.mulf %830, %831 : vector<8x8xf32>
    %cst_368 = arith.constant dense<0xFF800000> : vector<8xf32>
    %833 = vector.multi_reduction <maximumf>, %832, %cst_368 [1] : vector<8x8xf32> to vector<8xf32>
    %834 = vector.shape_cast %833 : vector<8xf32> to vector<8x1xf32>
    %835 = vector.broadcast %834 : vector<8x1xf32> to vector<8x8xf32>
    %836 = arith.subf %832, %835 : vector<8x8xf32>
    %837 = math.exp %836 : vector<8x8xf32>
    %cst_369 = arith.constant dense<0.000000e+00> : vector<8xf32>
    %838 = vector.multi_reduction <add>, %837, %cst_369 [1] : vector<8x8xf32> to vector<8xf32>
    %839 = vector.shape_cast %838 : vector<8xf32> to vector<8x1xf32>
    %840 = tpu.reciprocal %839 {approx = true} : vector<8x1xf32> -> vector<8x1xf32>
    %841 = vector.broadcast %840 : vector<8x1xf32> to vector<8x8xf32>
    %842 = arith.mulf %837, %841 : vector<8x8xf32>
    %cst_370 = arith.constant dense<0.000000e+00> : vector<8x8xf32>
    %843 = tpu.matmul %842, %828, %cst_370 {dimension_numbers = #tpu.dot_dimension_numbers<[1], [0], [0], [1], [0, 0, 1, 1], [], []>} : vector<8x8xf32>, vector<8x8xf32>, vector<8x8xf32> -> vector<8x8xf32>
    %844 = vector.extract_strided_slice %734 {offsets = [3, 0, 0], sizes = [1, 8, 32], strides = [1, 1, 1]} : vector<4x8x32xf32> to vector<1x8x32xf32>
    %845 = vector.shape_cast %844 : vector<1x8x32xf32> to vector<8x32xf32>
    %cst_371 = arith.constant dense<0.000000e+00> : vector<8x32xf32>
    %846 = tpu.matmul %843, %845, %cst_371 {dimension_numbers = #tpu.dot_dimension_numbers<[1], [0], [0], [1], [0, 0, 1, 1], [], []>} : vector<8x8xf32>, vector<8x32xf32>, vector<8x32xf32> -> vector<8x32xf32>
    %847 = arith.addf %825, %846 : vector<8x32xf32>
    %848 = vector.broadcast %736 : vector<1x32xf32> to vector<8x32xf32>
    %849 = arith.addf %847, %848 : vector<8x32xf32>
    %850 = arith.addf %728, %849 : vector<8x32xf32>
    %cst_372 = arith.constant dense<0.000000e+00> : vector<8xf32>
    %851 = vector.multi_reduction <add>, %850, %cst_372 [1] : vector<8x32xf32> to vector<8xf32>
    %852 = vector.shape_cast %851 : vector<8xf32> to vector<8x1xf32>
    %cst_373 = arith.constant 3.200000e+01 : f32
    %853 = vector.broadcast %cst_373 : f32 to vector<8x1xf32>
    %854 = arith.divf %852, %853 : vector<8x1xf32>
    %855 = vector.broadcast %854 : vector<8x1xf32> to vector<8x32xf32>
    %856 = arith.subf %850, %855 : vector<8x32xf32>
    %857 = arith.mulf %856, %856 : vector<8x32xf32>
    %cst_374 = arith.constant dense<0.000000e+00> : vector<8xf32>
    %858 = vector.multi_reduction <add>, %857, %cst_374 [1] : vector<8x32xf32> to vector<8xf32>
    %859 = vector.shape_cast %858 : vector<8xf32> to vector<8x1xf32>
    %cst_375 = arith.constant 3.200000e+01 : f32
    %860 = vector.broadcast %cst_375 : f32 to vector<8x1xf32>
    %861 = arith.divf %859, %860 : vector<8x1xf32>
    %862 = vector.broadcast %854 : vector<8x1xf32> to vector<8x32xf32>
    %863 = arith.subf %850, %862 : vector<8x32xf32>
    %cst_376 = arith.constant 9.99999974E-6 : f32
    %864 = vector.broadcast %cst_376 : f32 to vector<8x1xf32>
    %865 = arith.addf %861, %864 : vector<8x1xf32>
    %866 = math.rsqrt %865 : vector<8x1xf32>
    %867 = vector.broadcast %866 : vector<8x1xf32> to vector<8x32xf32>
    %868 = arith.mulf %863, %867 : vector<8x32xf32>
    %869 = vector.broadcast %738 : vector<1x32xf32> to vector<8x32xf32>
    %870 = arith.mulf %868, %869 : vector<8x32xf32>
    %871 = vector.broadcast %740 : vector<1x32xf32> to vector<8x32xf32>
    %872 = arith.addf %870, %871 : vector<8x32xf32>
    %cst_377 = arith.constant dense<0.000000e+00> : vector<8x32xf32>
    %873 = tpu.matmul %872, %742, %cst_377 {dimension_numbers = #tpu.dot_dimension_numbers<[1], [0], [0], [1], [0, 0, 1, 1], [], []>} : vector<8x32xf32>, vector<32x32xf32>, vector<8x32xf32> -> vector<8x32xf32>
    %874 = vector.broadcast %744 : vector<1x32xf32> to vector<8x32xf32>
    %875 = arith.addf %873, %874 : vector<8x32xf32>
    %cst_378 = arith.constant 0.000000e+00 : f32
    %876 = vector.broadcast %cst_378 : f32 to vector<8x32xf32>
    %877 = arith.cmpf oge, %875, %876 : vector<8x32xf32>
    %cst_379 = arith.constant 0.00999999977 : f32
    %878 = vector.broadcast %cst_379 : f32 to vector<8x32xf32>
    %879 = arith.mulf %878, %875 : vector<8x32xf32>
    %880 = arith.select %877, %875, %879 : vector<8x32xi1>, vector<8x32xf32>
    %cst_380 = arith.constant dense<0.000000e+00> : vector<8x32xf32>
    %881 = tpu.matmul %880, %746, %cst_380 {dimension_numbers = #tpu.dot_dimension_numbers<[1], [0], [0], [1], [0, 0, 1, 1], [], []>} : vector<8x32xf32>, vector<32x32xf32>, vector<8x32xf32> -> vector<8x32xf32>
    %882 = vector.broadcast %748 : vector<1x32xf32> to vector<8x32xf32>
    %883 = arith.addf %881, %882 : vector<8x32xf32>
    %884 = arith.addf %872, %883 : vector<8x32xf32>
    %cst_381 = arith.constant dense<0.000000e+00> : vector<8xf32>
    %885 = vector.multi_reduction <add>, %884, %cst_381 [1] : vector<8x32xf32> to vector<8xf32>
    %886 = vector.shape_cast %885 : vector<8xf32> to vector<8x1xf32>
    %cst_382 = arith.constant 3.200000e+01 : f32
    %887 = vector.broadcast %cst_382 : f32 to vector<8x1xf32>
    %888 = arith.divf %886, %887 : vector<8x1xf32>
    %889 = vector.broadcast %888 : vector<8x1xf32> to vector<8x32xf32>
    %890 = arith.subf %884, %889 : vector<8x32xf32>
    %891 = arith.mulf %890, %890 : vector<8x32xf32>
    %cst_383 = arith.constant dense<0.000000e+00> : vector<8xf32>
    %892 = vector.multi_reduction <add>, %891, %cst_383 [1] : vector<8x32xf32> to vector<8xf32>
    %893 = vector.shape_cast %892 : vector<8xf32> to vector<8x1xf32>
    %cst_384 = arith.constant 3.200000e+01 : f32
    %894 = vector.broadcast %cst_384 : f32 to vector<8x1xf32>
    %895 = arith.divf %893, %894 : vector<8x1xf32>
    %896 = vector.broadcast %888 : vector<8x1xf32> to vector<8x32xf32>
    %897 = arith.subf %884, %896 : vector<8x32xf32>
    %cst_385 = arith.constant 9.99999974E-6 : f32
    %898 = vector.broadcast %cst_385 : f32 to vector<8x1xf32>
    %899 = arith.addf %895, %898 : vector<8x1xf32>
    %900 = math.rsqrt %899 : vector<8x1xf32>
    %901 = vector.broadcast %900 : vector<8x1xf32> to vector<8x32xf32>
    %902 = arith.mulf %897, %901 : vector<8x32xf32>
    %903 = vector.broadcast %750 : vector<1x32xf32> to vector<8x32xf32>
    %904 = arith.mulf %902, %903 : vector<8x32xf32>
    %905 = vector.broadcast %752 : vector<1x32xf32> to vector<8x32xf32>
    %906 = arith.addf %904, %905 : vector<8x32xf32>
    %c5 = arith.constant 5 : index
    %c0_386 = arith.constant 0 : index
    %c0_387 = arith.constant 0 : index
    %907 = vector.load %arg4[%c5, %c0_386, %c0_387] : memref<6x32x96xf32, #tpu.memory_space<vmem>>, vector<1x32x96xf32>
    %908 = vector.shape_cast %907 : vector<1x32x96xf32> to vector<32x96xf32>
    %c5_388 = arith.constant 5 : index
    %c0_389 = arith.constant 0 : index
    %c0_390 = arith.constant 0 : index
    %909 = vector.load %arg5[%c5_388, %c0_389, %c0_390] : memref<6x1x96xf32, #tpu.memory_space<vmem>>, vector<1x1x96xf32>
    %910 = vector.shape_cast %909 : vector<1x1x96xf32> to vector<1x96xf32>
    %c5_391 = arith.constant 5 : index
    %c0_392 = arith.constant 0 : index
    %c0_393 = arith.constant 0 : index
    %c0_394 = arith.constant 0 : index
    %911 = vector.load %arg6[%c5_391, %c0_392, %c0_393, %c0_394] : memref<6x4x8x32xf32, #tpu.memory_space<vmem>>, vector<1x4x8x32xf32>
    %912 = vector.shape_cast %911 : vector<1x4x8x32xf32> to vector<4x8x32xf32>
    %c5_395 = arith.constant 5 : index
    %c0_396 = arith.constant 0 : index
    %c0_397 = arith.constant 0 : index
    %913 = vector.load %arg7[%c5_395, %c0_396, %c0_397] : memref<6x1x32xf32, #tpu.memory_space<vmem>>, vector<1x1x32xf32>
    %914 = vector.shape_cast %913 : vector<1x1x32xf32> to vector<1x32xf32>
    %c5_398 = arith.constant 5 : index
    %c0_399 = arith.constant 0 : index
    %c0_400 = arith.constant 0 : index
    %915 = vector.load %arg8[%c5_398, %c0_399, %c0_400] : memref<6x1x32xf32, #tpu.memory_space<vmem>>, vector<1x1x32xf32>
    %916 = vector.shape_cast %915 : vector<1x1x32xf32> to vector<1x32xf32>
    %c5_401 = arith.constant 5 : index
    %c0_402 = arith.constant 0 : index
    %c0_403 = arith.constant 0 : index
    %917 = vector.load %arg9[%c5_401, %c0_402, %c0_403] : memref<6x1x32xf32, #tpu.memory_space<vmem>>, vector<1x1x32xf32>
    %918 = vector.shape_cast %917 : vector<1x1x32xf32> to vector<1x32xf32>
    %c5_404 = arith.constant 5 : index
    %c0_405 = arith.constant 0 : index
    %c0_406 = arith.constant 0 : index
    %919 = vector.load %arg10[%c5_404, %c0_405, %c0_406] : memref<6x32x32xf32, #tpu.memory_space<vmem>>, vector<1x32x32xf32>
    %920 = vector.shape_cast %919 : vector<1x32x32xf32> to vector<32x32xf32>
    %c5_407 = arith.constant 5 : index
    %c0_408 = arith.constant 0 : index
    %c0_409 = arith.constant 0 : index
    %921 = vector.load %arg11[%c5_407, %c0_408, %c0_409] : memref<6x1x32xf32, #tpu.memory_space<vmem>>, vector<1x1x32xf32>
    %922 = vector.shape_cast %921 : vector<1x1x32xf32> to vector<1x32xf32>
    %c5_410 = arith.constant 5 : index
    %c0_411 = arith.constant 0 : index
    %c0_412 = arith.constant 0 : index
    %923 = vector.load %arg12[%c5_410, %c0_411, %c0_412] : memref<6x32x32xf32, #tpu.memory_space<vmem>>, vector<1x32x32xf32>
    %924 = vector.shape_cast %923 : vector<1x32x32xf32> to vector<32x32xf32>
    %c5_413 = arith.constant 5 : index
    %c0_414 = arith.constant 0 : index
    %c0_415 = arith.constant 0 : index
    %925 = vector.load %arg13[%c5_413, %c0_414, %c0_415] : memref<6x1x32xf32, #tpu.memory_space<vmem>>, vector<1x1x32xf32>
    %926 = vector.shape_cast %925 : vector<1x1x32xf32> to vector<1x32xf32>
    %c5_416 = arith.constant 5 : index
    %c0_417 = arith.constant 0 : index
    %c0_418 = arith.constant 0 : index
    %927 = vector.load %arg14[%c5_416, %c0_417, %c0_418] : memref<6x1x32xf32, #tpu.memory_space<vmem>>, vector<1x1x32xf32>
    %928 = vector.shape_cast %927 : vector<1x1x32xf32> to vector<1x32xf32>
    %c5_419 = arith.constant 5 : index
    %c0_420 = arith.constant 0 : index
    %c0_421 = arith.constant 0 : index
    %929 = vector.load %arg15[%c5_419, %c0_420, %c0_421] : memref<6x1x32xf32, #tpu.memory_space<vmem>>, vector<1x1x32xf32>
    %930 = vector.shape_cast %929 : vector<1x1x32xf32> to vector<1x32xf32>
    %cst_422 = arith.constant dense<0.000000e+00> : vector<8x96xf32>
    %931 = tpu.matmul %906, %908, %cst_422 {dimension_numbers = #tpu.dot_dimension_numbers<[1], [0], [0], [1], [0, 0, 1, 1], [], []>} : vector<8x32xf32>, vector<32x96xf32>, vector<8x96xf32> -> vector<8x96xf32>
    %932 = vector.broadcast %910 : vector<1x96xf32> to vector<8x96xf32>
    %933 = arith.addf %931, %932 : vector<8x96xf32>
    %934 = vector.extract_strided_slice %933 {offsets = [0, 0], sizes = [8, 32], strides = [1, 1]} : vector<8x96xf32> to vector<8x32xf32>
    %935 = vector.extract_strided_slice %933 {offsets = [0, 32], sizes = [8, 32], strides = [1, 1]} : vector<8x96xf32> to vector<8x32xf32>
    %936 = vector.extract_strided_slice %933 {offsets = [0, 64], sizes = [8, 32], strides = [1, 1]} : vector<8x96xf32> to vector<8x32xf32>
    %cst_423 = arith.constant 0.000000e+00 : f32
    %937 = vector.broadcast %cst_423 : f32 to vector<8x32xf32>
    %938 = vector.extract_strided_slice %934 {offsets = [0, 0], sizes = [8, 8], strides = [1, 1]} : vector<8x32xf32> to vector<8x8xf32>
    %939 = vector.extract_strided_slice %935 {offsets = [0, 0], sizes = [8, 8], strides = [1, 1]} : vector<8x32xf32> to vector<8x8xf32>
    %940 = vector.extract_strided_slice %936 {offsets = [0, 0], sizes = [8, 8], strides = [1, 1]} : vector<8x32xf32> to vector<8x8xf32>
    %941 = tpu.transpose %939, [1, 0] : vector<8x8xf32> -> vector<8x8xf32>
    %cst_424 = arith.constant dense<0.000000e+00> : vector<8x8xf32>
    %942 = tpu.matmul %938, %941, %cst_424 {dimension_numbers = #tpu.dot_dimension_numbers<[1], [0], [0], [1], [0, 0, 1, 1], [], []>} : vector<8x8xf32>, vector<8x8xf32>, vector<8x8xf32> -> vector<8x8xf32>
    %cst_425 = arith.constant 0.353553385 : f32
    %943 = vector.broadcast %cst_425 : f32 to vector<8x8xf32>
    %944 = arith.mulf %942, %943 : vector<8x8xf32>
    %cst_426 = arith.constant dense<0xFF800000> : vector<8xf32>
    %945 = vector.multi_reduction <maximumf>, %944, %cst_426 [1] : vector<8x8xf32> to vector<8xf32>
    %946 = vector.shape_cast %945 : vector<8xf32> to vector<8x1xf32>
    %947 = vector.broadcast %946 : vector<8x1xf32> to vector<8x8xf32>
    %948 = arith.subf %944, %947 : vector<8x8xf32>
    %949 = math.exp %948 : vector<8x8xf32>
    %cst_427 = arith.constant dense<0.000000e+00> : vector<8xf32>
    %950 = vector.multi_reduction <add>, %949, %cst_427 [1] : vector<8x8xf32> to vector<8xf32>
    %951 = vector.shape_cast %950 : vector<8xf32> to vector<8x1xf32>
    %952 = tpu.reciprocal %951 {approx = true} : vector<8x1xf32> -> vector<8x1xf32>
    %953 = vector.broadcast %952 : vector<8x1xf32> to vector<8x8xf32>
    %954 = arith.mulf %949, %953 : vector<8x8xf32>
    %cst_428 = arith.constant dense<0.000000e+00> : vector<8x8xf32>
    %955 = tpu.matmul %954, %940, %cst_428 {dimension_numbers = #tpu.dot_dimension_numbers<[1], [0], [0], [1], [0, 0, 1, 1], [], []>} : vector<8x8xf32>, vector<8x8xf32>, vector<8x8xf32> -> vector<8x8xf32>
    %956 = vector.extract_strided_slice %912 {offsets = [0, 0, 0], sizes = [1, 8, 32], strides = [1, 1, 1]} : vector<4x8x32xf32> to vector<1x8x32xf32>
    %957 = vector.shape_cast %956 : vector<1x8x32xf32> to vector<8x32xf32>
    %cst_429 = arith.constant dense<0.000000e+00> : vector<8x32xf32>
    %958 = tpu.matmul %955, %957, %cst_429 {dimension_numbers = #tpu.dot_dimension_numbers<[1], [0], [0], [1], [0, 0, 1, 1], [], []>} : vector<8x8xf32>, vector<8x32xf32>, vector<8x32xf32> -> vector<8x32xf32>
    %959 = arith.addf %937, %958 : vector<8x32xf32>
    %960 = vector.extract_strided_slice %934 {offsets = [0, 8], sizes = [8, 8], strides = [1, 1]} : vector<8x32xf32> to vector<8x8xf32>
    %961 = vector.extract_strided_slice %935 {offsets = [0, 8], sizes = [8, 8], strides = [1, 1]} : vector<8x32xf32> to vector<8x8xf32>
    %962 = vector.extract_strided_slice %936 {offsets = [0, 8], sizes = [8, 8], strides = [1, 1]} : vector<8x32xf32> to vector<8x8xf32>
    %963 = tpu.transpose %961, [1, 0] : vector<8x8xf32> -> vector<8x8xf32>
    %cst_430 = arith.constant dense<0.000000e+00> : vector<8x8xf32>
    %964 = tpu.matmul %960, %963, %cst_430 {dimension_numbers = #tpu.dot_dimension_numbers<[1], [0], [0], [1], [0, 0, 1, 1], [], []>} : vector<8x8xf32>, vector<8x8xf32>, vector<8x8xf32> -> vector<8x8xf32>
    %cst_431 = arith.constant 0.353553385 : f32
    %965 = vector.broadcast %cst_431 : f32 to vector<8x8xf32>
    %966 = arith.mulf %964, %965 : vector<8x8xf32>
    %cst_432 = arith.constant dense<0xFF800000> : vector<8xf32>
    %967 = vector.multi_reduction <maximumf>, %966, %cst_432 [1] : vector<8x8xf32> to vector<8xf32>
    %968 = vector.shape_cast %967 : vector<8xf32> to vector<8x1xf32>
    %969 = vector.broadcast %968 : vector<8x1xf32> to vector<8x8xf32>
    %970 = arith.subf %966, %969 : vector<8x8xf32>
    %971 = math.exp %970 : vector<8x8xf32>
    %cst_433 = arith.constant dense<0.000000e+00> : vector<8xf32>
    %972 = vector.multi_reduction <add>, %971, %cst_433 [1] : vector<8x8xf32> to vector<8xf32>
    %973 = vector.shape_cast %972 : vector<8xf32> to vector<8x1xf32>
    %974 = tpu.reciprocal %973 {approx = true} : vector<8x1xf32> -> vector<8x1xf32>
    %975 = vector.broadcast %974 : vector<8x1xf32> to vector<8x8xf32>
    %976 = arith.mulf %971, %975 : vector<8x8xf32>
    %cst_434 = arith.constant dense<0.000000e+00> : vector<8x8xf32>
    %977 = tpu.matmul %976, %962, %cst_434 {dimension_numbers = #tpu.dot_dimension_numbers<[1], [0], [0], [1], [0, 0, 1, 1], [], []>} : vector<8x8xf32>, vector<8x8xf32>, vector<8x8xf32> -> vector<8x8xf32>
    %978 = vector.extract_strided_slice %912 {offsets = [1, 0, 0], sizes = [1, 8, 32], strides = [1, 1, 1]} : vector<4x8x32xf32> to vector<1x8x32xf32>
    %979 = vector.shape_cast %978 : vector<1x8x32xf32> to vector<8x32xf32>
    %cst_435 = arith.constant dense<0.000000e+00> : vector<8x32xf32>
    %980 = tpu.matmul %977, %979, %cst_435 {dimension_numbers = #tpu.dot_dimension_numbers<[1], [0], [0], [1], [0, 0, 1, 1], [], []>} : vector<8x8xf32>, vector<8x32xf32>, vector<8x32xf32> -> vector<8x32xf32>
    %981 = arith.addf %959, %980 : vector<8x32xf32>
    %982 = vector.extract_strided_slice %934 {offsets = [0, 16], sizes = [8, 8], strides = [1, 1]} : vector<8x32xf32> to vector<8x8xf32>
    %983 = vector.extract_strided_slice %935 {offsets = [0, 16], sizes = [8, 8], strides = [1, 1]} : vector<8x32xf32> to vector<8x8xf32>
    %984 = vector.extract_strided_slice %936 {offsets = [0, 16], sizes = [8, 8], strides = [1, 1]} : vector<8x32xf32> to vector<8x8xf32>
    %985 = tpu.transpose %983, [1, 0] : vector<8x8xf32> -> vector<8x8xf32>
    %cst_436 = arith.constant dense<0.000000e+00> : vector<8x8xf32>
    %986 = tpu.matmul %982, %985, %cst_436 {dimension_numbers = #tpu.dot_dimension_numbers<[1], [0], [0], [1], [0, 0, 1, 1], [], []>} : vector<8x8xf32>, vector<8x8xf32>, vector<8x8xf32> -> vector<8x8xf32>
    %cst_437 = arith.constant 0.353553385 : f32
    %987 = vector.broadcast %cst_437 : f32 to vector<8x8xf32>
    %988 = arith.mulf %986, %987 : vector<8x8xf32>
    %cst_438 = arith.constant dense<0xFF800000> : vector<8xf32>
    %989 = vector.multi_reduction <maximumf>, %988, %cst_438 [1] : vector<8x8xf32> to vector<8xf32>
    %990 = vector.shape_cast %989 : vector<8xf32> to vector<8x1xf32>
    %991 = vector.broadcast %990 : vector<8x1xf32> to vector<8x8xf32>
    %992 = arith.subf %988, %991 : vector<8x8xf32>
    %993 = math.exp %992 : vector<8x8xf32>
    %cst_439 = arith.constant dense<0.000000e+00> : vector<8xf32>
    %994 = vector.multi_reduction <add>, %993, %cst_439 [1] : vector<8x8xf32> to vector<8xf32>
    %995 = vector.shape_cast %994 : vector<8xf32> to vector<8x1xf32>
    %996 = tpu.reciprocal %995 {approx = true} : vector<8x1xf32> -> vector<8x1xf32>
    %997 = vector.broadcast %996 : vector<8x1xf32> to vector<8x8xf32>
    %998 = arith.mulf %993, %997 : vector<8x8xf32>
    %cst_440 = arith.constant dense<0.000000e+00> : vector<8x8xf32>
    %999 = tpu.matmul %998, %984, %cst_440 {dimension_numbers = #tpu.dot_dimension_numbers<[1], [0], [0], [1], [0, 0, 1, 1], [], []>} : vector<8x8xf32>, vector<8x8xf32>, vector<8x8xf32> -> vector<8x8xf32>
    %1000 = vector.extract_strided_slice %912 {offsets = [2, 0, 0], sizes = [1, 8, 32], strides = [1, 1, 1]} : vector<4x8x32xf32> to vector<1x8x32xf32>
    %1001 = vector.shape_cast %1000 : vector<1x8x32xf32> to vector<8x32xf32>
    %cst_441 = arith.constant dense<0.000000e+00> : vector<8x32xf32>
    %1002 = tpu.matmul %999, %1001, %cst_441 {dimension_numbers = #tpu.dot_dimension_numbers<[1], [0], [0], [1], [0, 0, 1, 1], [], []>} : vector<8x8xf32>, vector<8x32xf32>, vector<8x32xf32> -> vector<8x32xf32>
    %1003 = arith.addf %981, %1002 : vector<8x32xf32>
    %1004 = vector.extract_strided_slice %934 {offsets = [0, 24], sizes = [8, 8], strides = [1, 1]} : vector<8x32xf32> to vector<8x8xf32>
    %1005 = vector.extract_strided_slice %935 {offsets = [0, 24], sizes = [8, 8], strides = [1, 1]} : vector<8x32xf32> to vector<8x8xf32>
    %1006 = vector.extract_strided_slice %936 {offsets = [0, 24], sizes = [8, 8], strides = [1, 1]} : vector<8x32xf32> to vector<8x8xf32>
    %1007 = tpu.transpose %1005, [1, 0] : vector<8x8xf32> -> vector<8x8xf32>
    %cst_442 = arith.constant dense<0.000000e+00> : vector<8x8xf32>
    %1008 = tpu.matmul %1004, %1007, %cst_442 {dimension_numbers = #tpu.dot_dimension_numbers<[1], [0], [0], [1], [0, 0, 1, 1], [], []>} : vector<8x8xf32>, vector<8x8xf32>, vector<8x8xf32> -> vector<8x8xf32>
    %cst_443 = arith.constant 0.353553385 : f32
    %1009 = vector.broadcast %cst_443 : f32 to vector<8x8xf32>
    %1010 = arith.mulf %1008, %1009 : vector<8x8xf32>
    %cst_444 = arith.constant dense<0xFF800000> : vector<8xf32>
    %1011 = vector.multi_reduction <maximumf>, %1010, %cst_444 [1] : vector<8x8xf32> to vector<8xf32>
    %1012 = vector.shape_cast %1011 : vector<8xf32> to vector<8x1xf32>
    %1013 = vector.broadcast %1012 : vector<8x1xf32> to vector<8x8xf32>
    %1014 = arith.subf %1010, %1013 : vector<8x8xf32>
    %1015 = math.exp %1014 : vector<8x8xf32>
    %cst_445 = arith.constant dense<0.000000e+00> : vector<8xf32>
    %1016 = vector.multi_reduction <add>, %1015, %cst_445 [1] : vector<8x8xf32> to vector<8xf32>
    %1017 = vector.shape_cast %1016 : vector<8xf32> to vector<8x1xf32>
    %1018 = tpu.reciprocal %1017 {approx = true} : vector<8x1xf32> -> vector<8x1xf32>
    %1019 = vector.broadcast %1018 : vector<8x1xf32> to vector<8x8xf32>
    %1020 = arith.mulf %1015, %1019 : vector<8x8xf32>
    %cst_446 = arith.constant dense<0.000000e+00> : vector<8x8xf32>
    %1021 = tpu.matmul %1020, %1006, %cst_446 {dimension_numbers = #tpu.dot_dimension_numbers<[1], [0], [0], [1], [0, 0, 1, 1], [], []>} : vector<8x8xf32>, vector<8x8xf32>, vector<8x8xf32> -> vector<8x8xf32>
    %1022 = vector.extract_strided_slice %912 {offsets = [3, 0, 0], sizes = [1, 8, 32], strides = [1, 1, 1]} : vector<4x8x32xf32> to vector<1x8x32xf32>
    %1023 = vector.shape_cast %1022 : vector<1x8x32xf32> to vector<8x32xf32>
    %cst_447 = arith.constant dense<0.000000e+00> : vector<8x32xf32>
    %1024 = tpu.matmul %1021, %1023, %cst_447 {dimension_numbers = #tpu.dot_dimension_numbers<[1], [0], [0], [1], [0, 0, 1, 1], [], []>} : vector<8x8xf32>, vector<8x32xf32>, vector<8x32xf32> -> vector<8x32xf32>
    %1025 = arith.addf %1003, %1024 : vector<8x32xf32>
    %1026 = vector.broadcast %914 : vector<1x32xf32> to vector<8x32xf32>
    %1027 = arith.addf %1025, %1026 : vector<8x32xf32>
    %1028 = arith.addf %906, %1027 : vector<8x32xf32>
    %cst_448 = arith.constant dense<0.000000e+00> : vector<8xf32>
    %1029 = vector.multi_reduction <add>, %1028, %cst_448 [1] : vector<8x32xf32> to vector<8xf32>
    %1030 = vector.shape_cast %1029 : vector<8xf32> to vector<8x1xf32>
    %cst_449 = arith.constant 3.200000e+01 : f32
    %1031 = vector.broadcast %cst_449 : f32 to vector<8x1xf32>
    %1032 = arith.divf %1030, %1031 : vector<8x1xf32>
    %1033 = vector.broadcast %1032 : vector<8x1xf32> to vector<8x32xf32>
    %1034 = arith.subf %1028, %1033 : vector<8x32xf32>
    %1035 = arith.mulf %1034, %1034 : vector<8x32xf32>
    %cst_450 = arith.constant dense<0.000000e+00> : vector<8xf32>
    %1036 = vector.multi_reduction <add>, %1035, %cst_450 [1] : vector<8x32xf32> to vector<8xf32>
    %1037 = vector.shape_cast %1036 : vector<8xf32> to vector<8x1xf32>
    %cst_451 = arith.constant 3.200000e+01 : f32
    %1038 = vector.broadcast %cst_451 : f32 to vector<8x1xf32>
    %1039 = arith.divf %1037, %1038 : vector<8x1xf32>
    %1040 = vector.broadcast %1032 : vector<8x1xf32> to vector<8x32xf32>
    %1041 = arith.subf %1028, %1040 : vector<8x32xf32>
    %cst_452 = arith.constant 9.99999974E-6 : f32
    %1042 = vector.broadcast %cst_452 : f32 to vector<8x1xf32>
    %1043 = arith.addf %1039, %1042 : vector<8x1xf32>
    %1044 = math.rsqrt %1043 : vector<8x1xf32>
    %1045 = vector.broadcast %1044 : vector<8x1xf32> to vector<8x32xf32>
    %1046 = arith.mulf %1041, %1045 : vector<8x32xf32>
    %1047 = vector.broadcast %916 : vector<1x32xf32> to vector<8x32xf32>
    %1048 = arith.mulf %1046, %1047 : vector<8x32xf32>
    %1049 = vector.broadcast %918 : vector<1x32xf32> to vector<8x32xf32>
    %1050 = arith.addf %1048, %1049 : vector<8x32xf32>
    %cst_453 = arith.constant dense<0.000000e+00> : vector<8x32xf32>
    %1051 = tpu.matmul %1050, %920, %cst_453 {dimension_numbers = #tpu.dot_dimension_numbers<[1], [0], [0], [1], [0, 0, 1, 1], [], []>} : vector<8x32xf32>, vector<32x32xf32>, vector<8x32xf32> -> vector<8x32xf32>
    %1052 = vector.broadcast %922 : vector<1x32xf32> to vector<8x32xf32>
    %1053 = arith.addf %1051, %1052 : vector<8x32xf32>
    %cst_454 = arith.constant 0.000000e+00 : f32
    %1054 = vector.broadcast %cst_454 : f32 to vector<8x32xf32>
    %1055 = arith.cmpf oge, %1053, %1054 : vector<8x32xf32>
    %cst_455 = arith.constant 0.00999999977 : f32
    %1056 = vector.broadcast %cst_455 : f32 to vector<8x32xf32>
    %1057 = arith.mulf %1056, %1053 : vector<8x32xf32>
    %1058 = arith.select %1055, %1053, %1057 : vector<8x32xi1>, vector<8x32xf32>
    %cst_456 = arith.constant dense<0.000000e+00> : vector<8x32xf32>
    %1059 = tpu.matmul %1058, %924, %cst_456 {dimension_numbers = #tpu.dot_dimension_numbers<[1], [0], [0], [1], [0, 0, 1, 1], [], []>} : vector<8x32xf32>, vector<32x32xf32>, vector<8x32xf32> -> vector<8x32xf32>
    %1060 = vector.broadcast %926 : vector<1x32xf32> to vector<8x32xf32>
    %1061 = arith.addf %1059, %1060 : vector<8x32xf32>
    %1062 = arith.addf %1050, %1061 : vector<8x32xf32>
    %cst_457 = arith.constant dense<0.000000e+00> : vector<8xf32>
    %1063 = vector.multi_reduction <add>, %1062, %cst_457 [1] : vector<8x32xf32> to vector<8xf32>
    %1064 = vector.shape_cast %1063 : vector<8xf32> to vector<8x1xf32>
    %cst_458 = arith.constant 3.200000e+01 : f32
    %1065 = vector.broadcast %cst_458 : f32 to vector<8x1xf32>
    %1066 = arith.divf %1064, %1065 : vector<8x1xf32>
    %1067 = vector.broadcast %1066 : vector<8x1xf32> to vector<8x32xf32>
    %1068 = arith.subf %1062, %1067 : vector<8x32xf32>
    %1069 = arith.mulf %1068, %1068 : vector<8x32xf32>
    %cst_459 = arith.constant dense<0.000000e+00> : vector<8xf32>
    %1070 = vector.multi_reduction <add>, %1069, %cst_459 [1] : vector<8x32xf32> to vector<8xf32>
    %1071 = vector.shape_cast %1070 : vector<8xf32> to vector<8x1xf32>
    %cst_460 = arith.constant 3.200000e+01 : f32
    %1072 = vector.broadcast %cst_460 : f32 to vector<8x1xf32>
    %1073 = arith.divf %1071, %1072 : vector<8x1xf32>
    %1074 = vector.broadcast %1066 : vector<8x1xf32> to vector<8x32xf32>
    %1075 = arith.subf %1062, %1074 : vector<8x32xf32>
    %cst_461 = arith.constant 9.99999974E-6 : f32
    %1076 = vector.broadcast %cst_461 : f32 to vector<8x1xf32>
    %1077 = arith.addf %1073, %1076 : vector<8x1xf32>
    %1078 = math.rsqrt %1077 : vector<8x1xf32>
    %1079 = vector.broadcast %1078 : vector<8x1xf32> to vector<8x32xf32>
    %1080 = arith.mulf %1075, %1079 : vector<8x32xf32>
    %1081 = vector.broadcast %928 : vector<1x32xf32> to vector<8x32xf32>
    %1082 = arith.mulf %1080, %1081 : vector<8x32xf32>
    %1083 = vector.broadcast %930 : vector<1x32xf32> to vector<8x32xf32>
    %1084 = arith.addf %1082, %1083 : vector<8x32xf32>
    %c0_462 = arith.constant 0 : index
    %c0_463 = arith.constant 0 : index
    %1085 = vector.load %arg17[%c0_462, %c0_463] : memref<1x16xf32, #tpu.memory_space<vmem>>, vector<1x16xf32>
    %1086 = vector.extract_strided_slice %1084 {offsets = [0, 0], sizes = [1, 32], strides = [1, 1]} : vector<8x32xf32> to vector<1x32xf32>
    %c0_464 = arith.constant 0 : index
    %c0_465 = arith.constant 0 : index
    %c0_466 = arith.constant 0 : index
    %1087 = vector.load %arg16[%c0_464, %c0_465, %c0_466] : memref<8x32x16xf32, #tpu.memory_space<vmem>>, vector<1x32x16xf32>
    %1088 = vector.shape_cast %1087 : vector<1x32x16xf32> to vector<32x16xf32>
    %cst_467 = arith.constant dense<0.000000e+00> : vector<1x16xf32>
    %1089 = tpu.matmul %1086, %1088, %cst_467 {dimension_numbers = #tpu.dot_dimension_numbers<[1], [0], [0], [1], [0, 0, 1, 1], [], []>} : vector<1x32xf32>, vector<32x16xf32>, vector<1x16xf32> -> vector<1x16xf32>
    %1090 = arith.addf %1085, %1089 : vector<1x16xf32>
    %1091 = vector.extract_strided_slice %1084 {offsets = [1, 0], sizes = [1, 32], strides = [1, 1]} : vector<8x32xf32> to vector<1x32xf32>
    %c1_468 = arith.constant 1 : index
    %c0_469 = arith.constant 0 : index
    %c0_470 = arith.constant 0 : index
    %1092 = vector.load %arg16[%c1_468, %c0_469, %c0_470] : memref<8x32x16xf32, #tpu.memory_space<vmem>>, vector<1x32x16xf32>
    %1093 = vector.shape_cast %1092 : vector<1x32x16xf32> to vector<32x16xf32>
    %cst_471 = arith.constant dense<0.000000e+00> : vector<1x16xf32>
    %1094 = tpu.matmul %1091, %1093, %cst_471 {dimension_numbers = #tpu.dot_dimension_numbers<[1], [0], [0], [1], [0, 0, 1, 1], [], []>} : vector<1x32xf32>, vector<32x16xf32>, vector<1x16xf32> -> vector<1x16xf32>
    %1095 = arith.addf %1090, %1094 : vector<1x16xf32>
    %1096 = vector.extract_strided_slice %1084 {offsets = [2, 0], sizes = [1, 32], strides = [1, 1]} : vector<8x32xf32> to vector<1x32xf32>
    %c2_472 = arith.constant 2 : index
    %c0_473 = arith.constant 0 : index
    %c0_474 = arith.constant 0 : index
    %1097 = vector.load %arg16[%c2_472, %c0_473, %c0_474] : memref<8x32x16xf32, #tpu.memory_space<vmem>>, vector<1x32x16xf32>
    %1098 = vector.shape_cast %1097 : vector<1x32x16xf32> to vector<32x16xf32>
    %cst_475 = arith.constant dense<0.000000e+00> : vector<1x16xf32>
    %1099 = tpu.matmul %1096, %1098, %cst_475 {dimension_numbers = #tpu.dot_dimension_numbers<[1], [0], [0], [1], [0, 0, 1, 1], [], []>} : vector<1x32xf32>, vector<32x16xf32>, vector<1x16xf32> -> vector<1x16xf32>
    %1100 = arith.addf %1095, %1099 : vector<1x16xf32>
    %1101 = vector.extract_strided_slice %1084 {offsets = [3, 0], sizes = [1, 32], strides = [1, 1]} : vector<8x32xf32> to vector<1x32xf32>
    %c3_476 = arith.constant 3 : index
    %c0_477 = arith.constant 0 : index
    %c0_478 = arith.constant 0 : index
    %1102 = vector.load %arg16[%c3_476, %c0_477, %c0_478] : memref<8x32x16xf32, #tpu.memory_space<vmem>>, vector<1x32x16xf32>
    %1103 = vector.shape_cast %1102 : vector<1x32x16xf32> to vector<32x16xf32>
    %cst_479 = arith.constant dense<0.000000e+00> : vector<1x16xf32>
    %1104 = tpu.matmul %1101, %1103, %cst_479 {dimension_numbers = #tpu.dot_dimension_numbers<[1], [0], [0], [1], [0, 0, 1, 1], [], []>} : vector<1x32xf32>, vector<32x16xf32>, vector<1x16xf32> -> vector<1x16xf32>
    %1105 = arith.addf %1100, %1104 : vector<1x16xf32>
    %1106 = vector.extract_strided_slice %1084 {offsets = [4, 0], sizes = [1, 32], strides = [1, 1]} : vector<8x32xf32> to vector<1x32xf32>
    %c4_480 = arith.constant 4 : index
    %c0_481 = arith.constant 0 : index
    %c0_482 = arith.constant 0 : index
    %1107 = vector.load %arg16[%c4_480, %c0_481, %c0_482] : memref<8x32x16xf32, #tpu.memory_space<vmem>>, vector<1x32x16xf32>
    %1108 = vector.shape_cast %1107 : vector<1x32x16xf32> to vector<32x16xf32>
    %cst_483 = arith.constant dense<0.000000e+00> : vector<1x16xf32>
    %1109 = tpu.matmul %1106, %1108, %cst_483 {dimension_numbers = #tpu.dot_dimension_numbers<[1], [0], [0], [1], [0, 0, 1, 1], [], []>} : vector<1x32xf32>, vector<32x16xf32>, vector<1x16xf32> -> vector<1x16xf32>
    %1110 = arith.addf %1105, %1109 : vector<1x16xf32>
    %1111 = vector.extract_strided_slice %1084 {offsets = [5, 0], sizes = [1, 32], strides = [1, 1]} : vector<8x32xf32> to vector<1x32xf32>
    %c5_484 = arith.constant 5 : index
    %c0_485 = arith.constant 0 : index
    %c0_486 = arith.constant 0 : index
    %1112 = vector.load %arg16[%c5_484, %c0_485, %c0_486] : memref<8x32x16xf32, #tpu.memory_space<vmem>>, vector<1x32x16xf32>
    %1113 = vector.shape_cast %1112 : vector<1x32x16xf32> to vector<32x16xf32>
    %cst_487 = arith.constant dense<0.000000e+00> : vector<1x16xf32>
    %1114 = tpu.matmul %1111, %1113, %cst_487 {dimension_numbers = #tpu.dot_dimension_numbers<[1], [0], [0], [1], [0, 0, 1, 1], [], []>} : vector<1x32xf32>, vector<32x16xf32>, vector<1x16xf32> -> vector<1x16xf32>
    %1115 = arith.addf %1110, %1114 : vector<1x16xf32>
    %1116 = vector.extract_strided_slice %1084 {offsets = [6, 0], sizes = [1, 32], strides = [1, 1]} : vector<8x32xf32> to vector<1x32xf32>
    %c6 = arith.constant 6 : index
    %c0_488 = arith.constant 0 : index
    %c0_489 = arith.constant 0 : index
    %1117 = vector.load %arg16[%c6, %c0_488, %c0_489] : memref<8x32x16xf32, #tpu.memory_space<vmem>>, vector<1x32x16xf32>
    %1118 = vector.shape_cast %1117 : vector<1x32x16xf32> to vector<32x16xf32>
    %cst_490 = arith.constant dense<0.000000e+00> : vector<1x16xf32>
    %1119 = tpu.matmul %1116, %1118, %cst_490 {dimension_numbers = #tpu.dot_dimension_numbers<[1], [0], [0], [1], [0, 0, 1, 1], [], []>} : vector<1x32xf32>, vector<32x16xf32>, vector<1x16xf32> -> vector<1x16xf32>
    %1120 = arith.addf %1115, %1119 : vector<1x16xf32>
    %1121 = vector.extract_strided_slice %1084 {offsets = [7, 0], sizes = [1, 32], strides = [1, 1]} : vector<8x32xf32> to vector<1x32xf32>
    %c7 = arith.constant 7 : index
    %c0_491 = arith.constant 0 : index
    %c0_492 = arith.constant 0 : index
    %1122 = vector.load %arg16[%c7, %c0_491, %c0_492] : memref<8x32x16xf32, #tpu.memory_space<vmem>>, vector<1x32x16xf32>
    %1123 = vector.shape_cast %1122 : vector<1x32x16xf32> to vector<32x16xf32>
    %cst_493 = arith.constant dense<0.000000e+00> : vector<1x16xf32>
    %1124 = tpu.matmul %1121, %1123, %cst_493 {dimension_numbers = #tpu.dot_dimension_numbers<[1], [0], [0], [1], [0, 0, 1, 1], [], []>} : vector<1x32xf32>, vector<32x16xf32>, vector<1x16xf32> -> vector<1x16xf32>
    %1125 = arith.addf %1120, %1124 : vector<1x16xf32>
    %c0_494 = arith.constant 0 : index
    %c0_495 = arith.constant 0 : index
    %1126 = vector.load %arg18[%c0_494, %c0_495] : memref<1x16xf32, #tpu.memory_space<vmem>>, vector<1x16xf32>
    %c0_496 = arith.constant 0 : index
    %c0_497 = arith.constant 0 : index
    %1127 = vector.load %arg19[%c0_496, %c0_497] : memref<1x16xf32, #tpu.memory_space<vmem>>, vector<1x16xf32>
    %cst_498 = arith.constant dense<0.000000e+00> : vector<1xf32>
    %1128 = vector.multi_reduction <add>, %1125, %cst_498 [1] : vector<1x16xf32> to vector<1xf32>
    %1129 = vector.shape_cast %1128 : vector<1xf32> to vector<1x1xf32>
    %cst_499 = arith.constant 1.600000e+01 : f32
    %1130 = vector.broadcast %cst_499 : f32 to vector<1x1xf32>
    %1131 = arith.divf %1129, %1130 : vector<1x1xf32>
    %1132 = vector.broadcast %1131 : vector<1x1xf32> to vector<1x16xf32>
    %1133 = arith.subf %1125, %1132 : vector<1x16xf32>
    %1134 = arith.mulf %1133, %1133 : vector<1x16xf32>
    %cst_500 = arith.constant dense<0.000000e+00> : vector<1xf32>
    %1135 = vector.multi_reduction <add>, %1134, %cst_500 [1] : vector<1x16xf32> to vector<1xf32>
    %1136 = vector.shape_cast %1135 : vector<1xf32> to vector<1x1xf32>
    %cst_501 = arith.constant 1.600000e+01 : f32
    %1137 = vector.broadcast %cst_501 : f32 to vector<1x1xf32>
    %1138 = arith.divf %1136, %1137 : vector<1x1xf32>
    %1139 = vector.broadcast %1131 : vector<1x1xf32> to vector<1x16xf32>
    %1140 = arith.subf %1125, %1139 : vector<1x16xf32>
    %cst_502 = arith.constant 9.99999974E-6 : f32
    %1141 = vector.broadcast %cst_502 : f32 to vector<1x1xf32>
    %1142 = arith.addf %1138, %1141 : vector<1x1xf32>
    %1143 = math.rsqrt %1142 : vector<1x1xf32>
    %1144 = vector.broadcast %1143 : vector<1x1xf32> to vector<1x16xf32>
    %1145 = arith.mulf %1140, %1144 : vector<1x16xf32>
    %1146 = arith.mulf %1145, %1126 : vector<1x16xf32>
    %1147 = arith.addf %1146, %1127 : vector<1x16xf32>
    %c0_503 = arith.constant 0 : index
    %c0_504 = arith.constant 0 : index
    %c0_505 = arith.constant 0 : index
    %1148 = vector.load %arg20[%c0_503, %c0_504, %c0_505] : memref<1x1x16xf32, #tpu.memory_space<vmem>>, vector<1x1x16xf32>
    %1149 = vector.shape_cast %1148 : vector<1x1x16xf32> to vector<1x16xf32>
    %1150 = vector.shape_cast %1147 : vector<1x16xf32> to vector<1x1x16xf32>
    tpu.vector_store %arg20[%c0_503, %c0_504, %c0_505], %1150 {strides = array<i32>} : memref<1x1x16xf32, #tpu.memory_space<vmem>>, vector<1x1x16xf32>,
    return
  }
  func.func @transform_0(%arg0: i32) -> (i32, i32, i32) {
    %c0_i32 = arith.constant 0 : i32
    %c0_i32_0 = arith.constant 0 : i32
    %c0_i32_1 = arith.constant 0 : i32
    return %arg0, %c0_i32, %c0_i32_0 : i32, i32, i32
  }
  func.func @transform_1(%arg0: i32) -> (i32, i32) {
    %c0_i32 = arith.constant 0 : i32
    %c0_i32_0 = arith.constant 0 : i32
    %c0_i32_1 = arith.constant 0 : i32
    return %c0_i32, %c0_i32_0 : i32, i32
  }
  func.func @transform_2(%arg0: i32) -> (i32, i32) {
    %c0_i32 = arith.constant 0 : i32
    %c0_i32_0 = arith.constant 0 : i32
    %c0_i32_1 = arith.constant 0 : i32
    return %c0_i32, %c0_i32_0 : i32, i32
  }
  func.func @transform_3(%arg0: i32) -> (i32, i32, i32) {
    %c0_i32 = arith.constant 0 : i32
    %c0_i32_0 = arith.constant 0 : i32
    %c0_i32_1 = arith.constant 0 : i32
    %c0_i32_2 = arith.constant 0 : i32
    return %c0_i32, %c0_i32_0, %c0_i32_1 : i32, i32, i32
  }
  func.func @transform_4(%arg0: i32) -> (i32, i32, i32) {
    %c0_i32 = arith.constant 0 : i32
    %c0_i32_0 = arith.constant 0 : i32
    %c0_i32_1 = arith.constant 0 : i32
    %c0_i32_2 = arith.constant 0 : i32
    return %c0_i32, %c0_i32_0, %c0_i32_1 : i32, i32, i32
  }
  func.func @transform_5(%arg0: i32) -> (i32, i32, i32, i32) {
    %c0_i32 = arith.constant 0 : i32
    %c0_i32_0 = arith.constant 0 : i32
    %c0_i32_1 = arith.constant 0 : i32
    %c0_i32_2 = arith.constant 0 : i32
    %c0_i32_3 = arith.constant 0 : i32
    return %c0_i32, %c0_i32_0, %c0_i32_1, %c0_i32_2 : i32, i32, i32, i32
  }
  func.func @transform_6(%arg0: i32) -> (i32, i32, i32) {
    %c0_i32 = arith.constant 0 : i32
    %c0_i32_0 = arith.constant 0 : i32
    %c0_i32_1 = arith.constant 0 : i32
    %c0_i32_2 = arith.constant 0 : i32
    return %c0_i32, %c0_i32_0, %c0_i32_1 : i32, i32, i32
  }
  func.func @transform_7(%arg0: i32) -> (i32, i32, i32) {
    %c0_i32 = arith.constant 0 : i32
    %c0_i32_0 = arith.constant 0 : i32
    %c0_i32_1 = arith.constant 0 : i32
    %c0_i32_2 = arith.constant 0 : i32
    return %c0_i32, %c0_i32_0, %c0_i32_1 : i32, i32, i32
  }
  func.func @transform_8(%arg0: i32) -> (i32, i32, i32) {
    %c0_i32 = arith.constant 0 : i32
    %c0_i32_0 = arith.constant 0 : i32
    %c0_i32_1 = arith.constant 0 : i32
    %c0_i32_2 = arith.constant 0 : i32
    return %c0_i32, %c0_i32_0, %c0_i32_1 : i32, i32, i32
  }
  func.func @transform_9(%arg0: i32) -> (i32, i32, i32) {
    %c0_i32 = arith.constant 0 : i32
    %c0_i32_0 = arith.constant 0 : i32
    %c0_i32_1 = arith.constant 0 : i32
    %c0_i32_2 = arith.constant 0 : i32
    return %c0_i32, %c0_i32_0, %c0_i32_1 : i32, i32, i32
  }
  func.func @transform_10(%arg0: i32) -> (i32, i32, i32) {
    %c0_i32 = arith.constant 0 : i32
    %c0_i32_0 = arith.constant 0 : i32
    %c0_i32_1 = arith.constant 0 : i32
    %c0_i32_2 = arith.constant 0 : i32
    return %c0_i32, %c0_i32_0, %c0_i32_1 : i32, i32, i32
  }
  func.func @transform_11(%arg0: i32) -> (i32, i32, i32) {
    %c0_i32 = arith.constant 0 : i32
    %c0_i32_0 = arith.constant 0 : i32
    %c0_i32_1 = arith.constant 0 : i32
    %c0_i32_2 = arith.constant 0 : i32
    return %c0_i32, %c0_i32_0, %c0_i32_1 : i32, i32, i32
  }
  func.func @transform_12(%arg0: i32) -> (i32, i32, i32) {
    %c0_i32 = arith.constant 0 : i32
    %c0_i32_0 = arith.constant 0 : i32
    %c0_i32_1 = arith.constant 0 : i32
    %c0_i32_2 = arith.constant 0 : i32
    return %c0_i32, %c0_i32_0, %c0_i32_1 : i32, i32, i32
  }
  func.func @transform_13(%arg0: i32) -> (i32, i32, i32) {
    %c0_i32 = arith.constant 0 : i32
    %c0_i32_0 = arith.constant 0 : i32
    %c0_i32_1 = arith.constant 0 : i32
    %c0_i32_2 = arith.constant 0 : i32
    return %c0_i32, %c0_i32_0, %c0_i32_1 : i32, i32, i32
  }
  func.func @transform_14(%arg0: i32) -> (i32, i32, i32) {
    %c0_i32 = arith.constant 0 : i32
    %c0_i32_0 = arith.constant 0 : i32
    %c0_i32_1 = arith.constant 0 : i32
    %c0_i32_2 = arith.constant 0 : i32
    return %c0_i32, %c0_i32_0, %c0_i32_1 : i32, i32, i32
  }
  func.func @transform_15(%arg0: i32) -> (i32, i32, i32) {
    %c0_i32 = arith.constant 0 : i32
    %c0_i32_0 = arith.constant 0 : i32
    %c0_i32_1 = arith.constant 0 : i32
    %c0_i32_2 = arith.constant 0 : i32
    return %c0_i32, %c0_i32_0, %c0_i32_1 : i32, i32, i32
  }
  func.func @transform_16(%arg0: i32) -> (i32, i32) {
    %c0_i32 = arith.constant 0 : i32
    %c0_i32_0 = arith.constant 0 : i32
    %c0_i32_1 = arith.constant 0 : i32
    return %c0_i32, %c0_i32_0 : i32, i32
  }
  func.func @transform_17(%arg0: i32) -> (i32, i32) {
    %c0_i32 = arith.constant 0 : i32
    %c0_i32_0 = arith.constant 0 : i32
    %c0_i32_1 = arith.constant 0 : i32
    return %c0_i32, %c0_i32_0 : i32, i32
  }
  func.func @transform_18(%arg0: i32) -> (i32, i32) {
    %c0_i32 = arith.constant 0 : i32
    %c0_i32_0 = arith.constant 0 : i32
    %c0_i32_1 = arith.constant 0 : i32
    return %c0_i32, %c0_i32_0 : i32, i32
  }
  func.func @transform_19(%arg0: i32) -> (i32, i32, i32) {
    %c0_i32 = arith.constant 0 : i32
    %c0_i32_0 = arith.constant 0 : i32
    %c0_i32_1 = arith.constant 0 : i32
    return %arg0, %c0_i32, %c0_i32_0 : i32, i32, i32
  }
}

</mosaic_0001>

<bundles_post_ra>
// kernel: tpu_custom_call.1
= control target key start
LH: loop header
LB: loop body
LE: loop exit
PB: predicated region body
PF: predicated region fallthrough
CT: control target
= control target key end

     0   :  { %s12442_s0 = inlined_call_operand.vmem [shape: f32[2,8,2], index: 0, kind: input, shape index: {}]   ;;  %s12443_s1 = inlined_call_operand.hbm [shape: f32[2,32], index: 1, kind: input, shape index: {}]   ;;  %s12444_s2 = inlined_call_operand.hbm [shape: f32[1,32], index: 2, kind: input, shape index: {}]   ;;  %s12445_s3 = inlined_call_operand.vmem [shape: f32[6,32,96], index: 3, kind: input, shape index: {}]   ;;  %s12446_s4 = inlined_call_operand.vmem [shape: f32[6,1,96], index: 4, kind: input, shape index: {}]   ;;  %s12447_s5 = inlined_call_operand.vmem [shape: f32[6,4,8,32], index: 5, kind: input, shape index: {}]   ;;  %s12448_s6 = inlined_call_operand.vmem [shape: f32[6,1,32], index: 6, kind: input, shape index: {}]   ;;  %s12449_s7 = inlined_call_operand.vmem [shape: f32[6,1,32], index: 7, kind: input, shape index: {}]   ;;  %s12450_s8 = inlined_call_operand.vmem [shape: f32[6,1,32], index: 8, kind: input, shape index: {}]   ;;  %s12451_s9 = inlined_call_operand.hbm [shape: f32[6,32,32], index: 9, kind: input, shape index: {}]   ;;  %s12452_s10 = inlined_call_operand.vmem [shape: f32[6,1,32], index: 10, kind: input, shape index: {}]   ;;  %s12453_s11 = inlined_call_operand.hbm [shape: f32[6,32,32], index: 11, kind: input, shape index: {}]   ;;  %s12454_s12 = inlined_call_operand.vmem [shape: f32[6,1,32], index: 12, kind: input, shape index: {}]   ;;  %s12455_s13 = inlined_call_operand.vmem [shape: f32[6,1,32], index: 13, kind: input, shape index: {}]   ;;  %s12456_s14 = inlined_call_operand.vmem [shape: f32[6,1,32], index: 14, kind: input, shape index: {}]   ;;  %s12457_s15 = inlined_call_operand.vmem [shape: f32[8,32,16], index: 15, kind: input, shape index: {}]   ;;  %s12458_s16 = inlined_call_operand.vmem [shape: f32[1,16], index: 16, kind: input, shape index: {}]   ;;  %s12459_s17 = inlined_call_operand.vmem [shape: f32[1,16], index: 17, kind: input, shape index: {}]   ;;  %s12460_s18 = inlined_call_operand.vmem [shape: f32[1,16], index: 18, kind: input, shape index: {}]   ;;  %s12461_s19 = inlined_call_operand.hbm [shape: f32[2,1,16], index: 19, kind: output, shape index: {}]  }
   0x1   :  { %12503 = sst [smem:[#allocation24_spill]] %s12442_s0 }
   0x2   :  { %12504 = sst [smem:[#allocation25_spill]] %s12443_s1 }
   0x3   :  { %12505 = sst [smem:[#allocation26_spill]] %s12444_s2 }
   0x4   :  { %12506 = sst [smem:[#allocation27_spill]] %s12445_s3 }
   0x5   :  { %12507 = sst [smem:[#allocation28_spill]] %s12451_s9 }
   0x6   :  { %12508 = sst [smem:[#allocation29_spill]] %s12453_s11 }
   0x7   :  { %12509 = sst [smem:[#allocation30_spill]] %s12459_s17 }
   0x8   :  { %12510 = sst [smem:[#allocation31_spill]] %s12460_s18 }
   0x9   :  { %12511 = sst [smem:[#allocation32_spill]] %s12461_s19 }
   0xa   :  { %24 = vsyncpa [#allocation3], 0 }
   0xb   :  { %25 = vsyncpa [#allocation6], 0 }
   0xc   :  { %26 = vsyncpa [#allocation9], 0 }
   0xd   :  { %27 = vsyncpa [#allocation4], 0 }
   0xe   :  { %29 = vsyncpa [#allocation4 + $0x1], 0  ;;  %s11129_s0 = smov 0   ;;  %s11131_s30 = smov 0  }
   0xf   :  { %s11133_s20 = smov 0   ;;  %s11135_s21 = smov 0  }
  0x10 LB: > { %12512 = sst [smem:[#allocation15_spill]] %s10992_s0  ;;  %s11150_s1 = sadd.s32 4294967295, %s11004_s21   ;;  %s11004_s21 = sphi %s11135_s21, %s12561_s21   ;;  %s11000_s20 = sphi %s11133_s20, %s12564_s20   ;;  %s10996_s30 = sphi %s11131_s30, %s12563_s30   ;;  %s10992_s0 = sphi %s11129_s0, %s12562_s0  }
  0x11   : > { %12513 = sst [smem:[#allocation16_spill]] %s10996_s30  ;;  %s9210_s22 = sadd.s32 4294967294, %s11004_s21  }
  0x12   : > { %12514 = sst [smem:[#allocation17_spill]] %s11000_s20  ;;  %s11154_s2 = sadd.s32 1, %s11004_s21  }
  0x13   : > { %12515 = sst [smem:[#allocation18_spill]] %s11004_s21  ;;  %s446_s23 = sadd.s32 1, %s11000_s20 }
  0x14   : > { %12516 = sst [smem:[#allocation19_spill]] %s11150_s1  ;;  %s443_s24 = ssub.s32 %s11004_s21, %s11154_s2 }
  0x15   : > { %12517 = sst [smem:[#allocation20_spill]] %s11154_s2  ;;  %p456_p0 = scmp.ne.s32.totalorder %s11000_s20, %s10996_s30 }
  0x16   : > { %p444_p1 = scmp.eq.s32.totalorder %s443_s24, 0  ;;  %p457_p2 = scmp.eq.s32.totalorder %s11150_s1, 1 }
  0x17   : > { %p462_p3 = scmp.ne.s32.totalorder %s10996_s30, %s10992_s0  ;;  %p463_p4 = scmp.eq.s32.totalorder %s9210_s22, 1 }
  0x18   : > { %s11165_s25 = scalar_select %p444_p1, %s11000_s20, %s446_s23  }
  0x19   : > { %p11167_p5 = por %p457_p2, %p456_p0  ;;  %p11171_p6 = por %p463_p4, %p462_p3 }
  0x1a   : > { %12518 = sst [smem:[#allocation21_spill]] %s11165_s25  ;;  %p9211_p7 = scmp.ge.s32.totalorder %s11004_s21, 1 }
  0x1b   : > { %s12519_s3 = scalar_select %p11167_p5, 1, 0 }
  0x1c   : > { %s12521_s26 = scalar_select %p11171_p6, 1, 0 }
  0x1d   : > { %12520 = sst [smem:[#allocation22_spill]] %s12519_s3  ;;  %p470_p8 = scmp.lt.s32.totalorder %s11004_s21, 3 }
  0x1e   : > { %12522 = sst [smem:[#allocation23_spill]] %s12521_s26  ;;  %p12472_p9 = scmp.eq.s32.totalorder %s11150_s1, 0 }
  0x1f   : > { %p11178_p10 = pnand %p9211_p7, %p470_p8  ;;  %s11006_s28 = smov [#allocation5]  }
  0x20   : > { %s494_s29 = sshll.u32 %s11006_s28, 4  ;;  %s11007_s22 = smov [#allocation2]   ;;  %s495_s29 = int_to_ptr.vmem [resolvable:$true] %s494_s29 }
  0x21   : > { %s12523_s27 = scalar_select %p11178_p10, 1, 0 }
  0x22   : > { %p10614_p11 = pneg %p11178_p10  ;;  %s483_s23 = sshll.u32 %s11007_s22, 4  ;;  %s11190_s23 = int_to_ptr.vmem [resolvable:$true] %s483_s23 }
  0x23   : > { %s11008_s25 = smov [#allocation7]   ;;  %s12525_s28 = sld [smem:[#allocation26_spill]] }
  0x24   : > { %p11186_p12 = pnand %p12472_p9, %p10614_p11  ;;  %s522_s20 = sshll.u32 %s11008_s25, 4  ;;  %s11192_s20 = int_to_ptr.vmem [resolvable:$true] %s522_s20 }
  0x26   : > { %p11202_p0 = pneg %p11186_p12 }
  0x29   : > { %s10818_s0 = scalar_lea.hbm %s12525_s28, 16 }
  0x2a   : > { %p10819_p13 = scmp.ne.s32.totalorder %s12525_s28, %s10818_s0  ;;  %p10825_p3 = scmp.lt.u32.totalorder %s10818_s0, %s12525_s28 }
  0x2c   : > { %p10821_p1 = pnand %p11202_p0, %p10819_p13 }
  0x2e   : > { %p10822_p2 = pneg %p10821_p1 }
  0x30   : > { %p10827_p4 = pnand %p10825_p3, %p10822_p2 }
  0x32   : > { %10830 = shalt.err (!%p10827_p4)
}
  0x33   : > { %s10831_s2 = scalar_lea.vmem %s495_s29, 16  ;;  %s10838_s19 = scalar_lea.vmem %s495_s29, 32 }
  0x34   : > { %p10832_p7 = scmp.ne.s32.totalorder %s495_s29, %s10831_s2  ;;  %p10839_p9 = scmp.lt.s32.totalorder %s495_s29, %s495_s29 }
  0x35   : > { %p10840_p6 = scmp.lt.s32.totalorder %s10838_s19, %s10831_s2 }
  0x36   : > { %p10834_p8 = pnand %p10832_p7, %p11202_p0 }
  0x37   : > { %p10841_p5 = por %p10840_p6, %p10839_p9 }
  0x38   : > { %p10835_p11 = pneg %p10834_p8 }
  0x3a   : > { %p10842_p10 = pnand %p10841_p5, %p10835_p11 }
  0x3c   : > { %10845 = shalt.err (!%p10842_p10)
}
  0x3d   : > { %10620 = dma.hbm_to_vmem [thread:$0]  (!%p11186_p12), %s12525_s28, 16, %s495_s29, [#allocation6]  }
  0x3e   : > { %s12527_s25 = sld [smem:[#allocation25_spill]] }
  0x44   : > { %s10846_s17 = scalar_lea.hbm %s12527_s25, 32 }
  0x45   : > { %p10847_p13 = scmp.ne.s32.totalorder %s12527_s25, %s10846_s17  ;;  %p10853_p5 = scmp.lt.u32.totalorder %s10846_s17, %s12527_s25 }
  0x47   : > { %p10849_p1 = pnand %p10847_p13, %p11202_p0 }
  0x49   : > { %p10850_p6 = pneg %p10849_p1 }
  0x4b   : > { %p10855_p9 = pnand %p10853_p5, %p10850_p6 }
  0x4d   : > { %10858 = shalt.err (!%p10855_p9)
}
  0x4e   : > { %s10859_s29 = scalar_lea.vmem %s11190_s23, 32  ;;  %p10867_p4 = scmp.lt.s32.totalorder %s11190_s23, %s11190_s23 }
  0x4f   : > { %p10860_p10 = scmp.ne.s32.totalorder %s11190_s23, %s10859_s29  ;;  %p10868_p7 = scmp.lt.s32.totalorder %s10859_s29, %s10859_s29 }
  0x51   : > { %p10862_p2 = pnand %p10860_p10, %p11202_p0  ;;  %p10869_p8 = por %p10868_p7, %p10867_p4 }
  0x53   : > { %p10863_p3 = pneg %p10862_p2 }
  0x55   : > { %p10870_p11 = pnand %p10869_p8, %p10863_p3 }
  0x57   : > { %10873 = shalt.err (!%p10870_p11)
}
  0x58   : > { %10617 = dma.hbm_to_vmem [thread:$0]  (!%p11186_p12), %s12527_s25, 32, %s11190_s23, [#allocation3]  }
  0x59   : > { %s12528_s9 = sld [smem:[#allocation28_spill]] }
  0x5f   : > { %s10874_s26 = scalar_lea.hbm %s12528_s9, 3072 }
  0x60   : > { %p10875_p13 = scmp.ne.s32.totalorder %s12528_s9, %s10874_s26  ;;  %p10881_p5 = scmp.lt.u32.totalorder %s10874_s26, %s12528_s9 }
  0x62   : > { %p10877_p1 = pnand %p10875_p13, %p11202_p0 }
  0x64   : > { %p10878_p6 = pneg %p10877_p1 }
  0x66   : > { %p10883_p9 = pnand %p10881_p5, %p10878_p6 }
  0x68   : > { %10886 = shalt.err (!%p10883_p9)
}
  0x69   : > { %s10887_s23 = scalar_lea.vmem %s11192_s20, 3072  ;;  %p10895_p4 = scmp.lt.s32.totalorder %s11192_s20, %s11192_s20 }
  0x6a   : > { %p10888_p10 = scmp.ne.s32.totalorder %s11192_s20, %s10887_s23  ;;  %p10896_p7 = scmp.lt.s32.totalorder %s10887_s23, %s10887_s23 }
  0x6c   : > { %p10890_p2 = pnand %p10888_p10, %p11202_p0  ;;  %p10897_p8 = por %p10896_p7, %p10895_p4 }
  0x6e   : > { %p10891_p3 = pneg %p10890_p2 }
  0x70   : > { %p10898_p11 = pnand %p10897_p8, %p10891_p3 }
  0x72   : > { %10901 = shalt.err (!%p10898_p11)
}
  0x73   : > { %s11009_s29 = smov 128   ;;  %s11010_s17 = smov 8  }
  0x74   : > { %10623 = dma.hbm_to_vmem [thread:$0]  (!%p11186_p12), %s12528_s9, 3072, %s11192_s20, [#allocation6], %s11009_s29, %s11009_s29, %s11010_s17  }
  0x75   : > { %s11011_s21 = smov [#allocation8]   ;;  %s12529_s11 = sld [smem:[#allocation29_spill]] }
  0x76   : > { %s538_s26 = sshll.u32 %s11011_s21, 4  ;;  %s539_s26 = int_to_ptr.vmem [resolvable:$true] %s538_s26 }
  0x7b   : > { %s10902_s2 = scalar_lea.hbm %s12529_s11, 3072 }
  0x7c   : > { %p10903_p13 = scmp.ne.s32.totalorder %s12529_s11, %s10902_s2  ;;  %p10909_p5 = scmp.lt.u32.totalorder %s10902_s2, %s12529_s11 }
  0x7e   : > { %p10905_p1 = pnand %p10903_p13, %p11202_p0 }
  0x80   : > { %p10906_p6 = pneg %p10905_p1 }
  0x82   : > { %p10911_p9 = pnand %p10909_p5, %p10906_p6 }
  0x84   : > { %10914 = shalt.err (!%p10911_p9)
}
  0x85   : > { %s10915_s20 = scalar_lea.vmem %s539_s26, 3072  ;;  %p10923_p4 = scmp.lt.s32.totalorder %s539_s26, %s539_s26 }
  0x86   : > { %p10916_p10 = scmp.ne.s32.totalorder %s539_s26, %s10915_s20  ;;  %p10924_p7 = scmp.lt.s32.totalorder %s10915_s20, %s10915_s20 }
  0x88   : > { %p10918_p2 = pnand %p10916_p10, %p11202_p0  ;;  %p10925_p8 = por %p10924_p7, %p10923_p4 }
  0x8a   : > { %p10919_p3 = pneg %p10918_p2 }
  0x8c   : > { %p10926_p11 = pnand %p10925_p8, %p10919_p3 }
  0x8e   : > { %10929 = shalt.err (!%p10926_p11)
}
  0x8f   : > { %10626 = dma.hbm_to_vmem [thread:$0]  (!%p11186_p12), %s12529_s11, 3072, %s539_s26, [#allocation9], %s11009_s29, %s11009_s29, %s11010_s17  }
  0x90   : > { %p12530_p13 = scmp.ne.s32.totalorder %s12523_s27, 0 }
  0x91   : > { %p12531_p1 = scmp.eq.s32.totalorder (!%p12530_p13), %s11150_s1, 0 }
  0x92   : > { %582 = sbr.rel (%p12530_p13) target bundleno = 22680 (0x5898), region = 96 }
  0x99   : > { %10975 = dma.done.wait (%p12531_p1), [#allocation3], 32   ;;  %p12532_p0 = pmov %p12531_p1 }
  0x9b   : > { %10977 = vsyncadd (%p12532_p0), [#allocation3], 4294967264  ;;  %p12533_p6 = pmov %p12532_p0 }
  0x9c   : > { %p12534_p5 = pmov %p12532_p0 }
  0x9d   : > { %10979 = dma.done.wait (%p12533_p6), [#allocation6], 3088  }
  0x9e   : > { %10981 = vsyncadd (%p12534_p5), [#allocation6], 4294964208  ;;  %p12535_p9 = pmov %p12532_p0 }
  0x9f   : > { %p12536_p12 = pmov %p12532_p0 }
  0xa0   : > { %10983 = dma.done.wait (%p12535_p9), [#allocation9], 3072  }
  0xa1   : > { %10985 = vsyncadd (%p12536_p12), [#allocation9], 4294964224  ;;  %p648_p10 = scmp.lt.s32.totalorder %s11150_s1, 1  ;;  %v11012_v0 = vmov 0   ;;  %s12537_s25 = sld [smem:[#allocation24_spill]]  ;;  %v11013_v4 = vmov 0.0|0.0   ;;  %v659_v11 = vlaneseq }
  0xa2   : > { %10694 = vset.pattern.permute.xlu0 %v11012_v0  ;;  %s12538_s26 = sld [smem:[#allocation27_spill]]  ;;  %10425 = vmatprep.subr.bf16.mxu1 %v11013_v4  ;;  %v11014_v6 = vmov 1   ;;  %vm11015_vm0 = vmmov 0   ;;  %v11016_v10 = vmov 0.0   ;;  %v653_v15 = vld [vmem:[#allocation2] sm:$0x3] }
  0xa3   : > { %s649_s27 = scalar_select %p648_p10, %s11150_s1, 1  ;;  %9787 = vmatprep.mubr.msk.f32.mxu1 %vm11015_vm0, %v11016_v10  ;;  %9800 = vmatprep.subr.mxu0 %v11016_v10  ;;  %v660_v12 = vshrl.u32 %v659_v11, 7  ;;  %v9223_v22 = vld [vmem:[#allocation5] ss:$0 sm:$0xff]  ;;  %vm712_vm1 = vcmask 261120   ;;  %vm789_vm2 = vcmask 64512  }
  0xa4   : > { %9802 = vmatprep.mubr.msk.f32.mxu0 %vm11015_vm0, %v11016_v10  ;;  %v9224_v25 = vld [vmem:[%s12446_s4] ss:$0 sm:$0xff]  ;;  %s12496_s28 = smov 120   ;;  %s12490_s22 = smov 64   ;;  %v688_v51 = vld [vmem:[%s12447_s5 + $0x8] sm:$0xff]  ;;  %vm9083_vm9 = vcmask 122880  }
  0xa5   : > { %s9222_s24 = sshll.u32 %s649_s27, 3  ;;  %v661_v13 = vsub.s32 0, %v660_v12  ;;  %v670_v14 = vsub.s32 1, %v660_v12  ;;  %s12498_s27 = smov 96   ;;  %v687_v59 = vld [vmem:[%s12447_s5] sm:$0xff] }
  0xa6   : > { %s12494_s17 = smov 56   ;;  %s12482_s19 = smov 48  }
  0xa7   : > { %s651_s29 = scalar_lea.vmem %s12537_s25, %s9222_s24  ;;  %v662_v17 = vrot.slane %v653_v15, %v661_v13  ;;  %v671_v18 = vrot.slane %v653_v15, %v670_v14  ;;  %s12500_s24 = smov 88  }
  0xa8   : > { %v652_v1 = vld [vmem:[%s651_s29] sm:$0xff]  ;;  %v683_v3 = vld [vmem:[%s12538_s26 + $0x8] sm:$0xff]  ;;  %v684_v7 = vld [vmem:[%s12538_s26 + $0x10] sm:$0xff]  ;;  %s12488_s25 = smov 80   ;;  %s12492_s29 = smov 112  }
  0xa9   : > { %656 = vperm.xlu0 %10694, %v652_v1   ;;  %v682_v2 = vld [vmem:[%s12538_s26] sm:$0xff]  ;;  %v685_v8 = vld [vmem:[%s12538_s26 + $0x18] sm:$0xff]  ;;  %s12484_s23 = smov 104   ;;  %s12486_s20 = smov 72  }
  0xaa   : > { %v10426_v5 = vpack.c.bf16 %v683_v3, %v682_v2  ;;  %v10429_v9 = vpack.c.bf16 %v685_v8, %v684_v7  ;;  %s12480_s21 = smov 40   ;;  %s12540_s3 = smov 48  }
  0xab   : > { %s12541_s18 = smov 40   ;;  %s12542_s0 = smov 64  }
  0xac   : > { %10427 = vmatpush3.bf16.msra.mxu1 %v10426_v5  ;;  %s12543_s2 = smov 80   ;;  %s12549_s30 = smov 96  }
  0xad   : > { %10695 = vset.pattern.permute.xlu0 %v11014_v6  ;;  %10428 = vmatprep.subr.bf16.mxu1 %v11013_v4  ;;  %s12553_s1 = sld [smem:[#allocation30_spill]] }
  0xae   : > { %665 = vperm.xlu0 %10695, %v652_v1  }
  0xb0   : > { %10430 = vmatpush3.bf16.msra.mxu1 %v10429_v9 }
  0xb1   : > { %9790 = vmatprep.subr.mxu1 %v11016_v10 }
 0x128   : > { %v657_v16 = vpop.permute.xlu0 %656 }
 0x129   : > { %v663_v20 = vmul.f32 %v662_v17, %v657_v16 }
 0x12d   : > { %v666_v19 = vpop.permute.xlu0 %665 }
 0x12e   : > { %v672_v21 = vmul.f32 %v671_v18, %v666_v19 }
 0x130   : > { %v673_v23 = vadd.f32 %v672_v21, %v663_v20 }
 0x132   : > { %v11321_v24 = vadd.f32 %v9223_v22, %v673_v23 }
 0x134   : > { %9788 = vmatmul.mubr.msk.f32.vlgmr.msra.gmra.mrb[0].mxu1 %vm712_vm1, %v11321_v24 }
 0x135   : > { %9792 = vmatprep.mubr.msk.f32.mxu1 %vm11015_vm0, %v11016_v10 }
 0x207   : > { %v782_v26 = vpop.f32.mrb[0].mxu1 }
 0x208   : > { %v11330_v27 = vadd.f32 %v9224_v25, %v782_v26  ;;  %v9789_v28 = vpop.f32.mrb[1].mxu1  ;;  %v689_v25 = vld [vmem:[%s12447_s5 + $0x10] sm:$0xff] }
 0x20a   : > { %787 = vrot.lane.b32.xlu1 %v11330_v27, %s12498_s27 }
 0x20e   : > { %954 = vrot.lane.b32.xlu1 %v11330_v27, %s12500_s24 }
 0x212   : > { %952 = vrot.lane.b32.xlu1 %v11330_v27, %s12496_s28 }
 0x27c   : > { %v788_v29 = vpop.permute.xlu1 %787 }
 0x27d   : > { %9791 = vmatpush3.xpose.msk.msra.mxu1 %vm789_vm2, %v788_v29 }
 0x27e   : > { %9795 = vmatprep.subr.mxu1 %v11016_v10 }
 0x280   : > { %9793 = vmatmul.mubr.msk.f32.vlgmr.msra.gmra.mrb[2].mxu1 %vm789_vm2, %v11330_v27  ;;  %v955_v30 = vpop.permute.xlu1 %954 }
 0x281   : > { %9801 = vmatpush3.xpose.msk.msra.mxu0 %vm789_vm2, %v955_v30  ;;  %9797 = vmatprep.mubr.msk.f32.mxu1 %vm11015_vm0, %v11016_v10 }
 0x282   : > { %9810 = vmatprep.subr.mxu0 %v11016_v10 }
 0x284   : > { %v953_v31 = vpop.permute.xlu1 %952 }
 0x285   : > { %9803 = vmatmul.mubr.msk.f32.vlgmr.msra.gmra.mrb[0].mxu0 %vm789_vm2, %v953_v31 }
 0x286   : > { %9812 = vmatprep.mubr.msk.f32.mxu0 %vm11015_vm0, %v11016_v10  ;;  %9811 = vmatpush3.msra.mxu0 %v688_v51 }
 0x287   : > { %9820 = vmatprep.subr.mxu0 %v11016_v10 }
 0x353   : > { %v860_v32 = vpop.f32.mrb[2].mxu1 }
 0x354   : > { %v864_v33 = vmul.f32 0.35355338, %v860_v32  ;;  %v9794_v34 = vpop.f32.mrb[3].mxu1 }
 0x356   : > { %v865_v35 = vsel %vm789_vm2, %v864_v33, -inf }
 0x357   : > { %866 = vmax.xlane.f32.xlu0 %v865_v35 }
 0x358   : > { %v1026_v36 = vpop.f32.mrb[0].mxu0 }
 0x359   : > { %v1030_v37 = vmul.f32 0.35355338, %v1026_v36  ;;  %v9804_v38 = vpop.f32.mrb[1].mxu0 }
 0x35a   : > { %v690_v38 = vld [vmem:[%s12447_s5 + $0x18] sm:$0xff] }
 0x35b   : > { %v1031_v39 = vsel %vm789_vm2, %v1030_v37, -inf }
 0x35c   : > { %1032 = vmax.xlane.f32.xlu1 %v1031_v39 }
 0x36d   : > { %876 = vrot.lane.b32.xlu1 %v11330_v27, %s12490_s22 }
 0x371   : > { %1266 = vrot.lane.b32.xlu1 %v11330_v27, %s12488_s25 }
 0x375   : > { %1264 = vrot.lane.b32.xlu1 %v11330_v27, %s12492_s29 }
 0x3e4   : > { %v867_v40 = vpop.xlane.xlu0 %866 }
 0x3e5   : > { %v868_v41 = vsub.f32 %v864_v33, %v867_v40 }
 0x3e7   : > { %v869_v42 = vmul.f32 1.442695, %v868_v41 }
 0x3e9   : > { %10696 = vpow2.f32 %v869_v42  ;;  %v1033_v43 = vpop.xlane.xlu1 %1032 }
 0x3ea   : > { %v1034_v44 = vsub.f32 %v1030_v37, %v1033_v43 }
 0x3ec   : > { %v1035_v45 = vmul.f32 1.442695, %v1034_v44 }
 0x3ed   : > { %v877_v46 = vpop.permute.xlu1 %876 }
 0x3ee   : > { %10698 = vpow2.f32 %v1035_v45  ;;  %9796 = vmatpush3.msra.mxu1 %v877_v46 }
 0x3ef   : > { %9805 = vmatprep.subr.mxu1 %v11016_v10 }
 0x3f1   : > { %v1267_v62 = vpop.permute.xlu1 %1266 }
 0x3f3   : > { %v10697_v47 = vpop.eup %10696 }
 0x3f4   : > { %v871_v48 = vsel %vm789_vm2, %v10697_v47, 0.0 }
 0x3f5   : > { %872 = vadd.xlane.f32.xlu0 %v871_v48  ;;  %v1265_v1 = vpop.permute.xlu1 %1264 }
 0x3f8   : > { %v10699_v49 = vpop.eup %10698 }
 0x3f9   : > { %v1037_v50 = vsel %vm789_vm2, %v10699_v49, 0.0 }
 0x3fa   : > { %1038 = vadd.xlane.f32.xlu0 %v1037_v50 }
 0x410   : > { %1042 = vrot.lane.b32.xlu0 %v11330_v27, %s12494_s17 }
 0x482   : > { %v873_v52 = vpop.xlane.xlu0 %872 }
 0x483   : > { %10700 = vrcp.f32 %v873_v52 }
 0x487   : > { %v1039_v53 = vpop.xlane.xlu0 %1038 }
 0x488   : > { %10702 = vrcp.f32 %v1039_v53 }
 0x48b   : > { %v1043_v56 = vpop.permute.xlu0 %1042 }
 0x48d   : > { %v10701_v54 = vpop.eup %10700 }
 0x48e   : > { %v875_v55 = vmul.f32 %v10701_v54, %v10697_v47  ;;  %v9242_v47 = vld [vmem:[%s12448_s6] ss:$0 sm:$0xff] }
 0x490   : > { %9798 = vmatmul.mubr.msk.f32.vlgmr.msra.gmra.mrb[4].mxu1 %vm789_vm2, %v875_v55 }
 0x491   : > { %9806 = vmatpush3.msra.mxu1 %v1043_v56  ;;  %9807 = vmatprep.mubr.msk.f32.mxu1 %vm11015_vm0, %v11016_v10 }
 0x492   : > { %v10703_v57 = vpop.eup %10702  ;;  %9815 = vmatprep.subr.mxu1 %v11016_v10 }
 0x493   : > { %v1041_v58 = vmul.f32 %v10703_v57, %v10699_v49 }
 0x495   : > { %9808 = vmatmul.mubr.msk.f32.vlgmr.msra.gmra.mrb[6].mxu1 %vm789_vm2, %v1041_v58 }
 0x496   : > { %9817 = vmatprep.mubr.msk.f32.mxu1 %vm11015_vm0, %v11016_v10  ;;  %9816 = vmatpush3.msra.mxu1 %v687_v59  ;;  %v694_v59 = vld [vmem:[#allocation7] sm:$0xff] }
 0x497   : > { %9825 = vmatprep.subr.mxu1 %v11016_v10 }
 0x563   : > { %v948_v60 = vpop.f32.mrb[4].mxu1 }
 0x564   : > { %v9799_v61 = vpop.f32.mrb[5].mxu1  ;;  %9818 = vmatmul.mubr.msk.f32.vlgmr.msra.gmra.mrb[8].mxu1 %vm789_vm2, %v948_v60  ;;  %v695_v60 = vld [vmem:[#allocation7 + $0x8] sm:$0xff] }
 0x565   : > { %9827 = vmatprep.mubr.msk.f32.mxu1 %vm11015_vm0, %v11016_v10  ;;  %v10432_v61 = vpack.c.bf16 %v695_v60, %v694_v59 }
 0x568   : > { %v1114_v63 = vpop.f32.mrb[6].mxu1 }
 0x569   : > { %v9809_v0 = vpop.f32.mrb[7].mxu1  ;;  %9813 = vmatmul.mubr.msk.f32.vlgmr.msra.gmra.mrb[2].mxu0 %vm789_vm2, %v1114_v63  ;;  %v697_v63 = vld [vmem:[#allocation7 + $0x18] sm:$0xff] }
 0x56a   : > { %9821 = vmatpush3.xpose.msk.msra.mxu0 %vm789_vm2, %v1267_v62  ;;  %9822 = vmatprep.mubr.msk.f32.mxu0 %vm11015_vm0, %v11016_v10  ;;  %v696_v62 = vld [vmem:[#allocation7 + $0x10] sm:$0xff] }
 0x56b   : > { %9830 = vmatprep.subr.mxu0 %v11016_v10  ;;  %v10435_v0 = vpack.c.bf16 %v697_v63, %v696_v62 }
 0x56d   : > { %9823 = vmatmul.mubr.msk.f32.vlgmr.msra.gmra.mrb[4].mxu0 %vm789_vm2, %v1265_v1 }
 0x56e   : > { %9832 = vmatprep.mubr.msk.f32.mxu0 %vm11015_vm0, %v11016_v10  ;;  %9831 = vmatpush3.msra.mxu0 %v689_v25 }
 0x56f   : > { %9840 = vmatprep.subr.mxu0 %v11016_v10 }
 0x637   : > { %v1260_v2 = vpop.f32.mrb[8].mxu1 }
 0x638   : > { %v9819_v3 = vpop.f32.mrb[9].mxu1 }
 0x63c   : > { %v1187_v5 = vpop.f32.mrb[2].mxu0 }
 0x63d   : > { %v1261_v6 = vadd.f32 %v1260_v2, %v1187_v5  ;;  %v9814_v7 = vpop.f32.mrb[3].mxu0  ;;  %v9243_v5 = vld [vmem:[%s12449_s7] ss:$0 sm:$0xff] }
 0x63e   : > { %v699_v7 = vld [vmem:[#allocation8] sm:$0xff] }
 0x640   : > { %v1338_v8 = vpop.f32.mrb[4].mxu0 }
 0x641   : > { %v1342_v9 = vmul.f32 0.35355338, %v1338_v8  ;;  %v9824_v11 = vpop.f32.mrb[5].mxu0  ;;  %v700_v8 = vld [vmem:[#allocation8 + $0x8] sm:$0xff] }
 0x643   : > { %v1343_v12 = vsel %vm789_vm2, %v1342_v9, -inf }
 0x644   : > { %1344 = vmax.xlane.f32.xlu0 %v1343_v12  ;;  %v10438_v12 = vpack.c.bf16 %v700_v8, %v699_v7 }
 0x65a   : > { %1354 = vrot.lane.b32.xlu0 %v11330_v27, %s12482_s19  ;;  %s12545_s19 = smov 120  }
 0x65e   : > { %1504 = vrot.lane.b32.xlu0 %v11330_v27, %s12484_s23  ;;  %s12547_s23 = smov 112  }
 0x6d1   : > { %v1345_v13 = vpop.xlane.xlu0 %1344 }
 0x6d2   : > { %v1346_v14 = vsub.f32 %v1342_v9, %v1345_v13  ;;  %v9244_v9 = vld [vmem:[%s12450_s8] ss:$0 sm:$0xff] }
 0x6d4   : > { %v1347_v15 = vmul.f32 1.442695, %v1346_v14  ;;  %v701_v14 = vld [vmem:[#allocation8 + $0x10] sm:$0xff] }
 0x6d5   : > { %v1355_v16 = vpop.permute.xlu0 %1354 }
 0x6d6   : > { %10704 = vpow2.f32 %v1347_v15  ;;  %9826 = vmatpush3.msra.mxu1 %v1355_v16  ;;  %v702_v15 = vld [vmem:[#allocation8 + $0x18] sm:$0xff] }
 0x6d7   : > { %9835 = vmatprep.subr.mxu1 %v11016_v10  ;;  %v10441_v16 = vpack.c.bf16 %v702_v15, %v701_v14 }
 0x6d9   : > { %v1505_v23 = vpop.permute.xlu0 %1504 }
 0x6e0   : > { %v10705_v17 = vpop.eup %10704 }
 0x6e1   : > { %v1349_v18 = vsel %vm789_vm2, %v10705_v17, 0.0 }
 0x6e2   : > { %1350 = vadd.xlane.f32.xlu1 %v1349_v18 }
 0x6f3   : > { %1506 = vrot.lane.b32.xlu1 %v11330_v27, %s12486_s20 }
 0x76f   : > { %v1351_v19 = vpop.xlane.xlu1 %1350 }
 0x770   : > { %10706 = vrcp.f32 %v1351_v19 }
 0x773   : > { %v1507_v22 = vpop.permute.xlu1 %1506 }
 0x77a   : > { %v10707_v20 = vpop.eup %10706 }
 0x77b   : > { %v1353_v21 = vmul.f32 %v10707_v20, %v10705_v17  ;;  %v9245_v17 = vld [vmem:[%s12452_s10] ss:$0 sm:$0xff] }
 0x77d   : > { %9828 = vmatmul.mubr.msk.f32.vlgmr.msra.gmra.mrb[10].mxu1 %vm789_vm2, %v1353_v21 }
 0x77e   : > { %9836 = vmatpush3.xpose.msk.msra.mxu1 %vm789_vm2, %v1507_v22  ;;  %9837 = vmatprep.mubr.msk.f32.mxu1 %vm11015_vm0, %v11016_v10 }
 0x77f   : > { %9845 = vmatprep.subr.mxu1 %v11016_v10 }
 0x781   : > { %9838 = vmatmul.mubr.msk.f32.vlgmr.msra.gmra.mrb[12].mxu1 %vm789_vm2, %v1505_v23  ;;  %v9247_v23 = vld [vmem:[%s12454_s12] ss:$0 sm:$0xff] }
 0x782   : > { %9847 = vmatprep.mubr.msk.f32.mxu1 %vm11015_vm0, %v11016_v10  ;;  %9846 = vmatpush3.msra.mxu1 %v690_v38 }
 0x783   : > { %10431 = vmatprep.subr.bf16.mxu1 %v11013_v4 }
 0x850   : > { %v1426_v26 = vpop.f32.mrb[10].mxu1 }
 0x851   : > { %v9829_v28 = vpop.f32.mrb[11].mxu1  ;;  %9833 = vmatmul.mubr.msk.f32.vlgmr.msra.gmra.mrb[6].mxu0 %vm789_vm2, %v1426_v26 }
 0x852   : > { %9842 = vmatprep.mubr.msk.f32.mxu0 %vm11015_vm0, %v11016_v10 }
 0x854   : > { %v1578_v29 = vpop.f32.mrb[12].mxu1 }
 0x855   : > { %v1582_v30 = vmul.f32 0.35355338, %v1578_v29  ;;  %v9839_v31 = vpop.f32.mrb[13].mxu1 }
 0x857   : > { %v1583_v32 = vsel %vm789_vm2, %v1582_v30, -inf }
 0x858   : > { %1584 = vmax.xlane.f32.xlu1 %v1583_v32 }
 0x8e5   : > { %v1585_v33 = vpop.xlane.xlu1 %1584 }
 0x8e6   : > { %v1586_v34 = vsub.f32 %v1582_v30, %v1585_v33 }
 0x8e8   : > { %v1587_v35 = vmul.f32 1.442695, %v1586_v34 }
 0x8ea   : > { %10708 = vpow2.f32 %v1587_v35 }
 0x8f4   : > { %v10709_v36 = vpop.eup %10708 }
 0x8f5   : > { %v1589_v37 = vsel %vm789_vm2, %v10709_v36, 0.0 }
 0x8f6   : > { %1590 = vadd.xlane.f32.xlu0 %v1589_v37  ;;  %v9252_v37 = vld [vmem:[%s12538_s26 + $0x28] sm:$0xff] }
 0x90c   : > { %1594 = vrot.lane.b32.xlu0 %v11330_v27, %s12480_s21  ;;  %s12539_s21 = smov 104  }
 0x924   : > { %v1499_v39 = vpop.f32.mrb[6].mxu0 }
 0x925   : > { %v1503_v40 = vadd.f32 %v1499_v39, %v1261_v6  ;;  %v9834_v41 = vpop.f32.mrb[7].mxu0  ;;  %v9253_v39 = vld [vmem:[%s12538_s26 + $0x30] sm:$0xff] }
 0x983   : > { %v1591_v42 = vpop.xlane.xlu0 %1590 }
 0x984   : > { %10710 = vrcp.f32 %v1591_v42 }
 0x987   : > { %v1595_v43 = vpop.permute.xlu0 %1594 }
 0x988   : > { %9841 = vmatpush3.msra.mxu0 %v1595_v43 }
 0x989   : > { %9893 = vmatprep.subr.mxu0 %v11016_v10 }
 0x98e   : > { %v10711_v44 = vpop.eup %10710 }
 0x98f   : > { %v1593_v45 = vmul.f32 %v10711_v44, %v10709_v36  ;;  %v9251_v36 = vld [vmem:[%s12538_s26 + $0x20] sm:$0xff] }
 0x990   : > { %v10444_v38 = vpack.c.bf16 %v9252_v37, %v9251_v36 }
 0x991   : > { %9843 = vmatmul.mubr.msk.f32.vlgmr.msra.gmra.mrb[8].mxu0 %vm789_vm2, %v1593_v45 }
 0x992   : > { %9895 = vmatprep.mubr.msk.f32.mxu0 %vm11015_vm0, %v11016_v10 }
 0xa64   : > { %v1666_v27 = vpop.f32.mrb[8].mxu0 }
 0xa65   : > { %v9844_v46 = vpop.f32.mrb[9].mxu0  ;;  %9848 = vmatmul.mubr.msk.f32.vlgmr.msra.gmra.mrb[14].mxu1 %vm789_vm2, %v1666_v27  ;;  %v9249_v27 = vld [vmem:[%s12455_s13] ss:$0 sm:$0xff] }
 0xa66   : > { %9858 = vmatprep.mubr.msk.f32.mxu1 %vm11015_vm0, %v11016_v10  ;;  %10433 = vmatpush3.bf16.msra.mxu1 %v10432_v61 }
 0xa67   : > { %10434 = vmatprep.subr.bf16.mxu1 %v11013_v4 }
 0xa6a   : > { %10436 = vmatpush3.bf16.msra.mxu1 %v10435_v0 }
 0xa6b   : > { %10437 = vmatprep.subr.bf16.mxu1 %v11013_v4 }
 0xb38   : > { %v1739_v48 = vpop.f32.mrb[14].mxu1 }
 0xb39   : > { %v1743_v49 = vadd.f32 %v1739_v48, %v1503_v40  ;;  %v9849_v50 = vpop.f32.mrb[15].mxu1  ;;  %v9254_v40 = vld [vmem:[%s12538_s26 + $0x38] sm:$0xff] }
 0xb3a   : > { %v10447_v41 = vpack.c.bf16 %v9254_v40, %v9253_v39  ;;  %v9267_v50 = vld [vmem:[%s12446_s4 + $0x1] ss:$0 sm:$0xff] }
 0xb3b   : > { %v1750_v51 = vadd.f32 %v9242_v47, %v1743_v49  ;;  %v9250_v47 = vld [vmem:[%s12456_s14] ss:$0 sm:$0xff] }
 0xb3d   : > { %v1751_v52 = vadd.f32 %v1750_v51, %v11321_v24 }
 0xb3f   : > { %v1752_v53 = vsel %vm712_vm1, %v1751_v52, 0.0 }
 0xb40   : > { %1753 = vadd.xlane.f32.xlu1 %v1752_v53 }
 0xbcd   : > { %v1754_v54 = vpop.xlane.xlu1 %1753 }
 0xbce   : > { %v1756_v55 = vmul.f32 0.03125, %v1754_v54 }
 0xbd0   : > { %v1757_v56 = vsub.f32 %v1751_v52, %v1756_v55 }
 0xbd2   : > { %v1758_v57 = vmul.f32 %v1757_v56, %v1757_v56 }
 0xbd4   : > { %v1759_v58 = vsel %vm712_vm1, %v1758_v57, 0.0 }
 0xbd5   : > { %1760 = vadd.xlane.f32.xlu1 %v1759_v58 }
 0xc62   : > { %v1761_v24 = vpop.xlane.xlu1 %1760 }
 0xc63   : > { %v1762_v1 = vmul.f32 0.03125, %v1761_v24 }
 0xc65   : > { %v1763_v2 = vadd.f32 1e-05, %v1762_v1 }
 0xc67   : > { %10712 = vrsqrt.f32 %v1763_v2 }
 0xc71   : > { %v10713_v3 = vpop.eup %10712 }
 0xc72   : > { %v1765_v6 = vmul.f32 %v10713_v3, %v1757_v56 }
 0xc74   : > { %v1772_v11 = vmul.f32 %v9243_v5, %v1765_v6 }
 0xc76   : > { %v1779_v13 = vadd.f32 %v9244_v9, %v1772_v11 }
 0xc78   : > { %9859 = vmatmul.mubr.msk.f32.vlgmr.msra.gmra.mrb[16].mxu1 %vm712_vm1, %v1779_v13 }
 0xc79   : > { %10439 = vmatpush3.bf16.msra.mxu1 %v10438_v12  ;;  %9869 = vmatprep.mubr.msk.f32.mxu1 %vm11015_vm0, %v11016_v10  ;;  %v9257_v12 = vld [vmem:[%s12447_s5 + $0x28] sm:$0xff] }
 0xc7a   : > { %10440 = vmatprep.subr.bf16.mxu1 %v11013_v4 }
 0xc7d   : > { %10442 = vmatpush3.bf16.msra.mxu1 %v10441_v16 }
 0xc7e   : > { %10443 = vmatprep.subr.bf16.mxu1 %v11013_v4 }
 0xd4b   : > { %v1855_v18 = vpop.f32.mrb[16].mxu1 }
 0xd4c   : > { %v1856_v19 = vadd.f32 %v9245_v17, %v1855_v18  ;;  %v9860_v20 = vpop.f32.mrb[17].mxu1 }
 0xd4e   : > { %vm1859_vm3 = vcmp.ge.f32.partialorder %v1856_v19, 0.0  ;;  %v1860_v21 = vmul.f32 0.01, %v1856_v19 }
 0xd50   : > { %v1861_v22 = vsel %vm1859_vm3, %v1856_v19, %v1860_v21  ;;  %v9256_v21 = vld [vmem:[%s12447_s5 + $0x20] sm:$0xff] }
 0xd51   : > { %9870 = vmatmul.mubr.msk.f32.vlgmr.msra.gmra.mrb[18].mxu1 %vm712_vm1, %v1861_v22 }
 0xd52   : > { %9880 = vmatprep.mubr.msk.f32.mxu1 %vm11015_vm0, %v11016_v10  ;;  %10445 = vmatpush3.bf16.msra.mxu1 %v10444_v38 }
 0xd53   : > { %10446 = vmatprep.subr.bf16.mxu1 %v11013_v4 }
 0xd56   : > { %10448 = vmatpush3.bf16.msra.mxu1 %v10447_v41 }
 0xd57   : > { %9883 = vmatprep.subr.mxu1 %v11016_v10 }
 0xe24   : > { %v1937_v25 = vpop.f32.mrb[18].mxu1 }
 0xe25   : > { %v1938_v26 = vadd.f32 %v9247_v23, %v1937_v25  ;;  %v9871_v28 = vpop.f32.mrb[19].mxu1 }
 0xe27   : > { %v1941_v29 = vadd.f32 %v1938_v26, %v1779_v13 }
 0xe29   : > { %v1942_v30 = vsel %vm712_vm1, %v1941_v29, 0.0 }
 0xe2a   : > { %1943 = vadd.xlane.f32.xlu1 %v1942_v30 }
 0xeb7   : > { %v1944_v31 = vpop.xlane.xlu1 %1943 }
 0xeb8   : > { %v1945_v32 = vmul.f32 0.03125, %v1944_v31 }
 0xeba   : > { %v1946_v33 = vsub.f32 %v1941_v29, %v1945_v32 }
 0xebc   : > { %v1947_v34 = vmul.f32 %v1946_v33, %v1946_v33 }
 0xebe   : > { %v1948_v35 = vsel %vm712_vm1, %v1947_v34, 0.0 }
 0xebf   : > { %1949 = vadd.xlane.f32.xlu1 %v1948_v35 }
 0xf4c   : > { %v1950_v42 = vpop.xlane.xlu1 %1949 }
 0xf4d   : > { %v1951_v43 = vmul.f32 0.03125, %v1950_v42 }
 0xf4f   : > { %v1952_v44 = vadd.f32 1e-05, %v1951_v43 }
 0xf51   : > { %10714 = vrsqrt.f32 %v1952_v44 }
 0xf5b   : > { %v10715_v45 = vpop.eup %10714 }
 0xf5c   : > { %v1954_v46 = vmul.f32 %v10715_v45, %v1946_v33 }
 0xf5e   : > { %v1961_v48 = vmul.f32 %v9249_v27, %v1954_v46 }
 0xf60   : > { %v11477_v49 = vadd.f32 %v9250_v47, %v1961_v48 }
 0xf62   : > { %9881 = vmatmul.mubr.msk.f32.vlgmr.msra.gmra.mrb[20].mxu1 %vm712_vm1, %v11477_v49 }
 0xf63   : > { %9885 = vmatprep.mubr.msk.f32.mxu1 %vm11015_vm0, %v11016_v10 }
0x1035   : > { %v2080_v51 = vpop.f32.mrb[20].mxu1 }
0x1036   : > { %v11486_v52 = vadd.f32 %v9267_v50, %v2080_v51  ;;  %v9882_v53 = vpop.f32.mrb[21].mxu1  ;;  %v9258_v50 = vld [vmem:[%s12447_s5 + $0x30] sm:$0xff] }
0x1038   : > { %2251 = vrot.lane.b32.xlu0 %v11486_v52, %s12500_s24  ;;  %2085 = vrot.lane.b32.xlu1 %v11486_v52, %s12498_s27 }
0x103c   : > { %2249 = vrot.lane.b32.xlu0 %v11486_v52, %s12496_s28 }
0x10aa   : > { %v2252_v54 = vpop.permute.xlu0 %2251  ;;  %v2086_v55 = vpop.permute.xlu1 %2085 }
0x10ab   : > { %9884 = vmatpush3.xpose.msk.msra.mxu1 %vm789_vm2, %v2086_v55  ;;  %9894 = vmatpush3.xpose.msk.msra.mxu0 %vm789_vm2, %v2252_v54 }
0x10ac   : > { %9888 = vmatprep.subr.mxu1 %v11016_v10  ;;  %9903 = vmatprep.subr.mxu0 %v11016_v10 }
0x10ae   : > { %v2250_v56 = vpop.permute.xlu0 %2249  ;;  %9886 = vmatmul.mubr.msk.f32.vlgmr.msra.gmra.mrb[22].mxu1 %vm789_vm2, %v11486_v52 }
0x10af   : > { %9896 = vmatmul.mubr.msk.f32.vlgmr.msra.gmra.mrb[10].mxu0 %vm789_vm2, %v2250_v56  ;;  %9890 = vmatprep.mubr.msk.f32.mxu1 %vm11015_vm0, %v11016_v10 }
0x10b0   : > { %9905 = vmatprep.mubr.msk.f32.mxu0 %vm11015_vm0, %v11016_v10  ;;  %9904 = vmatpush3.msra.mxu0 %v9257_v12 }
0x10b1   : > { %9913 = vmatprep.subr.mxu0 %v11016_v10 }
0x1181   : > { %v2157_v57 = vpop.f32.mrb[22].mxu1 }
0x1182   : > { %v2161_v58 = vmul.f32 0.35355338, %v2157_v57  ;;  %v9887_v59 = vpop.f32.mrb[23].mxu1  ;;  %v2323_v60 = vpop.f32.mrb[10].mxu0 }
0x1183   : > { %v2327_v61 = vmul.f32 0.35355338, %v2323_v60  ;;  %v9897_v62 = vpop.f32.mrb[11].mxu0 }
0x1184   : > { %v2162_v63 = vsel %vm789_vm2, %v2161_v58, -inf }
0x1185   : > { %2163 = vmax.xlane.f32.xlu0 %v2162_v63  ;;  %v2328_v0 = vsel %vm789_vm2, %v2327_v61, -inf }
0x1186   : > { %2329 = vmax.xlane.f32.xlu1 %v2328_v0  ;;  %v9259_v0 = vld [vmem:[%s12447_s5 + $0x38] sm:$0xff] }
0x1197   : > { %2339 = vrot.lane.b32.xlu1 %v11486_v52, %s12494_s17 }
0x119b   : > { %2563 = vrot.lane.b32.xlu1 %v11486_v52, %s12488_s25 }
0x1212   : > { %v2164_v24 = vpop.xlane.xlu0 %2163 }
0x1213   : > { %v2165_v1 = vsub.f32 %v2161_v58, %v2164_v24  ;;  %v2330_v2 = vpop.xlane.xlu1 %2329 }
0x1214   : > { %v2331_v3 = vsub.f32 %v2327_v61, %v2330_v2 }
0x1215   : > { %v2166_v5 = vmul.f32 1.442695, %v2165_v1 }
0x1216   : > { %v2332_v6 = vmul.f32 1.442695, %v2331_v3 }
0x1217   : > { %10716 = vpow2.f32 %v2166_v5  ;;  %v2340_v18 = vpop.permute.xlu1 %2339 }
0x1218   : > { %10718 = vpow2.f32 %v2332_v6 }
0x121b   : > { %v2564_v26 = vpop.permute.xlu1 %2563 }
0x1221   : > { %v10717_v7 = vpop.eup %10716 }
0x1222   : > { %v2168_v8 = vsel %vm789_vm2, %v10717_v7, 0.0  ;;  %v10719_v9 = vpop.eup %10718 }
0x1223   : > { %2169 = vadd.xlane.f32.xlu0 %v2168_v8  ;;  %v2334_v11 = vsel %vm789_vm2, %v10719_v9, 0.0  ;;  %v9285_v8 = vld [vmem:[%s12448_s6 + $0x1] ss:$0 sm:$0xff] }
0x1227   : > { %2335 = vadd.xlane.f32.xlu0 %v2334_v11 }
0x123d   : > { %2173 = vrot.lane.b32.xlu0 %v11486_v52, %s12490_s22  ;;  %s12544_s22 = smov 72  }
0x1241   : > { %2561 = vrot.lane.b32.xlu0 %v11486_v52, %s12492_s29 }
0x12b0   : > { %v2170_v13 = vpop.xlane.xlu0 %2169 }
0x12b1   : > { %10720 = vrcp.f32 %v2170_v13 }
0x12b4   : > { %v2336_v14 = vpop.xlane.xlu0 %2335 }
0x12b5   : > { %10722 = vrcp.f32 %v2336_v14 }
0x12b8   : > { %v2174_v15 = vpop.permute.xlu0 %2173 }
0x12b9   : > { %9889 = vmatpush3.msra.mxu1 %v2174_v15 }
0x12ba   : > { %9898 = vmatprep.subr.mxu1 %v11016_v10 }
0x12bb   : > { %v10721_v16 = vpop.eup %10720 }
0x12bc   : > { %v2172_v17 = vmul.f32 %v10721_v16, %v10717_v7  ;;  %v2562_v29 = vpop.permute.xlu0 %2561 }
0x12be   : > { %9891 = vmatmul.mubr.msk.f32.vlgmr.msra.gmra.mrb[24].mxu1 %vm789_vm2, %v2172_v17 }
0x12bf   : > { %v10723_v19 = vpop.eup %10722  ;;  %9899 = vmatpush3.msra.mxu1 %v2340_v18  ;;  %9900 = vmatprep.mubr.msk.f32.mxu1 %vm11015_vm0, %v11016_v10 }
0x12c0   : > { %v2338_v20 = vmul.f32 %v10723_v19, %v10719_v9  ;;  %9908 = vmatprep.subr.mxu1 %v11016_v10 }
0x12c2   : > { %9901 = vmatmul.mubr.msk.f32.vlgmr.msra.gmra.mrb[26].mxu1 %vm789_vm2, %v2338_v20 }
0x12c3   : > { %9910 = vmatprep.mubr.msk.f32.mxu1 %vm11015_vm0, %v11016_v10  ;;  %9909 = vmatpush3.msra.mxu1 %v9256_v21  ;;  %v1988_v21 = vld [vmem:[#allocation7 + $0x20] sm:$0xff] }
0x12c4   : > { %9918 = vmatprep.subr.mxu1 %v11016_v10 }
0x1391   : > { %v2245_v22 = vpop.f32.mrb[24].mxu1 }
0x1392   : > { %v9892_v23 = vpop.f32.mrb[25].mxu1  ;;  %9911 = vmatmul.mubr.msk.f32.vlgmr.msra.gmra.mrb[28].mxu1 %vm789_vm2, %v2245_v22  ;;  %v1989_v22 = vld [vmem:[#allocation7 + $0x28] sm:$0xff] }
0x1393   : > { %9920 = vmatprep.mubr.msk.f32.mxu1 %vm11015_vm0, %v11016_v10  ;;  %v10450_v23 = vpack.c.bf16 %v1989_v22, %v1988_v21 }
0x1395   : > { %v2411_v25 = vpop.f32.mrb[26].mxu1 }
0x1396   : > { %v9902_v28 = vpop.f32.mrb[27].mxu1  ;;  %9906 = vmatmul.mubr.msk.f32.vlgmr.msra.gmra.mrb[12].mxu0 %vm789_vm2, %v2411_v25  ;;  %v1990_v25 = vld [vmem:[#allocation7 + $0x30] sm:$0xff] }
0x1397   : > { %9914 = vmatpush3.xpose.msk.msra.mxu0 %vm789_vm2, %v2564_v26  ;;  %9915 = vmatprep.mubr.msk.f32.mxu0 %vm11015_vm0, %v11016_v10  ;;  %v1991_v26 = vld [vmem:[#allocation7 + $0x38] sm:$0xff] }
0x1398   : > { %9923 = vmatprep.subr.mxu0 %v11016_v10  ;;  %v10453_v28 = vpack.c.bf16 %v1991_v26, %v1990_v25 }
0x139a   : > { %9916 = vmatmul.mubr.msk.f32.vlgmr.msra.gmra.mrb[14].mxu0 %vm789_vm2, %v2562_v29 }
0x139b   : > { %9925 = vmatprep.mubr.msk.f32.mxu0 %vm11015_vm0, %v11016_v10  ;;  %9924 = vmatpush3.msra.mxu0 %v9258_v50 }
0x139c   : > { %9933 = vmatprep.subr.mxu0 %v11016_v10 }
0x1465   : > { %v2557_v30 = vpop.f32.mrb[28].mxu1 }
0x1466   : > { %v9912_v31 = vpop.f32.mrb[29].mxu1 }
0x1469   : > { %v2484_v32 = vpop.f32.mrb[12].mxu0 }
0x146a   : > { %v2558_v33 = vadd.f32 %v2557_v30, %v2484_v32  ;;  %v9907_v34 = vpop.f32.mrb[13].mxu0  ;;  %v9286_v32 = vld [vmem:[%s12449_s7 + $0x1] ss:$0 sm:$0xff] }
0x146b   : > { %v1995_v34 = vld [vmem:[#allocation8 + $0x20] sm:$0xff] }
0x146d   : > { %v2635_v35 = vpop.f32.mrb[14].mxu0 }
0x146e   : > { %v2639_v36 = vmul.f32 0.35355338, %v2635_v35  ;;  %v9917_v37 = vpop.f32.mrb[15].mxu0  ;;  %v1996_v35 = vld [vmem:[#allocation8 + $0x28] sm:$0xff] }
0x1470   : > { %v2640_v38 = vsel %vm789_vm2, %v2639_v36, -inf }
0x1471   : > { %2641 = vmax.xlane.f32.xlu1 %v2640_v38  ;;  %v10456_v38 = vpack.c.bf16 %v1996_v35, %v1995_v34 }
0x1482   : > { %2803 = vrot.lane.b32.xlu1 %v11486_v52, %s12486_s20  ;;  %s12546_s20 = smov 56  }
0x1486   : > { %2801 = vrot.lane.b32.xlu1 %v11486_v52, %s12539_s21 }
0x14fe   : > { %v2642_v39 = vpop.xlane.xlu1 %2641 }
0x14ff   : > { %v2643_v40 = vsub.f32 %v2639_v36, %v2642_v39  ;;  %v9287_v36 = vld [vmem:[%s12450_s8 + $0x1] ss:$0 sm:$0xff] }
0x1501   : > { %v2644_v41 = vmul.f32 1.442695, %v2643_v40  ;;  %v1997_v40 = vld [vmem:[#allocation8 + $0x30] sm:$0xff] }
0x1502   : > { %v2804_v46 = vpop.permute.xlu1 %2803 }
0x1503   : > { %10724 = vpow2.f32 %v2644_v41  ;;  %v1998_v41 = vld [vmem:[#allocation8 + $0x38] sm:$0xff] }
0x1506   : > { %v2802_v48 = vpop.permute.xlu1 %2801 }
0x150d   : > { %v10725_v42 = vpop.eup %10724 }
0x150e   : > { %v2646_v43 = vsel %vm789_vm2, %v10725_v42, 0.0 }
0x150f   : > { %2647 = vadd.xlane.f32.xlu0 %v2646_v43  ;;  %v9288_v43 = vld [vmem:[%s12452_s10 + $0x1] ss:$0 sm:$0xff] }
0x1525   : > { %2651 = vrot.lane.b32.xlu0 %v11486_v52, %s12540_s3 }
0x159c   : > { %v2648_v44 = vpop.xlane.xlu0 %2647 }
0x159d   : > { %10726 = vrcp.f32 %v2648_v44 }
0x15a0   : > { %v2652_v45 = vpop.permute.xlu0 %2651 }
0x15a1   : > { %9919 = vmatpush3.msra.mxu1 %v2652_v45 }
0x15a2   : > { %9928 = vmatprep.subr.mxu1 %v11016_v10 }
0x15a7   : > { %v10727_v27 = vpop.eup %10726 }
0x15a8   : > { %v2650_v47 = vmul.f32 %v10727_v27, %v10725_v42  ;;  %v10459_v42 = vpack.c.bf16 %v1998_v41, %v1997_v40 }
0x15aa   : > { %9921 = vmatmul.mubr.msk.f32.vlgmr.msra.gmra.mrb[30].mxu1 %vm789_vm2, %v2650_v47 }
0x15ab   : > { %9929 = vmatpush3.xpose.msk.msra.mxu1 %vm789_vm2, %v2804_v46  ;;  %9930 = vmatprep.mubr.msk.f32.mxu1 %vm11015_vm0, %v11016_v10 }
0x15ac   : > { %9938 = vmatprep.subr.mxu1 %v11016_v10 }
0x15ae   : > { %9931 = vmatmul.mubr.msk.f32.vlgmr.msra.gmra.mrb[32].mxu1 %vm789_vm2, %v2802_v48  ;;  %v9290_v48 = vld [vmem:[%s12454_s12 + $0x1] ss:$0 sm:$0xff] }
0x15af   : > { %9940 = vmatprep.mubr.msk.f32.mxu1 %vm11015_vm0, %v11016_v10  ;;  %9939 = vmatpush3.msra.mxu1 %v9259_v0  ;;  %v9296_v0 = vld [vmem:[%s12538_s26 + $0x50] sm:$0xff] }
0x15b0   : > { %10449 = vmatprep.subr.bf16.mxu1 %v11013_v4 }
0x167d   : > { %v2723_v51 = vpop.f32.mrb[30].mxu1 }
0x167e   : > { %v9922_v53 = vpop.f32.mrb[31].mxu1  ;;  %9926 = vmatmul.mubr.msk.f32.vlgmr.msra.gmra.mrb[16].mxu0 %vm789_vm2, %v2723_v51 }
0x167f   : > { %9935 = vmatprep.mubr.msk.f32.mxu0 %vm11015_vm0, %v11016_v10 }
0x1681   : > { %v2875_v54 = vpop.f32.mrb[32].mxu1 }
0x1682   : > { %v2879_v55 = vmul.f32 0.35355338, %v2875_v54  ;;  %v9932_v56 = vpop.f32.mrb[33].mxu1 }
0x1684   : > { %v2880_v57 = vsel %vm789_vm2, %v2879_v55, -inf }
0x1685   : > { %2881 = vmax.xlane.f32.xlu0 %v2880_v57 }
0x169b   : > { %2891 = vrot.lane.b32.xlu0 %v11486_v52, %s12541_s18 }
0x1712   : > { %v2882_v58 = vpop.xlane.xlu0 %2881 }
0x1713   : > { %v2883_v59 = vsub.f32 %v2879_v55, %v2882_v58 }
0x1715   : > { %v2884_v60 = vmul.f32 1.442695, %v2883_v59 }
0x1716   : > { %v2892_v61 = vpop.permute.xlu0 %2891 }
0x1717   : > { %10728 = vpow2.f32 %v2884_v60  ;;  %9934 = vmatpush3.msra.mxu0 %v2892_v61  ;;  %v9294_v61 = vld [vmem:[%s12538_s26 + $0x40] sm:$0xff] }
0x1718   : > { %10461 = vmatprep.subr.bf16.mxu0 %v11013_v4 }
0x1721   : > { %v10729_v62 = vpop.eup %10728 }
0x1722   : > { %v2886_v63 = vsel %vm789_vm2, %v10729_v62, 0.0 }
0x1723   : > { %2887 = vadd.xlane.f32.xlu1 %v2886_v63 }
0x1751   : > { %v2796_v52 = vpop.f32.mrb[16].mxu0 }
0x1752   : > { %v2800_v24 = vadd.f32 %v2796_v52, %v2558_v33  ;;  %v9927_v1 = vpop.f32.mrb[17].mxu0  ;;  %v9297_v52 = vld [vmem:[%s12538_s26 + $0x58] sm:$0xff] }
0x17b0   : > { %v2888_v2 = vpop.xlane.xlu1 %2887 }
0x17b1   : > { %10730 = vrcp.f32 %v2888_v2 }
0x17bb   : > { %v10731_v3 = vpop.eup %10730 }
0x17bc   : > { %v2890_v5 = vmul.f32 %v10731_v3, %v10729_v62  ;;  %v9295_v62 = vld [vmem:[%s12538_s26 + $0x48] sm:$0xff] }
0x17bd   : > { %v10462_v63 = vpack.c.bf16 %v9295_v62, %v9294_v61 }
0x17be   : > { %9936 = vmatmul.mubr.msk.f32.vlgmr.msra.gmra.mrb[18].mxu0 %vm789_vm2, %v2890_v5 }
0x17bf   : > { %9973 = vmatprep.mubr.msk.f32.mxu0 %vm11015_vm0, %v11016_v10  ;;  %10463 = vmatpush3.bf16.msra.mxu0 %v10462_v63 }
0x17c0   : > { %10464 = vmatprep.subr.bf16.mxu0 %v11013_v4 }
0x1891   : > { %v2963_v6 = vpop.f32.mrb[18].mxu0 }
0x1892   : > { %v9937_v7 = vpop.f32.mrb[19].mxu0  ;;  %9941 = vmatmul.mubr.msk.f32.vlgmr.msra.gmra.mrb[34].mxu1 %vm789_vm2, %v2963_v6  ;;  %v9292_v6 = vld [vmem:[%s12455_s13 + $0x1] ss:$0 sm:$0xff] }
0x1893   : > { %9951 = vmatprep.mubr.msk.f32.mxu1 %vm11015_vm0, %v11016_v10  ;;  %10451 = vmatpush3.bf16.msra.mxu1 %v10450_v23 }
0x1894   : > { %10452 = vmatprep.subr.bf16.mxu1 %v11013_v4 }
0x1897   : > { %10454 = vmatpush3.bf16.msra.mxu1 %v10453_v28 }
0x1898   : > { %10455 = vmatprep.subr.bf16.mxu1 %v11013_v4 }
0x1965   : > { %v3036_v9 = vpop.f32.mrb[34].mxu1 }
0x1966   : > { %v3040_v11 = vadd.f32 %v3036_v9, %v2800_v24  ;;  %v9942_v12 = vpop.f32.mrb[35].mxu1  ;;  %v10465_v24 = vpack.c.bf16 %v9297_v52, %v9296_v0 }
0x1967   : > { %v9310_v12 = vld [vmem:[%s12446_s4 + $0x2] ss:$0 sm:$0xff] }
0x1968   : > { %v3047_v13 = vadd.f32 %v9285_v8, %v3040_v11  ;;  %10466 = vmatpush3.bf16.msra.mxu0 %v10465_v24  ;;  %v9293_v8 = vld [vmem:[%s12456_s14 + $0x1] ss:$0 sm:$0xff] }
0x1969   : > { %9986 = vmatprep.subr.mxu0 %v11016_v10 }
0x196a   : > { %v3048_v14 = vadd.f32 %v3047_v13, %v11477_v49 }
0x196c   : > { %v3049_v15 = vsel %vm712_vm1, %v3048_v14, 0.0 }
0x196d   : > { %3050 = vadd.xlane.f32.xlu1 %v3049_v15 }
0x19fa   : > { %v3051_v16 = vpop.xlane.xlu1 %3050 }
0x19fb   : > { %v3052_v17 = vmul.f32 0.03125, %v3051_v16 }
0x19fd   : > { %v3053_v18 = vsub.f32 %v3048_v14, %v3052_v17 }
0x19ff   : > { %v3054_v19 = vmul.f32 %v3053_v18, %v3053_v18 }
0x1a01   : > { %v3055_v20 = vsel %vm712_vm1, %v3054_v19, 0.0 }
0x1a02   : > { %3056 = vadd.xlane.f32.xlu1 %v3055_v20 }
0x1a8f   : > { %v3057_v49 = vpop.xlane.xlu1 %3056 }
0x1a90   : > { %v3058_v29 = vmul.f32 0.03125, %v3057_v49 }
0x1a92   : > { %v3059_v30 = vadd.f32 1e-05, %v3058_v29 }
0x1a94   : > { %10732 = vrsqrt.f32 %v3059_v30 }
0x1a9e   : > { %v10733_v31 = vpop.eup %10732 }
0x1a9f   : > { %v3061_v33 = vmul.f32 %v10733_v31, %v3053_v18 }
0x1aa1   : > { %v3068_v37 = vmul.f32 %v9286_v32, %v3061_v33 }
0x1aa3   : > { %v3075_v39 = vadd.f32 %v9287_v36, %v3068_v37 }
0x1aa5   : > { %9952 = vmatmul.mubr.msk.f32.vlgmr.msra.gmra.mrb[36].mxu1 %vm712_vm1, %v3075_v39 }
0x1aa6   : > { %10457 = vmatpush3.bf16.msra.mxu1 %v10456_v38  ;;  %9962 = vmatprep.mubr.msk.f32.mxu1 %vm11015_vm0, %v11016_v10  ;;  %v9300_v38 = vld [vmem:[%s12447_s5 + $0x48] sm:$0xff] }
0x1aa7   : > { %10458 = vmatprep.subr.bf16.mxu1 %v11013_v4 }
0x1aaa   : > { %10460 = vmatpush3.bf16.msra.mxu1 %v10459_v42 }
0x1aab   : > { %9976 = vmatprep.subr.mxu1 %v11016_v10 }
0x1b78   : > { %v3151_v44 = vpop.f32.mrb[36].mxu1 }
0x1b79   : > { %v3152_v45 = vadd.f32 %v9288_v43, %v3151_v44  ;;  %v9953_v27 = vpop.f32.mrb[37].mxu1 }
0x1b7b   : > { %vm3155_vm4 = vcmp.ge.f32.partialorder %v3152_v45, 0.0  ;;  %v3156_v46 = vmul.f32 0.01, %v3152_v45 }
0x1b7d   : > { %v3157_v47 = vsel %vm3155_vm4, %v3152_v45, %v3156_v46  ;;  %v9299_v46 = vld [vmem:[%s12447_s5 + $0x40] sm:$0xff] }
0x1b7e   : > { %9963 = vmatmul.mubr.msk.f32.vlgmr.msra.gmra.mrb[38].mxu1 %vm712_vm1, %v3157_v47 }
0x1b7f   : > { %9978 = vmatprep.mubr.msk.f32.mxu1 %vm11015_vm0, %v11016_v10 }
0x1c51   : > { %v3233_v50 = vpop.f32.mrb[38].mxu1 }
0x1c52   : > { %v3234_v51 = vadd.f32 %v9290_v48, %v3233_v50  ;;  %v9964_v53 = vpop.f32.mrb[39].mxu1 }
0x1c54   : > { %v3237_v54 = vadd.f32 %v3234_v51, %v3075_v39 }
0x1c56   : > { %v3238_v55 = vsel %vm712_vm1, %v3237_v54, 0.0 }
0x1c57   : > { %3239 = vadd.xlane.f32.xlu1 %v3238_v55 }
0x1ce4   : > { %v3240_v56 = vpop.xlane.xlu1 %3239 }
0x1ce5   : > { %v3241_v57 = vmul.f32 0.03125, %v3240_v56 }
0x1ce7   : > { %v3242_v58 = vsub.f32 %v3237_v54, %v3241_v57 }
0x1ce9   : > { %v3243_v59 = vmul.f32 %v3242_v58, %v3242_v58 }
0x1ceb   : > { %v3244_v60 = vsel %vm712_vm1, %v3243_v59, 0.0 }
0x1cec   : > { %3245 = vadd.xlane.f32.xlu1 %v3244_v60 }
0x1d79   : > { %v3246_v1 = vpop.xlane.xlu1 %3245 }
0x1d7a   : > { %v3247_v2 = vmul.f32 0.03125, %v3246_v1 }
0x1d7c   : > { %v3248_v3 = vadd.f32 1e-05, %v3247_v2 }
0x1d7e   : > { %10734 = vrsqrt.f32 %v3248_v3 }
0x1d88   : > { %v10735_v5 = vpop.eup %10734 }
0x1d89   : > { %v3250_v7 = vmul.f32 %v10735_v5, %v3242_v58 }
0x1d8b   : > { %v3257_v9 = vmul.f32 %v9292_v6, %v3250_v7 }
0x1d8d   : > { %v11633_v11 = vadd.f32 %v9293_v8, %v3257_v9 }
0x1d8f   : > { %9974 = vmatmul.mubr.msk.f32.vlgmr.msra.gmra.mrb[20].mxu0 %vm712_vm1, %v11633_v11 }
0x1d90   : > { %9988 = vmatprep.mubr.msk.f32.mxu0 %vm11015_vm0, %v11016_v10 }
0x1e62   : > { %v3376_v13 = vpop.f32.mrb[20].mxu0 }
0x1e63   : > { %v11642_v14 = vadd.f32 %v9310_v12, %v3376_v13  ;;  %v9975_v15 = vpop.f32.mrb[21].mxu0  ;;  %v9301_v12 = vld [vmem:[%s12447_s5 + $0x50] sm:$0xff] }
0x1e65   : > { %3547 = vrot.lane.b32.xlu0 %v11642_v14, %s12500_s24  ;;  %3381 = vrot.lane.b32.xlu1 %v11642_v14, %s12498_s27 }
0x1e69   : > { %3545 = vrot.lane.b32.xlu0 %v11642_v14, %s12496_s28  ;;  %s12551_s28 = sld [smem:[#allocation19_spill]] }
0x1ed7   : > { %v3548_v16 = vpop.permute.xlu0 %3547  ;;  %v3382_v17 = vpop.permute.xlu1 %3381 }
0x1ed8   : > { %9977 = vmatpush3.xpose.msk.msra.mxu1 %vm789_vm2, %v3382_v17  ;;  %9987 = vmatpush3.xpose.msk.msra.mxu0 %vm789_vm2, %v3548_v16 }
0x1ed9   : > { %9981 = vmatprep.subr.mxu1 %v11016_v10  ;;  %9996 = vmatprep.subr.mxu0 %v11016_v10 }
0x1edb   : > { %v3546_v18 = vpop.permute.xlu0 %3545  ;;  %9979 = vmatmul.mubr.msk.f32.vlgmr.msra.gmra.mrb[40].mxu1 %vm789_vm2, %v11642_v14 }
0x1edc   : > { %9989 = vmatmul.mubr.msk.f32.vlgmr.msra.gmra.mrb[22].mxu0 %vm789_vm2, %v3546_v18  ;;  %9983 = vmatprep.mubr.msk.f32.mxu1 %vm11015_vm0, %v11016_v10 }
0x1edd   : > { %9998 = vmatprep.mubr.msk.f32.mxu0 %vm11015_vm0, %v11016_v10  ;;  %9997 = vmatpush3.msra.mxu0 %v9300_v38 }
0x1ede   : > { %10006 = vmatprep.subr.mxu0 %v11016_v10 }
0x1fae   : > { %v3453_v19 = vpop.f32.mrb[40].mxu1 }
0x1faf   : > { %v3457_v20 = vmul.f32 0.35355338, %v3453_v19  ;;  %v9980_v21 = vpop.f32.mrb[41].mxu1  ;;  %v3619_v22 = vpop.f32.mrb[22].mxu0 }
0x1fb0   : > { %v3623_v23 = vmul.f32 0.35355338, %v3619_v22  ;;  %v9990_v25 = vpop.f32.mrb[23].mxu0 }
0x1fb1   : > { %v3458_v26 = vsel %vm789_vm2, %v3457_v20, -inf }
0x1fb2   : > { %3459 = vmax.xlane.f32.xlu0 %v3458_v26  ;;  %v3624_v28 = vsel %vm789_vm2, %v3623_v23, -inf  ;;  %v9302_v26 = vld [vmem:[%s12447_s5 + $0x58] sm:$0xff] }
0x1fb3   : > { %3625 = vmax.xlane.f32.xlu1 %v3624_v28 }
0x1fc4   : > { %3635 = vrot.lane.b32.xlu1 %v11642_v14, %s12494_s17 }
0x1fc8   : > { %3857 = vrot.lane.b32.xlu1 %v11642_v14, %s12492_s29  ;;  %s12548_s29 = smov 88  }
0x203f   : > { %v3460_v49 = vpop.xlane.xlu0 %3459 }
0x2040   : > { %v3461_v29 = vsub.f32 %v3457_v20, %v3460_v49  ;;  %v3626_v30 = vpop.xlane.xlu1 %3625 }
0x2041   : > { %v3627_v31 = vsub.f32 %v3623_v23, %v3626_v30 }
0x2042   : > { %v3462_v32 = vmul.f32 1.442695, %v3461_v29 }
0x2043   : > { %v3628_v33 = vmul.f32 1.442695, %v3627_v31 }
0x2044   : > { %10736 = vpow2.f32 %v3462_v32  ;;  %v3636_v44 = vpop.permute.xlu1 %3635 }
0x2045   : > { %10738 = vpow2.f32 %v3628_v33 }
0x2048   : > { %v3858_v54 = vpop.permute.xlu1 %3857 }
0x204e   : > { %v10737_v34 = vpop.eup %10736 }
0x204f   : > { %v3464_v35 = vsel %vm789_vm2, %v10737_v34, 0.0  ;;  %v10739_v36 = vpop.eup %10738 }
0x2050   : > { %3465 = vadd.xlane.f32.xlu0 %v3464_v35  ;;  %v3630_v37 = vsel %vm789_vm2, %v10739_v36, 0.0  ;;  %v9328_v35 = vld [vmem:[%s12448_s6 + $0x2] ss:$0 sm:$0xff] }
0x2054   : > { %3631 = vadd.xlane.f32.xlu0 %v3630_v37 }
0x206a   : > { %3469 = vrot.lane.b32.xlu0 %v11642_v14, %s12542_s0 }
0x206e   : > { %3859 = vrot.lane.b32.xlu0 %v11642_v14, %s12543_s2 }
0x20dd   : > { %v3466_v39 = vpop.xlane.xlu0 %3465 }
0x20de   : > { %10740 = vrcp.f32 %v3466_v39 }
0x20e1   : > { %v3632_v40 = vpop.xlane.xlu0 %3631 }
0x20e2   : > { %10742 = vrcp.f32 %v3632_v40 }
0x20e5   : > { %v3470_v41 = vpop.permute.xlu0 %3469 }
0x20e6   : > { %9982 = vmatpush3.msra.mxu1 %v3470_v41 }
0x20e7   : > { %9991 = vmatprep.subr.mxu1 %v11016_v10 }
0x20e8   : > { %v10741_v42 = vpop.eup %10740 }
0x20e9   : > { %v3468_v43 = vmul.f32 %v10741_v42, %v10737_v34  ;;  %v3860_v51 = vpop.permute.xlu0 %3859 }
0x20eb   : > { %9984 = vmatmul.mubr.msk.f32.vlgmr.msra.gmra.mrb[42].mxu1 %vm789_vm2, %v3468_v43 }
0x20ec   : > { %v10743_v45 = vpop.eup %10742  ;;  %9992 = vmatpush3.msra.mxu1 %v3636_v44  ;;  %9993 = vmatprep.mubr.msk.f32.mxu1 %vm11015_vm0, %v11016_v10 }
0x20ed   : > { %v3634_v27 = vmul.f32 %v10743_v45, %v10739_v36  ;;  %10001 = vmatprep.subr.mxu1 %v11016_v10 }
0x20ef   : > { %9994 = vmatmul.mubr.msk.f32.vlgmr.msra.gmra.mrb[44].mxu1 %vm789_vm2, %v3634_v27 }
0x20f0   : > { %10003 = vmatprep.mubr.msk.f32.mxu1 %vm11015_vm0, %v11016_v10  ;;  %10002 = vmatpush3.msra.mxu1 %v9299_v46  ;;  %v3284_v46 = vld [vmem:[#allocation7 + $0x40] sm:$0xff] }
0x20f1   : > { %10011 = vmatprep.subr.mxu1 %v11016_v10 }
0x21be   : > { %v3541_v47 = vpop.f32.mrb[42].mxu1 }
0x21bf   : > { %v9985_v48 = vpop.f32.mrb[43].mxu1  ;;  %10004 = vmatmul.mubr.msk.f32.vlgmr.msra.gmra.mrb[46].mxu1 %vm789_vm2, %v3541_v47  ;;  %v3285_v47 = vld [vmem:[#allocation7 + $0x48] sm:$0xff] }
0x21c0   : > { %10013 = vmatprep.mubr.msk.f32.mxu1 %vm11015_vm0, %v11016_v10  ;;  %v10468_v48 = vpack.c.bf16 %v3285_v47, %v3284_v46 }
0x21c2   : > { %v3707_v50 = vpop.f32.mrb[44].mxu1 }
0x21c3   : > { %v9995_v53 = vpop.f32.mrb[45].mxu1  ;;  %9999 = vmatmul.mubr.msk.f32.vlgmr.msra.gmra.mrb[24].mxu0 %vm789_vm2, %v3707_v50  ;;  %v3286_v50 = vld [vmem:[#allocation7 + $0x50] sm:$0xff] }
0x21c4   : > { %10007 = vmatpush3.xpose.msk.msra.mxu0 %vm789_vm2, %v3860_v51  ;;  %10008 = vmatprep.mubr.msk.f32.mxu0 %vm11015_vm0, %v11016_v10  ;;  %v3287_v51 = vld [vmem:[#allocation7 + $0x58] sm:$0xff] }
0x21c5   : > { %10016 = vmatprep.subr.mxu0 %v11016_v10  ;;  %v10471_v53 = vpack.c.bf16 %v3287_v51, %v3286_v50 }
0x21c7   : > { %10009 = vmatmul.mubr.msk.f32.vlgmr.msra.gmra.mrb[26].mxu0 %vm789_vm2, %v3858_v54  ;;  %v3292_v54 = vld [vmem:[#allocation8 + $0x48] sm:$0xff] }
0x21c8   : > { %10018 = vmatprep.mubr.msk.f32.mxu0 %vm11015_vm0, %v11016_v10  ;;  %10017 = vmatpush3.msra.mxu0 %v9301_v12 }
0x21c9   : > { %10026 = vmatprep.subr.mxu0 %v11016_v10 }
0x2292   : > { %v3853_v55 = vpop.f32.mrb[46].mxu1 }
0x2293   : > { %v10005_v56 = vpop.f32.mrb[47].mxu1 }
0x2296   : > { %v3780_v57 = vpop.f32.mrb[24].mxu0 }
0x2297   : > { %v3854_v58 = vadd.f32 %v3853_v55, %v3780_v57  ;;  %v10000_v59 = vpop.f32.mrb[25].mxu0 }
0x229a   : > { %v3931_v60 = vpop.f32.mrb[26].mxu0 }
0x229b   : > { %v3935_v61 = vmul.f32 0.35355338, %v3931_v60  ;;  %v10010_v62 = vpop.f32.mrb[27].mxu0  ;;  %v9329_v60 = vld [vmem:[%s12449_s7 + $0x2] ss:$0 sm:$0xff] }
0x229c   : > { %v9330_v62 = vld [vmem:[%s12450_s8 + $0x2] ss:$0 sm:$0xff] }
0x229d   : > { %v3936_v63 = vsel %vm789_vm2, %v3935_v61, -inf }
0x229e   : > { %3937 = vmax.xlane.f32.xlu0 %v3936_v63 }
0x22b4   : > { %3947 = vrot.lane.b32.xlu0 %v11642_v14, %s12540_s3 }
0x22b8   : > { %4097 = vrot.lane.b32.xlu0 %v11642_v14, %s12539_s21 }
0x232b   : > { %v3938_v0 = vpop.xlane.xlu0 %3937 }
0x232c   : > { %v3939_v52 = vsub.f32 %v3935_v61, %v3938_v0 }
0x232e   : > { %v3940_v24 = vmul.f32 1.442695, %v3939_v52  ;;  %v3293_v52 = vld [vmem:[#allocation8 + $0x50] sm:$0xff] }
0x232f   : > { %v3948_v1 = vpop.permute.xlu0 %3947 }
0x2330   : > { %10744 = vpow2.f32 %v3940_v24  ;;  %10012 = vmatpush3.msra.mxu1 %v3948_v1  ;;  %v3294_v24 = vld [vmem:[#allocation8 + $0x58] sm:$0xff] }
0x2331   : > { %10021 = vmatprep.subr.mxu1 %v11016_v10  ;;  %v10477_v1 = vpack.c.bf16 %v3294_v24, %v3293_v52 }
0x2333   : > { %v4098_v9 = vpop.permute.xlu0 %4097 }
0x233a   : > { %v10745_v2 = vpop.eup %10744 }
0x233b   : > { %v3942_v3 = vsel %vm789_vm2, %v10745_v2, 0.0 }
0x233c   : > { %3943 = vadd.xlane.f32.xlu1 %v3942_v3 }
0x234d   : > { %4099 = vrot.lane.b32.xlu1 %v11642_v14, %s12544_s22 }
0x23c9   : > { %v3944_v5 = vpop.xlane.xlu1 %3943 }
0x23ca   : > { %10746 = vrcp.f32 %v3944_v5 }
0x23cd   : > { %v4100_v8 = vpop.permute.xlu1 %4099 }
0x23d4   : > { %v10747_v6 = vpop.eup %10746 }
0x23d5   : > { %v3946_v7 = vmul.f32 %v10747_v6, %v10745_v2  ;;  %v9331_v2 = vld [vmem:[%s12452_s10 + $0x2] ss:$0 sm:$0xff] }
0x23d7   : > { %10014 = vmatmul.mubr.msk.f32.vlgmr.msra.gmra.mrb[48].mxu1 %vm789_vm2, %v3946_v7 }
0x23d8   : > { %10022 = vmatpush3.xpose.msk.msra.mxu1 %vm789_vm2, %v4100_v8  ;;  %10023 = vmatprep.mubr.msk.f32.mxu1 %vm11015_vm0, %v11016_v10 }
0x23d9   : > { %10031 = vmatprep.subr.mxu1 %v11016_v10 }
0x23db   : > { %10024 = vmatmul.mubr.msk.f32.vlgmr.msra.gmra.mrb[50].mxu1 %vm789_vm2, %v4098_v9  ;;  %v9333_v9 = vld [vmem:[%s12454_s12 + $0x2] ss:$0 sm:$0xff] }
0x23dc   : > { %10033 = vmatprep.mubr.msk.f32.mxu1 %vm11015_vm0, %v11016_v10  ;;  %10032 = vmatpush3.msra.mxu1 %v9302_v26 }
0x23dd   : > { %10473 = vmatprep.subr.bf16.mxu1 %v11013_v4 }
0x24aa   : > { %v4019_v13 = vpop.f32.mrb[48].mxu1 }
0x24ab   : > { %v10015_v15 = vpop.f32.mrb[49].mxu1  ;;  %10019 = vmatmul.mubr.msk.f32.vlgmr.msra.gmra.mrb[28].mxu0 %vm789_vm2, %v4019_v13 }
0x24ac   : > { %10028 = vmatprep.mubr.msk.f32.mxu0 %vm11015_vm0, %v11016_v10 }
0x24ae   : > { %v4171_v16 = vpop.f32.mrb[50].mxu1 }
0x24af   : > { %v4175_v17 = vmul.f32 0.35355338, %v4171_v16  ;;  %v10025_v18 = vpop.f32.mrb[51].mxu1 }
0x24b1   : > { %v4176_v19 = vsel %vm789_vm2, %v4175_v17, -inf }
0x24b2   : > { %4177 = vmax.xlane.f32.xlu1 %v4176_v19 }
0x253f   : > { %v4178_v20 = vpop.xlane.xlu1 %4177 }
0x2540   : > { %v4179_v21 = vsub.f32 %v4175_v17, %v4178_v20 }
0x2542   : > { %v4180_v22 = vmul.f32 1.442695, %v4179_v21 }
0x2544   : > { %10748 = vpow2.f32 %v4180_v22 }
0x254e   : > { %v10749_v23 = vpop.eup %10748 }
0x254f   : > { %v4182_v25 = vsel %vm789_vm2, %v10749_v23, 0.0 }
0x2550   : > { %4183 = vadd.xlane.f32.xlu0 %v4182_v25  ;;  %v9338_v25 = vld [vmem:[%s12538_s26 + $0x68] sm:$0xff] }
0x2566   : > { %4187 = vrot.lane.b32.xlu0 %v11642_v14, %s12541_s18 }
0x257e   : > { %v4092_v28 = vpop.f32.mrb[28].mxu0 }
0x257f   : > { %v4096_v49 = vadd.f32 %v4092_v28, %v3854_v58  ;;  %v10020_v29 = vpop.f32.mrb[29].mxu0  ;;  %v9339_v28 = vld [vmem:[%s12538_s26 + $0x70] sm:$0xff] }
0x25dd   : > { %v4184_v30 = vpop.xlane.xlu0 %4183 }
0x25de   : > { %10750 = vrcp.f32 %v4184_v30 }
0x25e1   : > { %v4188_v31 = vpop.permute.xlu0 %4187 }
0x25e2   : > { %10027 = vmatpush3.msra.mxu0 %v4188_v31 }
0x25e3   : > { %10467 = vmatprep.subr.bf16.mxu0 %v11013_v4 }
0x25e8   : > { %v10751_v32 = vpop.eup %10750 }
0x25e9   : > { %v4186_v33 = vmul.f32 %v10751_v32, %v10749_v23  ;;  %v9337_v23 = vld [vmem:[%s12538_s26 + $0x60] sm:$0xff] }
0x25ea   : > { %v10480_v26 = vpack.c.bf16 %v9338_v25, %v9337_v23 }
0x25eb   : > { %10029 = vmatmul.mubr.msk.f32.vlgmr.msra.gmra.mrb[30].mxu0 %vm789_vm2, %v4186_v33 }
0x25ec   : > { %10044 = vmatprep.mubr.msk.f32.mxu0 %vm11015_vm0, %v11016_v10  ;;  %10469 = vmatpush3.bf16.msra.mxu0 %v10468_v48 }
0x25ed   : > { %10470 = vmatprep.subr.bf16.mxu0 %v11013_v4 }
0x25f0   : > { %10472 = vmatpush3.bf16.msra.mxu0 %v10471_v53 }
0x25f1   : > { %10479 = vmatprep.subr.bf16.mxu0 %v11013_v4 }
0x26be   : > { %v4259_v14 = vpop.f32.mrb[30].mxu0 }
0x26bf   : > { %v10030_v34 = vpop.f32.mrb[31].mxu0  ;;  %10034 = vmatmul.mubr.msk.f32.vlgmr.msra.gmra.mrb[52].mxu1 %vm789_vm2, %v4259_v14  ;;  %v9335_v14 = vld [vmem:[%s12455_s13 + $0x2] ss:$0 sm:$0xff] }
0x26c0   : > { %10055 = vmatprep.mubr.msk.f32.mxu1 %vm11015_vm0, %v11016_v10 }
0x2792   : > { %v4332_v36 = vpop.f32.mrb[52].mxu1 }
0x2793   : > { %v4336_v37 = vadd.f32 %v4332_v36, %v4096_v49  ;;  %v10035_v38 = vpop.f32.mrb[53].mxu1  ;;  %v9340_v49 = vld [vmem:[%s12538_s26 + $0x78] sm:$0xff] }
0x2794   : > { %v10483_v29 = vpack.c.bf16 %v9340_v49, %v9339_v28  ;;  %v9353_v38 = vld [vmem:[%s12446_s4 + $0x3] ss:$0 sm:$0xff] }
0x2795   : > { %v4343_v39 = vadd.f32 %v9328_v35, %v4336_v37  ;;  %v9336_v35 = vld [vmem:[%s12456_s14 + $0x2] ss:$0 sm:$0xff] }
0x2797   : > { %v4344_v40 = vadd.f32 %v4343_v39, %v11633_v11  ;;  %v3291_v11 = vld [vmem:[#allocation8 + $0x40] sm:$0xff] }
0x2798   : > { %v10474_v55 = vpack.c.bf16 %v3292_v54, %v3291_v11 }
0x2799   : > { %v4345_v41 = vsel %vm712_vm1, %v4344_v40, 0.0 }
0x279a   : > { %4346 = vadd.xlane.f32.xlu1 %v4345_v41  ;;  %10475 = vmatpush3.bf16.msra.mxu1 %v10474_v55 }
0x279b   : > { %10476 = vmatprep.subr.bf16.mxu1 %v11013_v4 }
0x279e   : > { %10478 = vmatpush3.bf16.msra.mxu1 %v10477_v1 }
0x279f   : > { %10069 = vmatprep.subr.mxu1 %v11016_v10 }
0x2827   : > { %v4347_v42 = vpop.xlane.xlu1 %4346 }
0x2828   : > { %v4348_v43 = vmul.f32 0.03125, %v4347_v42 }
0x282a   : > { %v4349_v44 = vsub.f32 %v4344_v40, %v4348_v43 }
0x282c   : > { %v4350_v45 = vmul.f32 %v4349_v44, %v4349_v44 }
0x282e   : > { %v4351_v27 = vsel %vm712_vm1, %v4350_v45, 0.0 }
0x282f   : > { %4352 = vadd.xlane.f32.xlu1 %v4351_v27 }
0x28bc   : > { %v4353_v56 = vpop.xlane.xlu1 %4352 }
0x28bd   : > { %v4354_v57 = vmul.f32 0.03125, %v4353_v56 }
0x28bf   : > { %v4355_v58 = vadd.f32 1e-05, %v4354_v57 }
0x28c1   : > { %10752 = vrsqrt.f32 %v4355_v58 }
0x28cb   : > { %v10753_v59 = vpop.eup %10752 }
0x28cc   : > { %v4357_v61 = vmul.f32 %v10753_v59, %v4349_v44 }
0x28ce   : > { %v4364_v63 = vmul.f32 %v9329_v60, %v4357_v61 }
0x28d0   : > { %v4371_v0 = vadd.f32 %v9330_v62, %v4364_v63  ;;  %v9343_v63 = vld [vmem:[%s12447_s5 + $0x68] sm:$0xff] }
0x28d2   : > { %10045 = vmatmul.mubr.msk.f32.vlgmr.msra.gmra.mrb[32].mxu0 %vm712_vm1, %v4371_v0 }
0x28d3   : > { %10066 = vmatprep.mubr.msk.f32.mxu0 %vm11015_vm0, %v11016_v10  ;;  %10481 = vmatpush3.bf16.msra.mxu0 %v10480_v26 }
0x28d4   : > { %10482 = vmatprep.subr.bf16.mxu0 %v11013_v4 }
0x28d7   : > { %10484 = vmatpush3.bf16.msra.mxu0 %v10483_v29 }
0x28d8   : > { %10079 = vmatprep.subr.mxu0 %v11016_v10 }
0x29a5   : > { %v4447_v3 = vpop.f32.mrb[32].mxu0 }
0x29a6   : > { %v4448_v5 = vadd.f32 %v9331_v2, %v4447_v3  ;;  %v10046_v6 = vpop.f32.mrb[33].mxu0 }
0x29a8   : > { %vm4451_vm5 = vcmp.ge.f32.partialorder %v4448_v5, 0.0  ;;  %v4452_v7 = vmul.f32 0.01, %v4448_v5 }
0x29aa   : > { %v4453_v8 = vsel %vm4451_vm5, %v4448_v5, %v4452_v7  ;;  %v9342_v7 = vld [vmem:[%s12447_s5 + $0x60] sm:$0xff] }
0x29ab   : > { %10056 = vmatmul.mubr.msk.f32.vlgmr.msra.gmra.mrb[54].mxu1 %vm712_vm1, %v4453_v8 }
0x29ac   : > { %10071 = vmatprep.mubr.msk.f32.mxu1 %vm11015_vm0, %v11016_v10 }
0x2a7e   : > { %v4529_v12 = vpop.f32.mrb[54].mxu1 }
0x2a7f   : > { %v4530_v13 = vadd.f32 %v9333_v9, %v4529_v12  ;;  %v10057_v15 = vpop.f32.mrb[55].mxu1 }
0x2a81   : > { %v4533_v16 = vadd.f32 %v4530_v13, %v4371_v0 }
0x2a83   : > { %v4534_v17 = vsel %vm712_vm1, %v4533_v16, 0.0 }
0x2a84   : > { %4535 = vadd.xlane.f32.xlu1 %v4534_v17 }
0x2b11   : > { %v4536_v18 = vpop.xlane.xlu1 %4535 }
0x2b12   : > { %v4537_v19 = vmul.f32 0.03125, %v4536_v18 }
0x2b14   : > { %v4538_v20 = vsub.f32 %v4533_v16, %v4537_v19 }
0x2b16   : > { %v4539_v21 = vmul.f32 %v4538_v20, %v4538_v20 }
0x2b18   : > { %v4540_v22 = vsel %vm712_vm1, %v4539_v21, 0.0 }
0x2b19   : > { %4541 = vadd.xlane.f32.xlu1 %v4540_v22 }
0x2ba6   : > { %v4542_v30 = vpop.xlane.xlu1 %4541 }
0x2ba7   : > { %v4543_v31 = vmul.f32 0.03125, %v4542_v30 }
0x2ba9   : > { %v4544_v32 = vadd.f32 1e-05, %v4543_v31 }
0x2bab   : > { %10754 = vrsqrt.f32 %v4544_v32 }
0x2bb5   : > { %v10755_v33 = vpop.eup %10754 }
0x2bb6   : > { %v4546_v34 = vmul.f32 %v10755_v33, %v4538_v20 }
0x2bb8   : > { %v4553_v36 = vmul.f32 %v9335_v14, %v4546_v34 }
0x2bba   : > { %v11789_v37 = vadd.f32 %v9336_v35, %v4553_v36 }
0x2bbc   : > { %10067 = vmatmul.mubr.msk.f32.vlgmr.msra.gmra.mrb[34].mxu0 %vm712_vm1, %v11789_v37 }
0x2bbd   : > { %10081 = vmatprep.mubr.msk.f32.mxu0 %vm11015_vm0, %v11016_v10 }
0x2c8f   : > { %v4672_v39 = vpop.f32.mrb[34].mxu0 }
0x2c90   : > { %v11798_v40 = vadd.f32 %v9353_v38, %v4672_v39  ;;  %v10068_v41 = vpop.f32.mrb[35].mxu0  ;;  %v9344_v38 = vld [vmem:[%s12447_s5 + $0x70] sm:$0xff] }
0x2c92   : > { %4843 = vrot.lane.b32.xlu0 %v11798_v40, %s12500_s24  ;;  %4677 = vrot.lane.b32.xlu1 %v11798_v40, %s12498_s27  ;;  %s12550_s24 = sld [smem:[#allocation16_spill]]  ;;  %s12552_s27 = sld [smem:[#allocation22_spill]] }
0x2c96   : > { %4841 = vrot.lane.b32.xlu0 %v11798_v40, %s12545_s19 }
0x2c98   : > { %s646_s17 = sand.u32 1, %s12550_s24   ;;  %p12556_p3 = scmp.ne.s32.totalorder %s12552_s27, 0 }
0x2c99   : > { %s11028_s24 = smov [#allocation10]  }
0x2d04   : > { %v4844_v42 = vpop.permute.xlu0 %4843  ;;  %v4678_v43 = vpop.permute.xlu1 %4677 }
0x2d05   : > { %10070 = vmatpush3.xpose.msk.msra.mxu1 %vm789_vm2, %v4678_v43  ;;  %10080 = vmatpush3.xpose.msk.msra.mxu0 %vm789_vm2, %v4844_v42 }
0x2d06   : > { %10074 = vmatprep.subr.mxu1 %v11016_v10  ;;  %10089 = vmatprep.subr.mxu0 %v11016_v10 }
0x2d08   : > { %v4842_v44 = vpop.permute.xlu0 %4841  ;;  %10072 = vmatmul.mubr.msk.f32.vlgmr.msra.gmra.mrb[56].mxu1 %vm789_vm2, %v11798_v40 }
0x2d09   : > { %10082 = vmatmul.mubr.msk.f32.vlgmr.msra.gmra.mrb[36].mxu0 %vm789_vm2, %v4842_v44  ;;  %10076 = vmatprep.mubr.msk.f32.mxu1 %vm11015_vm0, %v11016_v10 }
0x2d0a   : > { %10091 = vmatprep.mubr.msk.f32.mxu0 %vm11015_vm0, %v11016_v10  ;;  %10090 = vmatpush3.msra.mxu0 %v9343_v63 }
0x2d0b   : > { %10099 = vmatprep.subr.mxu0 %v11016_v10 }
0x2ddb   : > { %v4749_v45 = vpop.f32.mrb[56].mxu1 }
0x2ddc   : > { %v4753_v27 = vmul.f32 0.35355338, %v4749_v45  ;;  %v10073_v46 = vpop.f32.mrb[57].mxu1  ;;  %v4915_v47 = vpop.f32.mrb[36].mxu0 }
0x2ddd   : > { %v4919_v48 = vmul.f32 0.35355338, %v4915_v47  ;;  %v10083_v50 = vpop.f32.mrb[37].mxu0 }
0x2dde   : > { %v4754_v51 = vsel %vm789_vm2, %v4753_v27, -inf }
0x2ddf   : > { %4755 = vmax.xlane.f32.xlu0 %v4754_v51  ;;  %v4920_v53 = vsel %vm789_vm2, %v4919_v48, -inf }
0x2de0   : > { %4921 = vmax.xlane.f32.xlu1 %v4920_v53  ;;  %v9345_v53 = vld [vmem:[%s12447_s5 + $0x78] sm:$0xff] }
0x2df1   : > { %4931 = vrot.lane.b32.xlu1 %v11798_v40, %s12546_s20 }
0x2df5   : > { %5155 = vrot.lane.b32.xlu1 %v11798_v40, %s12543_s2 }
0x2e6c   : > { %v4756_v11 = vpop.xlane.xlu0 %4755 }
0x2e6d   : > { %v4757_v54 = vsub.f32 %v4753_v27, %v4756_v11  ;;  %v4922_v55 = vpop.xlane.xlu1 %4921 }
0x2e6e   : > { %v4923_v56 = vsub.f32 %v4919_v48, %v4922_v55 }
0x2e6f   : > { %v4758_v57 = vmul.f32 1.442695, %v4757_v54 }
0x2e70   : > { %v4924_v58 = vmul.f32 1.442695, %v4923_v56 }
0x2e71   : > { %10756 = vpow2.f32 %v4758_v57  ;;  %v4932_v3 = vpop.permute.xlu1 %4931 }
0x2e72   : > { %10758 = vpow2.f32 %v4924_v58 }
0x2e75   : > { %v5156_v13 = vpop.permute.xlu1 %5155 }
0x2e7b   : > { %v10757_v59 = vpop.eup %10756 }
0x2e7c   : > { %v4760_v60 = vsel %vm789_vm2, %v10757_v59, 0.0  ;;  %v10759_v61 = vpop.eup %10758 }
0x2e7d   : > { %4761 = vadd.xlane.f32.xlu0 %v4760_v60  ;;  %v4926_v62 = vsel %vm789_vm2, %v10759_v61, 0.0  ;;  %v9371_v60 = vld [vmem:[%s12448_s6 + $0x3] ss:$0 sm:$0xff] }
0x2e81   : > { %4927 = vadd.xlane.f32.xlu0 %v4926_v62 }
0x2e97   : > { %4765 = vrot.lane.b32.xlu0 %v11798_v40, %s12542_s0 }
0x2e9b   : > { %5153 = vrot.lane.b32.xlu0 %v11798_v40, %s12547_s23 }
0x2f0a   : > { %v4762_v0 = vpop.xlane.xlu0 %4761 }
0x2f0b   : > { %10760 = vrcp.f32 %v4762_v0 }
0x2f0e   : > { %v4928_v52 = vpop.xlane.xlu0 %4927 }
0x2f0f   : > { %10762 = vrcp.f32 %v4928_v52 }
0x2f12   : > { %v4766_v24 = vpop.permute.xlu0 %4765 }
0x2f13   : > { %10075 = vmatpush3.msra.mxu1 %v4766_v24 }
0x2f14   : > { %10084 = vmatprep.subr.mxu1 %v11016_v10 }
0x2f15   : > { %v10761_v1 = vpop.eup %10760 }
0x2f16   : > { %v4764_v2 = vmul.f32 %v10761_v1, %v10757_v59  ;;  %v5154_v16 = vpop.permute.xlu0 %5153 }
0x2f18   : > { %10077 = vmatmul.mubr.msk.f32.vlgmr.msra.gmra.mrb[58].mxu1 %vm789_vm2, %v4764_v2 }
0x2f19   : > { %v10763_v5 = vpop.eup %10762  ;;  %10085 = vmatpush3.msra.mxu1 %v4932_v3  ;;  %10086 = vmatprep.mubr.msk.f32.mxu1 %vm11015_vm0, %v11016_v10 }
0x2f1a   : > { %v4930_v6 = vmul.f32 %v10763_v5, %v10759_v61  ;;  %10094 = vmatprep.subr.mxu1 %v11016_v10 }
0x2f1c   : > { %10087 = vmatmul.mubr.msk.f32.vlgmr.msra.gmra.mrb[60].mxu1 %vm789_vm2, %v4930_v6 }
0x2f1d   : > { %10096 = vmatprep.mubr.msk.f32.mxu1 %vm11015_vm0, %v11016_v10  ;;  %10095 = vmatpush3.msra.mxu1 %v9342_v7  ;;  %v4580_v7 = vld [vmem:[#allocation7 + $0x60] sm:$0xff] }
0x2f1e   : > { %10104 = vmatprep.subr.mxu1 %v11016_v10 }
0x2feb   : > { %v4837_v8 = vpop.f32.mrb[58].mxu1 }
0x2fec   : > { %v10078_v9 = vpop.f32.mrb[59].mxu1  ;;  %10097 = vmatmul.mubr.msk.f32.vlgmr.msra.gmra.mrb[62].mxu1 %vm789_vm2, %v4837_v8  ;;  %v4581_v8 = vld [vmem:[#allocation7 + $0x68] sm:$0xff] }
0x2fed   : > { %10106 = vmatprep.mubr.msk.f32.mxu1 %vm11015_vm0, %v11016_v10  ;;  %v10486_v9 = vpack.c.bf16 %v4581_v8, %v4580_v7 }
0x2fef   : > { %v5003_v12 = vpop.f32.mrb[60].mxu1 }
0x2ff0   : > { %v10088_v15 = vpop.f32.mrb[61].mxu1  ;;  %10092 = vmatmul.mubr.msk.f32.vlgmr.msra.gmra.mrb[38].mxu0 %vm789_vm2, %v5003_v12  ;;  %v4582_v12 = vld [vmem:[#allocation7 + $0x70] sm:$0xff] }
0x2ff1   : > { %10100 = vmatpush3.xpose.msk.msra.mxu0 %vm789_vm2, %v5156_v13  ;;  %10101 = vmatprep.mubr.msk.f32.mxu0 %vm11015_vm0, %v11016_v10  ;;  %v4583_v13 = vld [vmem:[#allocation7 + $0x78] sm:$0xff] }
0x2ff2   : > { %10109 = vmatprep.subr.mxu0 %v11016_v10  ;;  %v10489_v15 = vpack.c.bf16 %v4583_v13, %v4582_v12 }
0x2ff4   : > { %10102 = vmatmul.mubr.msk.f32.vlgmr.msra.gmra.mrb[40].mxu0 %vm789_vm2, %v5154_v16  ;;  %v4588_v16 = vld [vmem:[#allocation8 + $0x68] sm:$0xff] }
0x2ff5   : > { %10111 = vmatprep.mubr.msk.f32.mxu0 %vm11015_vm0, %v11016_v10  ;;  %10110 = vmatpush3.msra.mxu0 %v9344_v38 }
0x2ff6   : > { %10119 = vmatprep.subr.mxu0 %v11016_v10 }
0x30bf   : > { %v5149_v17 = vpop.f32.mrb[62].mxu1 }
0x30c0   : > { %v10098_v18 = vpop.f32.mrb[63].mxu1 }
0x30c3   : > { %v5076_v19 = vpop.f32.mrb[38].mxu0 }
0x30c4   : > { %v5150_v20 = vadd.f32 %v5149_v17, %v5076_v19  ;;  %v10093_v21 = vpop.f32.mrb[39].mxu0 }
0x30c7   : > { %v5227_v22 = vpop.f32.mrb[40].mxu0 }
0x30c8   : > { %v5231_v23 = vmul.f32 0.35355338, %v5227_v22  ;;  %v10103_v25 = vpop.f32.mrb[41].mxu0  ;;  %v9372_v22 = vld [vmem:[%s12449_s7 + $0x3] ss:$0 sm:$0xff] }
0x30c9   : > { %v9373_v25 = vld [vmem:[%s12450_s8 + $0x3] ss:$0 sm:$0xff] }
0x30ca   : > { %v5232_v26 = vsel %vm789_vm2, %v5231_v23, -inf }
0x30cb   : > { %5233 = vmax.xlane.f32.xlu1 %v5232_v26 }
0x30dc   : > { %5395 = vrot.lane.b32.xlu1 %v11798_v40, %s12544_s22 }
0x30e0   : > { %5393 = vrot.lane.b32.xlu1 %v11798_v40, %s12539_s21 }
0x3158   : > { %v5234_v28 = vpop.xlane.xlu1 %5233 }
0x3159   : > { %v5235_v49 = vsub.f32 %v5231_v23, %v5234_v28 }
0x315b   : > { %v5236_v29 = vmul.f32 1.442695, %v5235_v49  ;;  %v4589_v49 = vld [vmem:[#allocation8 + $0x70] sm:$0xff] }
0x315c   : > { %v5396_v34 = vpop.permute.xlu1 %5395 }
0x315d   : > { %10764 = vpow2.f32 %v5236_v29  ;;  %v4590_v29 = vld [vmem:[#allocation8 + $0x78] sm:$0xff] }
0x3160   : > { %v5394_v36 = vpop.permute.xlu1 %5393 }
0x3167   : > { %v10765_v30 = vpop.eup %10764 }
0x3168   : > { %v5238_v31 = vsel %vm789_vm2, %v10765_v30, 0.0 }
0x3169   : > { %5239 = vadd.xlane.f32.xlu0 %v5238_v31  ;;  %v9374_v31 = vld [vmem:[%s12452_s10 + $0x3] ss:$0 sm:$0xff] }
0x317f   : > { %5243 = vrot.lane.b32.xlu0 %v11798_v40, %s12540_s3 }
0x31f6   : > { %v5240_v32 = vpop.xlane.xlu0 %5239 }
0x31f7   : > { %10766 = vrcp.f32 %v5240_v32 }
0x31fa   : > { %v5244_v33 = vpop.permute.xlu0 %5243 }
0x31fb   : > { %10105 = vmatpush3.msra.mxu1 %v5244_v33 }
0x31fc   : > { %10114 = vmatprep.subr.mxu1 %v11016_v10 }
0x3201   : > { %v10767_v14 = vpop.eup %10766 }
0x3202   : > { %v5242_v35 = vmul.f32 %v10767_v14, %v10765_v30  ;;  %v10495_v30 = vpack.c.bf16 %v4590_v29, %v4589_v49 }
0x3204   : > { %10107 = vmatmul.mubr.msk.f32.vlgmr.msra.gmra.mrb[64].mxu1 %vm789_vm2, %v5242_v35 }
0x3205   : > { %10115 = vmatpush3.xpose.msk.msra.mxu1 %vm789_vm2, %v5396_v34  ;;  %10116 = vmatprep.mubr.msk.f32.mxu1 %vm11015_vm0, %v11016_v10 }
0x3206   : > { %10124 = vmatprep.subr.mxu1 %v11016_v10 }
0x3208   : > { %10117 = vmatmul.mubr.msk.f32.vlgmr.msra.gmra.mrb[66].mxu1 %vm789_vm2, %v5394_v36  ;;  %v9376_v36 = vld [vmem:[%s12454_s12 + $0x3] ss:$0 sm:$0xff] }
0x3209   : > { %10126 = vmatprep.mubr.msk.f32.mxu1 %vm11015_vm0, %v11016_v10  ;;  %10125 = vmatpush3.msra.mxu1 %v9345_v53  ;;  %v9382_v53 = vld [vmem:[%s12538_s26 + $0x90] sm:$0xff] }
0x320a   : > { %10491 = vmatprep.subr.bf16.mxu1 %v11013_v4 }
0x32d7   : > { %v5315_v39 = vpop.f32.mrb[64].mxu1 }
0x32d8   : > { %v10108_v41 = vpop.f32.mrb[65].mxu1  ;;  %10112 = vmatmul.mubr.msk.f32.vlgmr.msra.gmra.mrb[42].mxu0 %vm789_vm2, %v5315_v39 }
0x32d9   : > { %10121 = vmatprep.mubr.msk.f32.mxu0 %vm11015_vm0, %v11016_v10 }
0x32db   : > { %v5467_v42 = vpop.f32.mrb[66].mxu1 }
0x32dc   : > { %v5471_v43 = vmul.f32 0.35355338, %v5467_v42  ;;  %v10118_v44 = vpop.f32.mrb[67].mxu1 }
0x32de   : > { %v5472_v45 = vsel %vm789_vm2, %v5471_v43, -inf }
0x32df   : > { %5473 = vmax.xlane.f32.xlu0 %v5472_v45 }
0x32f5   : > { %5483 = vrot.lane.b32.xlu0 %v11798_v40, %s12541_s18 }
0x336c   : > { %v5474_v27 = vpop.xlane.xlu0 %5473 }
0x336d   : > { %v5475_v46 = vsub.f32 %v5471_v43, %v5474_v27 }
0x336f   : > { %v5476_v47 = vmul.f32 1.442695, %v5475_v46 }
0x3370   : > { %v5484_v48 = vpop.permute.xlu0 %5483 }
0x3371   : > { %10768 = vpow2.f32 %v5476_v47  ;;  %10120 = vmatpush3.msra.mxu0 %v5484_v48  ;;  %v9380_v48 = vld [vmem:[%s12538_s26 + $0x80] sm:$0xff] }
0x3372   : > { %10485 = vmatprep.subr.bf16.mxu0 %v11013_v4 }
0x337b   : > { %v10769_v50 = vpop.eup %10768 }
0x337c   : > { %v5478_v51 = vsel %vm789_vm2, %v10769_v50, 0.0 }
0x337d   : > { %5479 = vadd.xlane.f32.xlu1 %v5478_v51 }
0x33ab   : > { %v5388_v40 = vpop.f32.mrb[42].mxu0 }
0x33ac   : > { %v5392_v11 = vadd.f32 %v5388_v40, %v5150_v20  ;;  %v10113_v54 = vpop.f32.mrb[43].mxu0  ;;  %v9383_v40 = vld [vmem:[%s12538_s26 + $0x98] sm:$0xff] }
0x340a   : > { %v5480_v55 = vpop.xlane.xlu1 %5479 }
0x340b   : > { %10770 = vrcp.f32 %v5480_v55 }
0x3415   : > { %v10771_v56 = vpop.eup %10770 }
0x3416   : > { %v5482_v57 = vmul.f32 %v10771_v56, %v10769_v50  ;;  %v9381_v50 = vld [vmem:[%s12538_s26 + $0x88] sm:$0xff] }
0x3417   : > { %v10498_v51 = vpack.c.bf16 %v9381_v50, %v9380_v48 }
0x3418   : > { %10122 = vmatmul.mubr.msk.f32.vlgmr.msra.gmra.mrb[44].mxu0 %vm789_vm2, %v5482_v57 }
0x3419   : > { %10137 = vmatprep.mubr.msk.f32.mxu0 %vm11015_vm0, %v11016_v10  ;;  %10487 = vmatpush3.bf16.msra.mxu0 %v10486_v9 }
0x341a   : > { %10488 = vmatprep.subr.bf16.mxu0 %v11013_v4 }
0x341d   : > { %10490 = vmatpush3.bf16.msra.mxu0 %v10489_v15 }
0x341e   : > { %10497 = vmatprep.subr.bf16.mxu0 %v11013_v4 }
0x34eb   : > { %v5555_v58 = vpop.f32.mrb[44].mxu0 }
0x34ec   : > { %v10123_v59 = vpop.f32.mrb[45].mxu0  ;;  %10127 = vmatmul.mubr.msk.f32.vlgmr.msra.gmra.mrb[68].mxu1 %vm789_vm2, %v5555_v58  ;;  %v9378_v58 = vld [vmem:[%s12455_s13 + $0x3] ss:$0 sm:$0xff] }
0x34ed   : > { %10148 = vmatprep.mubr.msk.f32.mxu1 %vm11015_vm0, %v11016_v10 }
0x35bf   : > { %v5628_v61 = vpop.f32.mrb[68].mxu1 }
0x35c0   : > { %v5632_v62 = vadd.f32 %v5628_v61, %v5392_v11  ;;  %v10128_v63 = vpop.f32.mrb[69].mxu1  ;;  %v10501_v11 = vpack.c.bf16 %v9383_v40, %v9382_v53 }
0x35c1   : > { %v9396_v63 = vld [vmem:[%s12446_s4 + $0x4] ss:$0 sm:$0xff] }
0x35c2   : > { %v5639_v0 = vadd.f32 %v9371_v60, %v5632_v62  ;;  %v9379_v60 = vld [vmem:[%s12456_s14 + $0x3] ss:$0 sm:$0xff] }
0x35c4   : > { %v5640_v52 = vadd.f32 %v5639_v0, %v11789_v37  ;;  %v4587_v37 = vld [vmem:[#allocation8 + $0x60] sm:$0xff] }
0x35c5   : > { %v10492_v17 = vpack.c.bf16 %v4588_v16, %v4587_v37 }
0x35c6   : > { %v5641_v24 = vsel %vm712_vm1, %v5640_v52, 0.0 }
0x35c7   : > { %5642 = vadd.xlane.f32.xlu1 %v5641_v24  ;;  %10493 = vmatpush3.bf16.msra.mxu1 %v10492_v17 }
0x35c8   : > { %10494 = vmatprep.subr.bf16.mxu1 %v11013_v4 }
0x35cb   : > { %10496 = vmatpush3.bf16.msra.mxu1 %v10495_v30 }
0x35cc   : > { %10162 = vmatprep.subr.mxu1 %v11016_v10 }
0x3654   : > { %v5643_v1 = vpop.xlane.xlu1 %5642 }
0x3655   : > { %v5644_v2 = vmul.f32 0.03125, %v5643_v1 }
0x3657   : > { %v5645_v3 = vsub.f32 %v5640_v52, %v5644_v2 }
0x3659   : > { %v5646_v5 = vmul.f32 %v5645_v3, %v5645_v3 }
0x365b   : > { %v5647_v6 = vsel %vm712_vm1, %v5646_v5, 0.0 }
0x365c   : > { %5648 = vadd.xlane.f32.xlu1 %v5647_v6 }
0x36e9   : > { %v5649_v18 = vpop.xlane.xlu1 %5648 }
0x36ea   : > { %v5650_v19 = vmul.f32 0.03125, %v5649_v18 }
0x36ec   : > { %v5651_v20 = vadd.f32 1e-05, %v5650_v19 }
0x36ee   : > { %10772 = vrsqrt.f32 %v5651_v20 }
0x36f8   : > { %v10773_v21 = vpop.eup %10772 }
0x36f9   : > { %v5653_v23 = vmul.f32 %v10773_v21, %v5645_v3 }
0x36fb   : > { %v5660_v26 = vmul.f32 %v9372_v22, %v5653_v23 }
0x36fd   : > { %v5667_v28 = vadd.f32 %v9373_v25, %v5660_v26  ;;  %v9386_v26 = vld [vmem:[%s12447_s5 + $0x88] sm:$0xff] }
0x36ff   : > { %10138 = vmatmul.mubr.msk.f32.vlgmr.msra.gmra.mrb[46].mxu0 %vm712_vm1, %v5667_v28 }
0x3700   : > { %10159 = vmatprep.mubr.msk.f32.mxu0 %vm11015_vm0, %v11016_v10  ;;  %10499 = vmatpush3.bf16.msra.mxu0 %v10498_v51 }
0x3701   : > { %10500 = vmatprep.subr.bf16.mxu0 %v11013_v4 }
0x3704   : > { %10502 = vmatpush3.bf16.msra.mxu0 %v10501_v11 }
0x3705   : > { %10172 = vmatprep.subr.mxu0 %v11016_v10 }
0x37d2   : > { %v5743_v32 = vpop.f32.mrb[46].mxu0 }
0x37d3   : > { %v5744_v33 = vadd.f32 %v9374_v31, %v5743_v32  ;;  %v10139_v14 = vpop.f32.mrb[47].mxu0 }
0x37d5   : > { %vm5747_vm6 = vcmp.ge.f32.partialorder %v5744_v33, 0.0  ;;  %v5748_v34 = vmul.f32 0.01, %v5744_v33 }
0x37d7   : > { %v5749_v35 = vsel %vm5747_vm6, %v5744_v33, %v5748_v34  ;;  %v9385_v34 = vld [vmem:[%s12447_s5 + $0x80] sm:$0xff] }
0x37d8   : > { %10149 = vmatmul.mubr.msk.f32.vlgmr.msra.gmra.mrb[70].mxu1 %vm712_vm1, %v5749_v35 }
0x37d9   : > { %10164 = vmatprep.mubr.msk.f32.mxu1 %vm11015_vm0, %v11016_v10 }
0x38ab   : > { %v5825_v38 = vpop.f32.mrb[70].mxu1 }
0x38ac   : > { %v5826_v39 = vadd.f32 %v9376_v36, %v5825_v38  ;;  %v10150_v41 = vpop.f32.mrb[71].mxu1 }
0x38ae   : > { %v5829_v42 = vadd.f32 %v5826_v39, %v5667_v28 }
0x38b0   : > { %v5830_v43 = vsel %vm712_vm1, %v5829_v42, 0.0 }
0x38b1   : > { %5831 = vadd.xlane.f32.xlu1 %v5830_v43 }
0x393e   : > { %v5832_v44 = vpop.xlane.xlu1 %5831 }
0x393f   : > { %v5833_v45 = vmul.f32 0.03125, %v5832_v44 }
0x3941   : > { %v5834_v27 = vsub.f32 %v5829_v42, %v5833_v45 }
0x3943   : > { %v5835_v46 = vmul.f32 %v5834_v27, %v5834_v27 }
0x3945   : > { %v5836_v47 = vsel %vm712_vm1, %v5835_v46, 0.0 }
0x3946   : > { %5837 = vadd.xlane.f32.xlu1 %v5836_v47 }
0x39d3   : > { %v5838_v54 = vpop.xlane.xlu1 %5837 }
0x39d4   : > { %v5839_v55 = vmul.f32 0.03125, %v5838_v54 }
0x39d6   : > { %v5840_v56 = vadd.f32 1e-05, %v5839_v55 }
0x39d8   : > { %10774 = vrsqrt.f32 %v5840_v56 }
0x39e2   : > { %v10775_v57 = vpop.eup %10774 }
0x39e3   : > { %v5842_v59 = vmul.f32 %v10775_v57, %v5834_v27 }
0x39e5   : > { %v5849_v61 = vmul.f32 %v9378_v58, %v5842_v59 }
0x39e7   : > { %v11945_v62 = vadd.f32 %v9379_v60, %v5849_v61 }
0x39e9   : > { %10160 = vmatmul.mubr.msk.f32.vlgmr.msra.gmra.mrb[48].mxu0 %vm712_vm1, %v11945_v62 }
0x39ea   : > { %10174 = vmatprep.mubr.msk.f32.mxu0 %vm11015_vm0, %v11016_v10 }
0x3abc   : > { %v5968_v0 = vpop.f32.mrb[48].mxu0 }
0x3abd   : > { %v11954_v52 = vadd.f32 %v9396_v63, %v5968_v0  ;;  %v10161_v24 = vpop.f32.mrb[49].mxu0  ;;  %v9387_v63 = vld [vmem:[%s12447_s5 + $0x90] sm:$0xff] }
0x3abf   : > { %6139 = vrot.lane.b32.xlu0 %v11954_v52, %s12548_s29  ;;  %5973 = vrot.lane.b32.xlu1 %v11954_v52, %s12549_s30 }
0x3ac3   : > { %6137 = vrot.lane.b32.xlu0 %v11954_v52, %s12545_s19 }
0x3b31   : > { %v6140_v1 = vpop.permute.xlu0 %6139  ;;  %v5974_v2 = vpop.permute.xlu1 %5973 }
0x3b32   : > { %10163 = vmatpush3.xpose.msk.msra.mxu1 %vm789_vm2, %v5974_v2  ;;  %10173 = vmatpush3.xpose.msk.msra.mxu0 %vm789_vm2, %v6140_v1 }
0x3b33   : > { %10167 = vmatprep.subr.mxu1 %v11016_v10  ;;  %10182 = vmatprep.subr.mxu0 %v11016_v10 }
0x3b35   : > { %v6138_v3 = vpop.permute.xlu0 %6137  ;;  %10165 = vmatmul.mubr.msk.f32.vlgmr.msra.gmra.mrb[72].mxu1 %vm789_vm2, %v11954_v52 }
0x3b36   : > { %10175 = vmatmul.mubr.msk.f32.vlgmr.msra.gmra.mrb[50].mxu0 %vm789_vm2, %v6138_v3  ;;  %10169 = vmatprep.mubr.msk.f32.mxu1 %vm11015_vm0, %v11016_v10 }
0x3b37   : > { %10184 = vmatprep.mubr.msk.f32.mxu0 %vm11015_vm0, %v11016_v10  ;;  %10183 = vmatpush3.msra.mxu0 %v9386_v26 }
0x3b38   : > { %10192 = vmatprep.subr.mxu0 %v11016_v10 }
0x3c08   : > { %v6045_v5 = vpop.f32.mrb[72].mxu1 }
0x3c09   : > { %v6049_v6 = vmul.f32 0.35355338, %v6045_v5  ;;  %v10166_v7 = vpop.f32.mrb[73].mxu1  ;;  %v6211_v8 = vpop.f32.mrb[50].mxu0 }
0x3c0a   : > { %v6215_v9 = vmul.f32 0.35355338, %v6211_v8  ;;  %v10176_v12 = vpop.f32.mrb[51].mxu0 }
0x3c0b   : > { %v6050_v13 = vsel %vm789_vm2, %v6049_v6, -inf }
0x3c0c   : > { %6051 = vmax.xlane.f32.xlu0 %v6050_v13  ;;  %v6216_v15 = vsel %vm789_vm2, %v6215_v9, -inf  ;;  %v9388_v13 = vld [vmem:[%s12447_s5 + $0x98] sm:$0xff] }
0x3c0d   : > { %6217 = vmax.xlane.f32.xlu1 %v6216_v15 }
0x3c1e   : > { %6227 = vrot.lane.b32.xlu1 %v11954_v52, %s12546_s20 }
0x3c22   : > { %6449 = vrot.lane.b32.xlu1 %v11954_v52, %s12547_s23 }
0x3c99   : > { %v6052_v37 = vpop.xlane.xlu0 %6051 }
0x3c9a   : > { %v6053_v16 = vsub.f32 %v6049_v6, %v6052_v37  ;;  %v6218_v17 = vpop.xlane.xlu1 %6217 }
0x3c9b   : > { %v6219_v18 = vsub.f32 %v6215_v9, %v6218_v17 }
0x3c9c   : > { %v6054_v19 = vmul.f32 1.442695, %v6053_v16 }
0x3c9d   : > { %v6220_v20 = vmul.f32 1.442695, %v6219_v18 }
0x3c9e   : > { %10776 = vpow2.f32 %v6054_v19  ;;  %v6228_v32 = vpop.permute.xlu1 %6227 }
0x3c9f   : > { %10778 = vpow2.f32 %v6220_v20 }
0x3ca2   : > { %v6450_v42 = vpop.permute.xlu1 %6449 }
0x3ca8   : > { %v10777_v21 = vpop.eup %10776 }
0x3ca9   : > { %v6056_v22 = vsel %vm789_vm2, %v10777_v21, 0.0  ;;  %v10779_v23 = vpop.eup %10778 }
0x3caa   : > { %6057 = vadd.xlane.f32.xlu0 %v6056_v22  ;;  %v6222_v25 = vsel %vm789_vm2, %v10779_v23, 0.0  ;;  %v9414_v22 = vld [vmem:[%s12448_s6 + $0x4] ss:$0 sm:$0xff] }
0x3cae   : > { %6223 = vadd.xlane.f32.xlu0 %v6222_v25 }
0x3cc4   : > { %6061 = vrot.lane.b32.xlu0 %v11954_v52, %s12542_s0 }
0x3cc8   : > { %6451 = vrot.lane.b32.xlu0 %v11954_v52, %s12543_s2 }
0x3d37   : > { %v6058_v28 = vpop.xlane.xlu0 %6057 }
0x3d38   : > { %10780 = vrcp.f32 %v6058_v28 }
0x3d3b   : > { %v6224_v49 = vpop.xlane.xlu0 %6223 }
0x3d3c   : > { %10782 = vrcp.f32 %v6224_v49 }
0x3d3f   : > { %v6062_v29 = vpop.permute.xlu0 %6061 }
0x3d40   : > { %10168 = vmatpush3.msra.mxu1 %v6062_v29 }
0x3d41   : > { %10177 = vmatprep.subr.mxu1 %v11016_v10 }
0x3d42   : > { %v10781_v30 = vpop.eup %10780 }
0x3d43   : > { %v6060_v31 = vmul.f32 %v10781_v30, %v10777_v21  ;;  %v6452_v39 = vpop.permute.xlu0 %6451 }
0x3d45   : > { %10170 = vmatmul.mubr.msk.f32.vlgmr.msra.gmra.mrb[74].mxu1 %vm789_vm2, %v6060_v31 }
0x3d46   : > { %v10783_v33 = vpop.eup %10782  ;;  %10178 = vmatpush3.msra.mxu1 %v6228_v32  ;;  %10179 = vmatprep.mubr.msk.f32.mxu1 %vm11015_vm0, %v11016_v10 }
0x3d47   : > { %v6226_v14 = vmul.f32 %v10783_v33, %v10779_v23  ;;  %10187 = vmatprep.subr.mxu1 %v11016_v10 }
0x3d49   : > { %10180 = vmatmul.mubr.msk.f32.vlgmr.msra.gmra.mrb[76].mxu1 %vm789_vm2, %v6226_v14 }
0x3d4a   : > { %10189 = vmatprep.mubr.msk.f32.mxu1 %vm11015_vm0, %v11016_v10  ;;  %10188 = vmatpush3.msra.mxu1 %v9385_v34  ;;  %v5876_v34 = vld [vmem:[#allocation7 + $0x80] sm:$0xff] }
0x3d4b   : > { %10197 = vmatprep.subr.mxu1 %v11016_v10 }
0x3e18   : > { %v6133_v35 = vpop.f32.mrb[74].mxu1 }
0x3e19   : > { %v10171_v36 = vpop.f32.mrb[75].mxu1  ;;  %10190 = vmatmul.mubr.msk.f32.vlgmr.msra.gmra.mrb[78].mxu1 %vm789_vm2, %v6133_v35  ;;  %v5877_v35 = vld [vmem:[#allocation7 + $0x88] sm:$0xff] }
0x3e1a   : > { %10199 = vmatprep.mubr.msk.f32.mxu1 %vm11015_vm0, %v11016_v10  ;;  %v10504_v36 = vpack.c.bf16 %v5877_v35, %v5876_v34 }
0x3e1c   : > { %v6299_v38 = vpop.f32.mrb[76].mxu1 }
0x3e1d   : > { %v10181_v41 = vpop.f32.mrb[77].mxu1  ;;  %10185 = vmatmul.mubr.msk.f32.vlgmr.msra.gmra.mrb[52].mxu0 %vm789_vm2, %v6299_v38  ;;  %v5878_v38 = vld [vmem:[#allocation7 + $0x90] sm:$0xff] }
0x3e1e   : > { %10193 = vmatpush3.xpose.msk.msra.mxu0 %vm789_vm2, %v6452_v39  ;;  %10194 = vmatprep.mubr.msk.f32.mxu0 %vm11015_vm0, %v11016_v10  ;;  %v5879_v39 = vld [vmem:[#allocation7 + $0x98] sm:$0xff] }
0x3e1f   : > { %10202 = vmatprep.subr.mxu0 %v11016_v10  ;;  %v10507_v41 = vpack.c.bf16 %v5879_v39, %v5878_v38 }
0x3e21   : > { %10195 = vmatmul.mubr.msk.f32.vlgmr.msra.gmra.mrb[54].mxu0 %vm789_vm2, %v6450_v42  ;;  %v5884_v42 = vld [vmem:[#allocation8 + $0x88] sm:$0xff] }
0x3e22   : > { %10204 = vmatprep.mubr.msk.f32.mxu0 %vm11015_vm0, %v11016_v10  ;;  %10203 = vmatpush3.msra.mxu0 %v9387_v63 }
0x3e23   : > { %10212 = vmatprep.subr.mxu0 %v11016_v10 }
0x3eec   : > { %v6445_v43 = vpop.f32.mrb[78].mxu1 }
0x3eed   : > { %v10191_v44 = vpop.f32.mrb[79].mxu1 }
0x3ef0   : > { %v6372_v45 = vpop.f32.mrb[52].mxu0 }
0x3ef1   : > { %v6446_v27 = vadd.f32 %v6445_v43, %v6372_v45  ;;  %v10186_v46 = vpop.f32.mrb[53].mxu0 }
0x3ef4   : > { %v6523_v47 = vpop.f32.mrb[54].mxu0 }
0x3ef5   : > { %v6527_v48 = vmul.f32 0.35355338, %v6523_v47  ;;  %v10196_v50 = vpop.f32.mrb[55].mxu0  ;;  %v9415_v47 = vld [vmem:[%s12449_s7 + $0x4] ss:$0 sm:$0xff] }
0x3ef6   : > { %v9416_v50 = vld [vmem:[%s12450_s8 + $0x4] ss:$0 sm:$0xff] }
0x3ef7   : > { %v6528_v51 = vsel %vm789_vm2, %v6527_v48, -inf }
0x3ef8   : > { %6529 = vmax.xlane.f32.xlu0 %v6528_v51 }
0x3f0e   : > { %6539 = vrot.lane.b32.xlu0 %v11954_v52, %s12540_s3 }
0x3f12   : > { %6689 = vrot.lane.b32.xlu0 %v11954_v52, %s12539_s21 }
0x3f85   : > { %v6530_v53 = vpop.xlane.xlu0 %6529 }
0x3f86   : > { %v6531_v40 = vsub.f32 %v6527_v48, %v6530_v53 }
0x3f88   : > { %v6532_v11 = vmul.f32 1.442695, %v6531_v40  ;;  %v5885_v40 = vld [vmem:[#allocation8 + $0x90] sm:$0xff] }
0x3f89   : > { %v6540_v54 = vpop.permute.xlu0 %6539 }
0x3f8a   : > { %10784 = vpow2.f32 %v6532_v11  ;;  %10198 = vmatpush3.msra.mxu1 %v6540_v54  ;;  %v5886_v11 = vld [vmem:[#allocation8 + $0x98] sm:$0xff] }
0x3f8b   : > { %10207 = vmatprep.subr.mxu1 %v11016_v10  ;;  %v10513_v54 = vpack.c.bf16 %v5886_v11, %v5885_v40 }
0x3f8d   : > { %v6690_v61 = vpop.permute.xlu0 %6689 }
0x3f94   : > { %v10785_v55 = vpop.eup %10784 }
0x3f95   : > { %v6534_v56 = vsel %vm789_vm2, %v10785_v55, 0.0 }
0x3f96   : > { %6535 = vadd.xlane.f32.xlu1 %v6534_v56 }
0x3fa7   : > { %6691 = vrot.lane.b32.xlu1 %v11954_v52, %s12544_s22 }
0x4023   : > { %v6536_v57 = vpop.xlane.xlu1 %6535 }
0x4024   : > { %10786 = vrcp.f32 %v6536_v57 }
0x4027   : > { %v6692_v60 = vpop.permute.xlu1 %6691 }
0x402e   : > { %v10787_v58 = vpop.eup %10786 }
0x402f   : > { %v6538_v59 = vmul.f32 %v10787_v58, %v10785_v55  ;;  %v9417_v55 = vld [vmem:[%s12452_s10 + $0x4] ss:$0 sm:$0xff] }
0x4031   : > { %10200 = vmatmul.mubr.msk.f32.vlgmr.msra.gmra.mrb[80].mxu1 %vm789_vm2, %v6538_v59 }
0x4032   : > { %10208 = vmatpush3.xpose.msk.msra.mxu1 %vm789_vm2, %v6692_v60  ;;  %10209 = vmatprep.mubr.msk.f32.mxu1 %vm11015_vm0, %v11016_v10 }
0x4033   : > { %10217 = vmatprep.subr.mxu1 %v11016_v10 }
0x4035   : > { %10210 = vmatmul.mubr.msk.f32.vlgmr.msra.gmra.mrb[82].mxu1 %vm789_vm2, %v6690_v61  ;;  %v9419_v61 = vld [vmem:[%s12454_s12 + $0x4] ss:$0 sm:$0xff] }
0x4036   : > { %10219 = vmatprep.mubr.msk.f32.mxu1 %vm11015_vm0, %v11016_v10  ;;  %10218 = vmatpush3.msra.mxu1 %v9388_v13 }
0x4037   : > { %10509 = vmatprep.subr.bf16.mxu1 %v11013_v4 }
0x4104   : > { %v6611_v0 = vpop.f32.mrb[80].mxu1 }
0x4105   : > { %v10201_v24 = vpop.f32.mrb[81].mxu1  ;;  %10205 = vmatmul.mubr.msk.f32.vlgmr.msra.gmra.mrb[56].mxu0 %vm789_vm2, %v6611_v0 }
0x4106   : > { %10214 = vmatprep.mubr.msk.f32.mxu0 %vm11015_vm0, %v11016_v10 }
0x4108   : > { %v6763_v1 = vpop.f32.mrb[82].mxu1 }
0x4109   : > { %v6767_v2 = vmul.f32 0.35355338, %v6763_v1  ;;  %v10211_v3 = vpop.f32.mrb[83].mxu1 }
0x410b   : > { %v6768_v5 = vsel %vm789_vm2, %v6767_v2, -inf }
0x410c   : > { %6769 = vmax.xlane.f32.xlu1 %v6768_v5 }
0x4199   : > { %v6770_v6 = vpop.xlane.xlu1 %6769 }
0x419a   : > { %v6771_v7 = vsub.f32 %v6767_v2, %v6770_v6 }
0x419c   : > { %v6772_v8 = vmul.f32 1.442695, %v6771_v7 }
0x419e   : > { %10788 = vpow2.f32 %v6772_v8 }
0x41a8   : > { %v10789_v9 = vpop.eup %10788 }
0x41a9   : > { %v6774_v12 = vsel %vm789_vm2, %v10789_v9, 0.0 }
0x41aa   : > { %6775 = vadd.xlane.f32.xlu0 %v6774_v12  ;;  %v9424_v12 = vld [vmem:[%s12538_s26 + $0xa8] sm:$0xff] }
0x41c0   : > { %6779 = vrot.lane.b32.xlu0 %v11954_v52, %s12541_s18 }
0x41d8   : > { %v6684_v15 = vpop.f32.mrb[56].mxu0 }
0x41d9   : > { %v6688_v37 = vadd.f32 %v6684_v15, %v6446_v27  ;;  %v10206_v16 = vpop.f32.mrb[57].mxu0  ;;  %v9425_v15 = vld [vmem:[%s12538_s26 + $0xb0] sm:$0xff] }
0x4237   : > { %v6776_v17 = vpop.xlane.xlu0 %6775 }
0x4238   : > { %10790 = vrcp.f32 %v6776_v17 }
0x423b   : > { %v6780_v18 = vpop.permute.xlu0 %6779 }
0x423c   : > { %10213 = vmatpush3.msra.mxu0 %v6780_v18 }
0x423d   : > { %10503 = vmatprep.subr.bf16.mxu0 %v11013_v4 }
0x4242   : > { %v10791_v19 = vpop.eup %10790 }
0x4243   : > { %v6778_v20 = vmul.f32 %v10791_v19, %v10789_v9  ;;  %v9423_v9 = vld [vmem:[%s12538_s26 + $0xa0] sm:$0xff] }
0x4244   : > { %v10516_v13 = vpack.c.bf16 %v9424_v12, %v9423_v9 }
0x4245   : > { %10215 = vmatmul.mubr.msk.f32.vlgmr.msra.gmra.mrb[58].mxu0 %vm789_vm2, %v6778_v20 }
0x4246   : > { %10230 = vmatprep.mubr.msk.f32.mxu0 %vm11015_vm0, %v11016_v10  ;;  %10505 = vmatpush3.bf16.msra.mxu0 %v10504_v36 }
0x4247   : > { %10506 = vmatprep.subr.bf16.mxu0 %v11013_v4 }
0x424a   : > { %10508 = vmatpush3.bf16.msra.mxu0 %v10507_v41 }
0x424b   : > { %10515 = vmatprep.subr.bf16.mxu0 %v11013_v4 }
0x4318   : > { %v6851_v52 = vpop.f32.mrb[58].mxu0 }
0x4319   : > { %v10216_v21 = vpop.f32.mrb[59].mxu0  ;;  %10220 = vmatmul.mubr.msk.f32.vlgmr.msra.gmra.mrb[84].mxu1 %vm789_vm2, %v6851_v52  ;;  %v9421_v52 = vld [vmem:[%s12455_s13 + $0x4] ss:$0 sm:$0xff] }
0x431a   : > { %10241 = vmatprep.mubr.msk.f32.mxu1 %vm11015_vm0, %v11016_v10 }
0x43ec   : > { %v6924_v23 = vpop.f32.mrb[84].mxu1 }
0x43ed   : > { %v6928_v25 = vadd.f32 %v6924_v23, %v6688_v37  ;;  %v10221_v26 = vpop.f32.mrb[85].mxu1  ;;  %v9426_v37 = vld [vmem:[%s12538_s26 + $0xb8] sm:$0xff] }
0x43ee   : > { %v10519_v16 = vpack.c.bf16 %v9426_v37, %v9425_v15  ;;  %v9439_v26 = vld [vmem:[%s12446_s4 + $0x5] ss:$0 sm:$0xff] }
0x43ef   : > { %v6935_v28 = vadd.f32 %v9414_v22, %v6928_v25  ;;  %v9422_v22 = vld [vmem:[%s12456_s14 + $0x4] ss:$0 sm:$0xff] }
0x43f1   : > { %v6936_v49 = vadd.f32 %v6935_v28, %v11945_v62  ;;  %v5883_v62 = vld [vmem:[#allocation8 + $0x80] sm:$0xff] }
0x43f2   : > { %v10510_v43 = vpack.c.bf16 %v5884_v42, %v5883_v62 }
0x43f3   : > { %v6937_v29 = vsel %vm712_vm1, %v6936_v49, 0.0 }
0x43f4   : > { %6938 = vadd.xlane.f32.xlu1 %v6937_v29  ;;  %10511 = vmatpush3.bf16.msra.mxu1 %v10510_v43 }
0x43f5   : > { %10512 = vmatprep.subr.bf16.mxu1 %v11013_v4 }
0x43f8   : > { %10514 = vmatpush3.bf16.msra.mxu1 %v10513_v54 }
0x43f9   : > { %10255 = vmatprep.subr.mxu1 %v11016_v10 }
0x4481   : > { %v6939_v30 = vpop.xlane.xlu1 %6938 }
0x4482   : > { %v6940_v31 = vmul.f32 0.03125, %v6939_v30 }
0x4484   : > { %v6941_v32 = vsub.f32 %v6936_v49, %v6940_v31 }
0x4486   : > { %v6942_v33 = vmul.f32 %v6941_v32, %v6941_v32 }
0x4488   : > { %v6943_v14 = vsel %vm712_vm1, %v6942_v33, 0.0 }
0x4489   : > { %6944 = vadd.xlane.f32.xlu1 %v6943_v14 }
0x4516   : > { %v6945_v44 = vpop.xlane.xlu1 %6944 }
0x4517   : > { %v6946_v45 = vmul.f32 0.03125, %v6945_v44 }
0x4519   : > { %v6947_v27 = vadd.f32 1e-05, %v6946_v45 }
0x451b   : > { %10792 = vrsqrt.f32 %v6947_v27 }
0x4525   : > { %v10793_v46 = vpop.eup %10792 }
0x4526   : > { %v6949_v48 = vmul.f32 %v10793_v46, %v6941_v32 }
0x4528   : > { %v6956_v51 = vmul.f32 %v9415_v47, %v6949_v48 }
0x452a   : > { %v6963_v53 = vadd.f32 %v9416_v50, %v6956_v51  ;;  %v9429_v51 = vld [vmem:[%s12447_s5 + $0xa8] sm:$0xff] }
0x452c   : > { %10231 = vmatmul.mubr.msk.f32.vlgmr.msra.gmra.mrb[60].mxu0 %vm712_vm1, %v6963_v53 }
0x452d   : > { %10252 = vmatprep.mubr.msk.f32.mxu0 %vm11015_vm0, %v11016_v10  ;;  %10517 = vmatpush3.bf16.msra.mxu0 %v10516_v13 }
0x452e   : > { %10518 = vmatprep.subr.bf16.mxu0 %v11013_v4 }
0x4531   : > { %10520 = vmatpush3.bf16.msra.mxu0 %v10519_v16 }
0x4532   : > { %10265 = vmatprep.subr.mxu0 %v11016_v10 }
0x45ff   : > { %v7039_v56 = vpop.f32.mrb[60].mxu0 }
0x4600   : > { %v7040_v57 = vadd.f32 %v9417_v55, %v7039_v56  ;;  %v10232_v58 = vpop.f32.mrb[61].mxu0 }
0x4602   : > { %vm7043_vm7 = vcmp.ge.f32.partialorder %v7040_v57, 0.0  ;;  %v7044_v59 = vmul.f32 0.01, %v7040_v57 }
0x4604   : > { %v7045_v60 = vsel %vm7043_vm7, %v7040_v57, %v7044_v59  ;;  %v9428_v59 = vld [vmem:[%s12447_s5 + $0xa0] sm:$0xff] }
0x4605   : > { %10242 = vmatmul.mubr.msk.f32.vlgmr.msra.gmra.mrb[86].mxu1 %vm712_vm1, %v7045_v60 }
0x4606   : > { %10257 = vmatprep.mubr.msk.f32.mxu1 %vm11015_vm0, %v11016_v10 }
0x46d8   : > { %v7121_v63 = vpop.f32.mrb[86].mxu1 }
0x46d9   : > { %v7122_v0 = vadd.f32 %v9419_v61, %v7121_v63  ;;  %v10243_v24 = vpop.f32.mrb[87].mxu1 }
0x46db   : > { %v7125_v1 = vadd.f32 %v7122_v0, %v6963_v53 }
0x46dd   : > { %v7126_v2 = vsel %vm712_vm1, %v7125_v1, 0.0 }
0x46de   : > { %7127 = vadd.xlane.f32.xlu1 %v7126_v2 }
0x476b   : > { %v7128_v3 = vpop.xlane.xlu1 %7127 }
0x476c   : > { %v7129_v5 = vmul.f32 0.03125, %v7128_v3 }
0x476e   : > { %v7130_v6 = vsub.f32 %v7125_v1, %v7129_v5 }
0x4770   : > { %v7131_v7 = vmul.f32 %v7130_v6, %v7130_v6 }
0x4772   : > { %v7132_v8 = vsel %vm712_vm1, %v7131_v7, 0.0 }
0x4773   : > { %7133 = vadd.xlane.f32.xlu1 %v7132_v8 }
0x4800   : > { %v7134_v17 = vpop.xlane.xlu1 %7133 }
0x4801   : > { %v7135_v18 = vmul.f32 0.03125, %v7134_v17 }
0x4803   : > { %v7136_v19 = vadd.f32 1e-05, %v7135_v18 }
0x4805   : > { %10794 = vrsqrt.f32 %v7136_v19 }
0x480f   : > { %v10795_v20 = vpop.eup %10794 }
0x4810   : > { %v7138_v21 = vmul.f32 %v10795_v20, %v7130_v6 }
0x4812   : > { %v7145_v23 = vmul.f32 %v9421_v52, %v7138_v21 }
0x4814   : > { %v12101_v25 = vadd.f32 %v9422_v22, %v7145_v23 }
0x4816   : > { %10253 = vmatmul.mubr.msk.f32.vlgmr.msra.gmra.mrb[62].mxu0 %vm712_vm1, %v12101_v25 }
0x4817   : > { %10267 = vmatprep.mubr.msk.f32.mxu0 %vm11015_vm0, %v11016_v10 }
0x48e9   : > { %v7264_v28 = vpop.f32.mrb[62].mxu0 }
0x48ea   : > { %v12110_v49 = vadd.f32 %v9439_v26, %v7264_v28  ;;  %v10254_v29 = vpop.f32.mrb[63].mxu0  ;;  %v9430_v26 = vld [vmem:[%s12447_s5 + $0xb0] sm:$0xff] }
0x48ec   : > { %7435 = vrot.lane.b32.xlu0 %v12110_v49, %s12548_s29  ;;  %7269 = vrot.lane.b32.xlu1 %v12110_v49, %s12549_s30  ;;  %s9102_s30 = scalar_lea.sflag [#allocation4], %s646_s17 }
0x48f0   : > { %7433 = vrot.lane.b32.xlu0 %v12110_v49, %s12545_s19 }
0x495e   : > { %v7436_v30 = vpop.permute.xlu0 %7435  ;;  %v7270_v31 = vpop.permute.xlu1 %7269 }
0x495f   : > { %10256 = vmatpush3.xpose.msk.msra.mxu1 %vm789_vm2, %v7270_v31  ;;  %10266 = vmatpush3.xpose.msk.msra.mxu0 %vm789_vm2, %v7436_v30 }
0x4960   : > { %10260 = vmatprep.subr.mxu1 %v11016_v10  ;;  %10275 = vmatprep.subr.mxu0 %v11016_v10 }
0x4962   : > { %v7434_v32 = vpop.permute.xlu0 %7433  ;;  %10258 = vmatmul.mubr.msk.f32.vlgmr.msra.gmra.mrb[88].mxu1 %vm789_vm2, %v12110_v49 }
0x4963   : > { %10268 = vmatmul.mubr.msk.f32.vlgmr.msra.gmra.mrb[64].mxu0 %vm789_vm2, %v7434_v32  ;;  %10262 = vmatprep.mubr.msk.f32.mxu1 %vm11015_vm0, %v11016_v10 }
0x4964   : > { %10277 = vmatprep.mubr.msk.f32.mxu0 %vm11015_vm0, %v11016_v10  ;;  %10276 = vmatpush3.msra.mxu0 %v9429_v51 }
0x4965   : > { %10285 = vmatprep.subr.mxu0 %v11016_v10 }
0x4a35   : > { %v7341_v33 = vpop.f32.mrb[88].mxu1 }
0x4a36   : > { %v7345_v14 = vmul.f32 0.35355338, %v7341_v33  ;;  %v10259_v34 = vpop.f32.mrb[89].mxu1  ;;  %v7507_v35 = vpop.f32.mrb[64].mxu0 }
0x4a37   : > { %v7511_v36 = vmul.f32 0.35355338, %v7507_v35  ;;  %v10269_v38 = vpop.f32.mrb[65].mxu0 }
0x4a38   : > { %v7346_v39 = vsel %vm789_vm2, %v7345_v14, -inf }
0x4a39   : > { %7347 = vmax.xlane.f32.xlu0 %v7346_v39  ;;  %v7512_v41 = vsel %vm789_vm2, %v7511_v36, -inf }
0x4a3a   : > { %7513 = vmax.xlane.f32.xlu1 %v7512_v41  ;;  %v9431_v41 = vld [vmem:[%s12447_s5 + $0xb8] sm:$0xff] }
0x4a4b   : > { %7523 = vrot.lane.b32.xlu1 %v12110_v49, %s12546_s20  ;;  %s9502_s20 = sshll.u32 %s12551_s28, 4  ;;  %s10934_s28 = sshll.u32 %s11028_s24, 4  ;;  %s10935_s28 = int_to_ptr.vmem [resolvable:$false] %s10934_s28 }
0x4a4c   : > { %s10936_s25 = scalar_lea.vmem %s10935_s28, 32 }
0x4a4f   : > { %7747 = vrot.lane.b32.xlu1 %v12110_v49, %s12543_s2 }
0x4ac6   : > { %v7348_v62 = vpop.xlane.xlu0 %7347 }
0x4ac7   : > { %v7349_v42 = vsub.f32 %v7345_v14, %v7348_v62  ;;  %v7514_v43 = vpop.xlane.xlu1 %7513 }
0x4ac8   : > { %v7515_v44 = vsub.f32 %v7511_v36, %v7514_v43 }
0x4ac9   : > { %v7350_v45 = vmul.f32 1.442695, %v7349_v42 }
0x4aca   : > { %v7516_v27 = vmul.f32 1.442695, %v7515_v44 }
0x4acb   : > { %10796 = vpow2.f32 %v7350_v45  ;;  %v7524_v56 = vpop.permute.xlu1 %7523 }
0x4acc   : > { %10798 = vpow2.f32 %v7516_v27 }
0x4acf   : > { %v7748_v0 = vpop.permute.xlu1 %7747 }
0x4ad5   : > { %v10797_v46 = vpop.eup %10796 }
0x4ad6   : > { %v7352_v47 = vsel %vm789_vm2, %v10797_v46, 0.0  ;;  %v10799_v48 = vpop.eup %10798 }
0x4ad7   : > { %7353 = vadd.xlane.f32.xlu0 %v7352_v47  ;;  %v7518_v50 = vsel %vm789_vm2, %v10799_v48, 0.0  ;;  %v9457_v47 = vld [vmem:[%s12448_s6 + $0x5] ss:$0 sm:$0xff] }
0x4adb   : > { %7519 = vadd.xlane.f32.xlu0 %v7518_v50 }
0x4af1   : > { %7357 = vrot.lane.b32.xlu0 %v12110_v49, %s12542_s0  ;;  %s12554_s0 = sld [smem:[#allocation31_spill]] }
0x4af5   : > { %7745 = vrot.lane.b32.xlu0 %v12110_v49, %s12547_s23 }
0x4b64   : > { %v7354_v53 = vpop.xlane.xlu0 %7353 }
0x4b65   : > { %10800 = vrcp.f32 %v7354_v53 }
0x4b68   : > { %v7520_v40 = vpop.xlane.xlu0 %7519 }
0x4b69   : > { %10802 = vrcp.f32 %v7520_v40 }
0x4b6c   : > { %v7358_v11 = vpop.permute.xlu0 %7357 }
0x4b6d   : > { %10261 = vmatpush3.msra.mxu1 %v7358_v11 }
0x4b6e   : > { %10270 = vmatprep.subr.mxu1 %v11016_v10 }
0x4b6f   : > { %v10801_v54 = vpop.eup %10800 }
0x4b70   : > { %v7356_v55 = vmul.f32 %v10801_v54, %v10797_v46  ;;  %v7746_v1 = vpop.permute.xlu0 %7745 }
0x4b72   : > { %10263 = vmatmul.mubr.msk.f32.vlgmr.msra.gmra.mrb[90].mxu1 %vm789_vm2, %v7356_v55 }
0x4b73   : > { %v10803_v57 = vpop.eup %10802  ;;  %10271 = vmatpush3.msra.mxu1 %v7524_v56  ;;  %10272 = vmatprep.mubr.msk.f32.mxu1 %vm11015_vm0, %v11016_v10 }
0x4b74   : > { %v7522_v58 = vmul.f32 %v10803_v57, %v10799_v48  ;;  %10280 = vmatprep.subr.mxu1 %v11016_v10 }
0x4b76   : > { %10273 = vmatmul.mubr.msk.f32.vlgmr.msra.gmra.mrb[92].mxu1 %vm789_vm2, %v7522_v58 }
0x4b77   : > { %10282 = vmatprep.mubr.msk.f32.mxu1 %vm11015_vm0, %v11016_v10  ;;  %10281 = vmatpush3.msra.mxu1 %v9428_v59  ;;  %v7172_v59 = vld [vmem:[#allocation7 + $0xa0] sm:$0xff] }
0x4b78   : > { %10290 = vmatprep.subr.mxu1 %v11016_v10 }
0x4c45   : > { %v7429_v60 = vpop.f32.mrb[90].mxu1 }
0x4c46   : > { %v10264_v61 = vpop.f32.mrb[91].mxu1  ;;  %10283 = vmatmul.mubr.msk.f32.vlgmr.msra.gmra.mrb[94].mxu1 %vm789_vm2, %v7429_v60  ;;  %v7173_v60 = vld [vmem:[#allocation7 + $0xa8] sm:$0xff] }
0x4c47   : > { %10292 = vmatprep.mubr.msk.f32.mxu1 %vm11015_vm0, %v11016_v10  ;;  %v10522_v61 = vpack.c.bf16 %v7173_v60, %v7172_v59  ;;  %v9474_v60 = vld [vmem:[%s12457_s15 + $0x50] sm:$0xff] }
0x4c49   : > { %v7595_v63 = vpop.f32.mrb[92].mxu1 }
0x4c4a   : > { %v10274_v24 = vpop.f32.mrb[93].mxu1  ;;  %10278 = vmatmul.mubr.msk.f32.vlgmr.msra.gmra.mrb[66].mxu0 %vm789_vm2, %v7595_v63  ;;  %v7174_v63 = vld [vmem:[#allocation7 + $0xb0] sm:$0xff] }
0x4c4b   : > { %10286 = vmatpush3.xpose.msk.msra.mxu0 %vm789_vm2, %v7748_v0  ;;  %10287 = vmatprep.mubr.msk.f32.mxu0 %vm11015_vm0, %v11016_v10  ;;  %v7175_v0 = vld [vmem:[#allocation7 + $0xb8] sm:$0xff] }
0x4c4c   : > { %10295 = vmatprep.subr.mxu0 %v11016_v10  ;;  %v10525_v24 = vpack.c.bf16 %v7175_v0, %v7174_v63  ;;  %v9477_v0 = vld [vmem:[%s12457_s15 + $0x60] sm:$0xff] }
0x4c4e   : > { %10288 = vmatmul.mubr.msk.f32.vlgmr.msra.gmra.mrb[68].mxu0 %vm789_vm2, %v7746_v1  ;;  %v7180_v1 = vld [vmem:[#allocation8 + $0xa8] sm:$0xff] }
0x4c4f   : > { %10297 = vmatprep.mubr.msk.f32.mxu0 %vm11015_vm0, %v11016_v10  ;;  %10296 = vmatpush3.msra.mxu0 %v9430_v26 }
0x4c50   : > { %10305 = vmatprep.subr.mxu0 %v11016_v10 }
0x4d19   : > { %v7741_v2 = vpop.f32.mrb[94].mxu1 }
0x4d1a   : > { %v10284_v3 = vpop.f32.mrb[95].mxu1 }
0x4d1d   : > { %v7668_v5 = vpop.f32.mrb[66].mxu0 }
0x4d1e   : > { %v7742_v6 = vadd.f32 %v7741_v2, %v7668_v5  ;;  %v10279_v7 = vpop.f32.mrb[67].mxu0 }
0x4d21   : > { %v7819_v8 = vpop.f32.mrb[68].mxu0 }
0x4d22   : > { %v7823_v9 = vmul.f32 0.35355338, %v7819_v8  ;;  %v10289_v12 = vpop.f32.mrb[69].mxu0  ;;  %v9458_v8 = vld [vmem:[%s12449_s7 + $0x5] ss:$0 sm:$0xff] }
0x4d23   : > { %v9459_v12 = vld [vmem:[%s12450_s8 + $0x5] ss:$0 sm:$0xff] }
0x4d24   : > { %v7824_v13 = vsel %vm789_vm2, %v7823_v9, -inf }
0x4d25   : > { %7825 = vmax.xlane.f32.xlu1 %v7824_v13 }
0x4d36   : > { %7987 = vrot.lane.b32.xlu1 %v12110_v49, %s12544_s22 }
0x4d3a   : > { %7985 = vrot.lane.b32.xlu1 %v12110_v49, %s12539_s21  ;;  %s647_s21 = scalar_lea.vmem [#allocation10], %s646_s17 }
0x4db2   : > { %v7826_v15 = vpop.xlane.xlu1 %7825 }
0x4db3   : > { %v7827_v37 = vsub.f32 %v7823_v9, %v7826_v15 }
0x4db5   : > { %v7828_v16 = vmul.f32 1.442695, %v7827_v37  ;;  %v7181_v37 = vld [vmem:[#allocation8 + $0xb0] sm:$0xff] }
0x4db6   : > { %v7988_v21 = vpop.permute.xlu1 %7987 }
0x4db7   : > { %10804 = vpow2.f32 %v7828_v16  ;;  %v7182_v16 = vld [vmem:[#allocation8 + $0xb8] sm:$0xff] }
0x4dba   : > { %v7986_v23 = vpop.permute.xlu1 %7985 }
0x4dc1   : > { %v10805_v17 = vpop.eup %10804 }
0x4dc2   : > { %v7830_v18 = vsel %vm789_vm2, %v10805_v17, 0.0 }
0x4dc3   : > { %7831 = vadd.xlane.f32.xlu0 %v7830_v18  ;;  %v9460_v18 = vld [vmem:[%s12452_s10 + $0x5] ss:$0 sm:$0xff] }
0x4dd9   : > { %7835 = vrot.lane.b32.xlu0 %v12110_v49, %s12540_s3  ;;  %s9114_s3 = sshll.u32 %s647_s21, 4  ;;  %s12401_s3 = int_to_ptr.vmem [resolvable:$true] %s9114_s3 }
0x4dda   : > { %s10930_s9 = scalar_lea.vmem %s12401_s3, 16  ;;  %p10937_p8 = scmp.lt.s32.totalorder %s12401_s3, %s10935_s28 }
0x4ddb   : > { %p10931_p2 = scmp.ne.s32.totalorder %s12401_s3, %s10930_s9  ;;  %p10938_p11 = scmp.lt.s32.totalorder %s10936_s25, %s10930_s9 }
0x4ddd   : > { %p10932_p4 = pnand %p10931_p2, %p12556_p3  ;;  %p10939_p13 = por %p10938_p11, %p10937_p8 }
0x4ddf   : > { %p10933_p7 = pneg %p10932_p4 }
0x4de1   : > { %p10940_p1 = pnand %p10939_p13, %p10933_p7 }
0x4e50   : > { %v7832_v19 = vpop.xlane.xlu0 %7831 }
0x4e51   : > { %10806 = vrcp.f32 %v7832_v19 }
0x4e54   : > { %v7836_v20 = vpop.permute.xlu0 %7835 }
0x4e55   : > { %10291 = vmatpush3.msra.mxu1 %v7836_v20 }
0x4e56   : > { %10300 = vmatprep.subr.mxu1 %v11016_v10 }
0x4e5b   : > { %v10807_v52 = vpop.eup %10806 }
0x4e5c   : > { %v7834_v22 = vmul.f32 %v10807_v52, %v10805_v17  ;;  %v10531_v17 = vpack.c.bf16 %v7182_v16, %v7181_v37  ;;  %v9487_v37 = vld [vmem:[%s12457_s15 + $0xa0] sm:$0xff]  ;;  %v9488_v16 = vld [vmem:[%s12457_s15 + $0xa8] sm:$0xff] }
0x4e5e   : > { %10293 = vmatmul.mubr.msk.f32.vlgmr.msra.gmra.mrb[96].mxu1 %vm789_vm2, %v7834_v22 }
0x4e5f   : > { %10301 = vmatpush3.xpose.msk.msra.mxu1 %vm789_vm2, %v7988_v21  ;;  %10302 = vmatprep.mubr.msk.f32.mxu1 %vm11015_vm0, %v11016_v10 }
0x4e60   : > { %10310 = vmatprep.subr.mxu1 %v11016_v10 }
0x4e62   : > { %10303 = vmatmul.mubr.msk.f32.vlgmr.msra.gmra.mrb[98].mxu1 %vm789_vm2, %v7986_v23  ;;  %v9462_v23 = vld [vmem:[%s12454_s12 + $0x5] ss:$0 sm:$0xff] }
0x4e63   : > { %10312 = vmatprep.mubr.msk.f32.mxu1 %vm11015_vm0, %v11016_v10  ;;  %10311 = vmatpush3.msra.mxu1 %v9431_v41  ;;  %v8452_v41 = vld [vmem:[%s12457_s15 + $0x10] sm:$0xff] }
0x4e64   : > { %10527 = vmatprep.subr.bf16.mxu1 %v11013_v4 }
0x4f31   : > { %v7907_v28 = vpop.f32.mrb[96].mxu1 }
0x4f32   : > { %v10294_v29 = vpop.f32.mrb[97].mxu1  ;;  %10298 = vmatmul.mubr.msk.f32.vlgmr.msra.gmra.mrb[70].mxu0 %vm789_vm2, %v7907_v28 }
0x4f33   : > { %10307 = vmatprep.mubr.msk.f32.mxu0 %vm11015_vm0, %v11016_v10 }
0x4f35   : > { %v8059_v30 = vpop.f32.mrb[98].mxu1 }
0x4f36   : > { %v8063_v31 = vmul.f32 0.35355338, %v8059_v30  ;;  %v10304_v32 = vpop.f32.mrb[99].mxu1 }
0x4f38   : > { %v8064_v33 = vsel %vm789_vm2, %v8063_v31, -inf }
0x4f39   : > { %8065 = vmax.xlane.f32.xlu0 %v8064_v33 }
0x4f4f   : > { %8075 = vrot.lane.b32.xlu0 %v12110_v49, %s12541_s18  ;;  %s12555_s18 = sld [smem:[#allocation32_spill]] }
0x4f55   : > { %s12399_s29 = scalar_lea.hbm %s12555_s18, %s9502_s20 }
0x4fc6   : > { %v8066_v14 = vpop.xlane.xlu0 %8065 }
0x4fc7   : > { %v8067_v34 = vsub.f32 %v8063_v31, %v8066_v14 }
0x4fc9   : > { %v8068_v35 = vmul.f32 1.442695, %v8067_v34 }
0x4fca   : > { %v8076_v36 = vpop.permute.xlu0 %8075 }
0x4fcb   : > { %10808 = vpow2.f32 %v8068_v35  ;;  %10306 = vmatpush3.msra.mxu0 %v8076_v36  ;;  %v8450_v36 = vld [vmem:[%s12457_s15] sm:$0xff] }
0x4fcc   : > { %10521 = vmatprep.subr.bf16.mxu0 %v11013_v4 }
0x4fd5   : > { %v10809_v38 = vpop.eup %10808 }
0x4fd6   : > { %v8070_v39 = vsel %vm789_vm2, %v10809_v38, 0.0 }
0x4fd7   : > { %8071 = vadd.xlane.f32.xlu1 %v8070_v39 }
0x5005   : > { %v7980_v49 = vpop.f32.mrb[70].mxu0 }
0x5006   : > { %v7984_v62 = vadd.f32 %v7980_v49, %v7742_v6  ;;  %v10299_v42 = vpop.f32.mrb[71].mxu0  ;;  %v8453_v49 = vld [vmem:[%s12457_s15 + $0x18] sm:$0xff] }
0x5064   : > { %v8072_v43 = vpop.xlane.xlu1 %8071 }
0x5065   : > { %10810 = vrcp.f32 %v8072_v43 }
0x506f   : > { %v10811_v44 = vpop.eup %10810 }
0x5070   : > { %v8074_v45 = vmul.f32 %v10811_v44, %v10809_v38  ;;  %v8451_v38 = vld [vmem:[%s12457_s15 + $0x8] sm:$0xff] }
0x5071   : > { %v10534_v39 = vpack.c.bf16 %v8451_v38, %v8450_v36 }
0x5072   : > { %10308 = vmatmul.mubr.msk.f32.vlgmr.msra.gmra.mrb[72].mxu0 %vm789_vm2, %v8074_v45 }
0x5073   : > { %10323 = vmatprep.mubr.msk.f32.mxu0 %vm11015_vm0, %v11016_v10  ;;  %10523 = vmatpush3.bf16.msra.mxu0 %v10522_v61  ;;  %v9475_v61 = vld [vmem:[%s12457_s15 + $0x58] sm:$0xff] }
0x5074   : > { %10524 = vmatprep.subr.bf16.mxu0 %v11013_v4  ;;  %v10549_v63 = vpack.c.bf16 %v9475_v61, %v9474_v60 }
0x5077   : > { %10526 = vmatpush3.bf16.msra.mxu0 %v10525_v24  ;;  %v9478_v24 = vld [vmem:[%s12457_s15 + $0x68] sm:$0xff] }
0x5078   : > { %10533 = vmatprep.subr.bf16.mxu0 %v11013_v4 }
0x5145   : > { %v8147_v27 = vpop.f32.mrb[72].mxu0 }
0x5146   : > { %v10309_v46 = vpop.f32.mrb[73].mxu0  ;;  %10313 = vmatmul.mubr.msk.f32.vlgmr.msra.gmra.mrb[100].mxu1 %vm789_vm2, %v8147_v27  ;;  %v9464_v27 = vld [vmem:[%s12455_s13 + $0x5] ss:$0 sm:$0xff] }
0x5147   : > { %10334 = vmatprep.mubr.msk.f32.mxu1 %vm11015_vm0, %v11016_v10 }
0x5219   : > { %v8220_v48 = vpop.f32.mrb[100].mxu1 }
0x521a   : > { %v8224_v50 = vadd.f32 %v8220_v48, %v7984_v62  ;;  %v10314_v51 = vpop.f32.mrb[101].mxu1  ;;  %v10537_v62 = vpack.c.bf16 %v8453_v49, %v8452_v41  ;;  %v9468_v48 = vld [vmem:[%s12457_s15 + $0x28] sm:$0xff] }
0x521c   : > { %v8231_v53 = vadd.f32 %v9457_v47, %v8224_v50  ;;  %v9467_v47 = vld [vmem:[%s12457_s15 + $0x20] sm:$0xff] }
0x521d   : > { %v9465_v50 = vld [vmem:[%s12456_s14 + $0x5] ss:$0 sm:$0xff] }
0x521e   : > { %v8232_v40 = vadd.f32 %v8231_v53, %v12101_v25  ;;  %v7179_v25 = vld [vmem:[#allocation8 + $0xa0] sm:$0xff]  ;;  %v10540_v53 = vpack.c.bf16 %v9468_v48, %v9467_v47 }
0x521f   : > { %v10528_v2 = vpack.c.bf16 %v7180_v1, %v7179_v25  ;;  %v10552_v25 = vpack.c.bf16 %v9478_v24, %v9477_v0 }
0x5220   : > { %v8233_v11 = vsel %vm712_vm1, %v8232_v40, 0.0 }
0x5221   : > { %8234 = vadd.xlane.f32.xlu1 %v8233_v11  ;;  %10529 = vmatpush3.bf16.msra.mxu1 %v10528_v2  ;;  %v9469_v11 = vld [vmem:[%s12457_s15 + $0x30] sm:$0xff] }
0x5222   : > { %10530 = vmatprep.subr.bf16.mxu1 %v11013_v4  ;;  %v9479_v2 = vld [vmem:[%s12457_s15 + $0x70] sm:$0xff] }
0x5225   : > { %10532 = vmatpush3.bf16.msra.mxu1 %v10531_v17  ;;  %v10564_v17 = vpack.c.bf16 %v9488_v16, %v9487_v37 }
0x52ae   : > { %v8235_v54 = vpop.xlane.xlu1 %8234 }
0x52af   : > { %v8236_v55 = vmul.f32 0.03125, %v8235_v54  ;;  %v9470_v54 = vld [vmem:[%s12457_s15 + $0x38] sm:$0xff] }
0x52b1   : > { %v8237_v56 = vsub.f32 %v8232_v40, %v8236_v55  ;;  %v10543_v55 = vpack.c.bf16 %v9470_v54, %v9469_v11 }
0x52b3   : > { %v8238_v57 = vmul.f32 %v8237_v56, %v8237_v56 }
0x52b5   : > { %v8239_v58 = vsel %vm712_vm1, %v8238_v57, 0.0  ;;  %v9473_v57 = vld [vmem:[%s12457_s15 + $0x48] sm:$0xff] }
0x52b6   : > { %8240 = vadd.xlane.f32.xlu1 %v8239_v58 }
0x5343   : > { %v8241_v3 = vpop.xlane.xlu1 %8240 }
0x5344   : > { %v8242_v5 = vmul.f32 0.03125, %v8241_v3  ;;  %v9480_v3 = vld [vmem:[%s12457_s15 + $0x78] sm:$0xff] }
0x5346   : > { %v8243_v6 = vadd.f32 1e-05, %v8242_v5  ;;  %v10555_v5 = vpack.c.bf16 %v9480_v3, %v9479_v2 }
0x5348   : > { %10812 = vrsqrt.f32 %v8243_v6  ;;  %v9482_v6 = vld [vmem:[%s12457_s15 + $0x80] sm:$0xff] }
0x5352   : > { %v10813_v7 = vpop.eup %10812 }
0x5353   : > { %v8245_v9 = vmul.f32 %v10813_v7, %v8237_v56  ;;  %v9472_v56 = vld [vmem:[%s12457_s15 + $0x40] sm:$0xff]  ;;  %v9483_v7 = vld [vmem:[%s12457_s15 + $0x88] sm:$0xff] }
0x5354   : > { %v10546_v58 = vpack.c.bf16 %v9473_v57, %v9472_v56 }
0x5355   : > { %v8252_v13 = vmul.f32 %v9458_v8, %v8245_v9  ;;  %v10558_v8 = vpack.c.bf16 %v9483_v7, %v9482_v6 }
0x5357   : > { %v8259_v15 = vadd.f32 %v9459_v12, %v8252_v13  ;;  %v9484_v12 = vld [vmem:[%s12457_s15 + $0x90] sm:$0xff]  ;;  %v9485_v13 = vld [vmem:[%s12457_s15 + $0x98] sm:$0xff] }
0x5359   : > { %10324 = vmatmul.mubr.msk.f32.vlgmr.msra.gmra.mrb[74].mxu0 %vm712_vm1, %v8259_v15 }
0x535a   : > { %10345 = vmatprep.mubr.msk.f32.mxu0 %vm11015_vm0, %v11016_v10  ;;  %10535 = vmatpush3.bf16.msra.mxu0 %v10534_v39  ;;  %v8449_v39 = vld [vmem:[%s12458_s16] sm:$0x1] }
0x535b   : > { %10536 = vmatprep.subr.bf16.mxu0 %v11013_v4 }
0x535e   : > { %10538 = vmatpush3.bf16.msra.mxu0 %v10537_v62 }
0x535f   : > { %10539 = vmatprep.subr.bf16.mxu0 %v11013_v4 }
0x542c   : > { %v8335_v19 = vpop.f32.mrb[74].mxu0 }
0x542d   : > { %v8336_v20 = vadd.f32 %v9460_v18, %v8335_v19  ;;  %v10325_v52 = vpop.f32.mrb[75].mxu0  ;;  %v9489_v19 = vld [vmem:[%s12457_s15 + $0xb0] sm:$0xff] }
0x542f   : > { %vm8339_vm8 = vcmp.ge.f32.partialorder %v8336_v20, 0.0  ;;  %v8340_v21 = vmul.f32 0.01, %v8336_v20 }
0x5431   : > { %v8341_v22 = vsel %vm8339_vm8, %v8336_v20, %v8340_v21  ;;  %v9490_v20 = vld [vmem:[%s12457_s15 + $0xb8] sm:$0xff]  ;;  %v9492_v21 = vld [vmem:[%s12457_s15 + $0xc0] sm:$0xff] }
0x5432   : > { %10335 = vmatmul.mubr.msk.f32.vlgmr.msra.gmra.mrb[102].mxu1 %vm712_vm1, %v8341_v22  ;;  %v10567_v52 = vpack.c.bf16 %v9490_v20, %v9489_v19  ;;  %v9493_v22 = vld [vmem:[%s12457_s15 + $0xc8] sm:$0xff] }
0x5505   : > { %v8417_v26 = vpop.f32.mrb[102].mxu1 }
0x5506   : > { %v8418_v28 = vadd.f32 %v9462_v23, %v8417_v26  ;;  %v10336_v29 = vpop.f32.mrb[103].mxu1  ;;  %v10570_v23 = vpack.c.bf16 %v9493_v22, %v9492_v21 }
0x5507   : > { %v9495_v29 = vld [vmem:[%s12457_s15 + $0xd8] sm:$0xff] }
0x5508   : > { %v8421_v30 = vadd.f32 %v8418_v28, %v8259_v15  ;;  %v10561_v15 = vpack.c.bf16 %v9485_v13, %v9484_v12  ;;  %v9494_v28 = vld [vmem:[%s12457_s15 + $0xd0] sm:$0xff] }
0x550a   : > { %v8422_v31 = vsel %vm712_vm1, %v8421_v30, 0.0 }
0x550b   : > { %8423 = vadd.xlane.f32.xlu1 %v8422_v31  ;;  %v9497_v31 = vld [vmem:[%s12457_s15 + $0xe0] sm:$0xff] }
0x5598   : > { %v8424_v32 = vpop.xlane.xlu1 %8423 }
0x5599   : > { %v8425_v33 = vmul.f32 0.03125, %v8424_v32  ;;  %v9498_v32 = vld [vmem:[%s12457_s15 + $0xe8] sm:$0xff] }
0x559b   : > { %v8426_v14 = vsub.f32 %v8421_v30, %v8425_v33  ;;  %v10573_v30 = vpack.c.bf16 %v9495_v29, %v9494_v28  ;;  %v10576_v33 = vpack.c.bf16 %v9498_v32, %v9497_v31 }
0x559d   : > { %v8427_v34 = vmul.f32 %v8426_v14, %v8426_v14 }
0x559f   : > { %v8428_v35 = vsel %vm712_vm1, %v8427_v34, 0.0  ;;  %v9499_v34 = vld [vmem:[%s12457_s15 + $0xf0] sm:$0xff] }
0x55a0   : > { %8429 = vadd.xlane.f32.xlu1 %v8428_v35  ;;  %v9500_v35 = vld [vmem:[%s12457_s15 + $0xf8] sm:$0xff] }
0x55a1   : > { %v10579_v36 = vpack.c.bf16 %v9500_v35, %v9499_v34 }
0x562d   : > { %v8430_v42 = vpop.xlane.xlu1 %8429 }
0x562e   : > { %v8431_v43 = vmul.f32 0.03125, %v8430_v42 }
0x5630   : > { %v8432_v44 = vadd.f32 1e-05, %v8431_v43 }
0x5632   : > { %10814 = vrsqrt.f32 %v8432_v44 }
0x563c   : > { %v10815_v45 = vpop.eup %10814 }
0x563d   : > { %v8434_v46 = vmul.f32 %v10815_v45, %v8426_v14 }
0x563f   : > { %v8441_v51 = vmul.f32 %v9464_v27, %v8434_v46 }
0x5641   : > { %v12260_v40 = vadd.f32 %v9465_v50, %v8441_v51  ;;  %v9081_v50 = vld [vmem:[%s12553_s1] sm:$0x1] }
0x5643   : > { %10346 = vmatmul.mubr.msk.f32.vlgmr.msra.gmra.mrb[76].mxu0 %vm712_vm1, %v12260_v40  ;;  %v8533_v59 = vrot.slane %v12260_v40, 1  ;;  %v8612_v1 = vrot.slane %v12260_v40, 2  ;;  %v8691_v9 = vrot.slane %v12260_v40, 3  ;;  %v8770_v18 = vrot.slane %v12260_v40, 4 }
0x5644   : > { %10541 = vmatpush3.bf16.msra.mxu0 %v10540_v53  ;;  %10356 = vmatprep.mubr.msk.f32.mxu0 %vm11015_vm0, %v11016_v10  ;;  %v8849_v26 = vrot.slane %v12260_v40, 5  ;;  %v8928_v14 = vrot.slane %v12260_v40, 6  ;;  %v9007_v38 = vrot.slane %v12260_v40, 7  ;;  %v9082_v53 = vld [vmem:[%s12554_s0] sm:$0x1] }
0x5645   : > { %10542 = vmatprep.subr.bf16.mxu0 %v11013_v4 }
0x5648   : > { %10544 = vmatpush3.bf16.msra.mxu0 %v10543_v55 }
0x5649   : > { %10545 = vmatprep.subr.bf16.mxu0 %v11013_v4 }
0x564b   : > { %10357 = vmatmul.mubr.msk.f32.vlgmr.msra.gmra.mrb[76].mxu0 %vm712_vm1, %v8533_v59 }
0x564c   : > { %10547 = vmatpush3.bf16.msra.mxu0 %v10546_v58  ;;  %10367 = vmatprep.mubr.msk.f32.mxu0 %vm11015_vm0, %v11016_v10 }
0x564d   : > { %10548 = vmatprep.subr.bf16.mxu0 %v11013_v4 }
0x5650   : > { %10550 = vmatpush3.bf16.msra.mxu0 %v10549_v63 }
0x5651   : > { %10551 = vmatprep.subr.bf16.mxu0 %v11013_v4 }
0x5653   : > { %10368 = vmatmul.mubr.msk.f32.vlgmr.msra.gmra.mrb[76].mxu0 %vm712_vm1, %v8612_v1 }
0x5654   : > { %10553 = vmatpush3.bf16.msra.mxu0 %v10552_v25  ;;  %10378 = vmatprep.mubr.msk.f32.mxu0 %vm11015_vm0, %v11016_v10 }
0x5655   : > { %10554 = vmatprep.subr.bf16.mxu0 %v11013_v4 }
0x5658   : > { %10556 = vmatpush3.bf16.msra.mxu0 %v10555_v5 }
0x5659   : > { %10557 = vmatprep.subr.bf16.mxu0 %v11013_v4 }
0x565b   : > { %10379 = vmatmul.mubr.msk.f32.vlgmr.msra.gmra.mrb[76].mxu0 %vm712_vm1, %v8691_v9 }
0x565c   : > { %10559 = vmatpush3.bf16.msra.mxu0 %v10558_v8  ;;  %10389 = vmatprep.mubr.msk.f32.mxu0 %vm11015_vm0, %v11016_v10 }
0x565d   : > { %10560 = vmatprep.subr.bf16.mxu0 %v11013_v4 }
0x5660   : > { %10562 = vmatpush3.bf16.msra.mxu0 %v10561_v15 }
0x5661   : > { %10563 = vmatprep.subr.bf16.mxu0 %v11013_v4 }
0x5663   : > { %10390 = vmatmul.mubr.msk.f32.vlgmr.msra.gmra.mrb[76].mxu0 %vm712_vm1, %v8770_v18 }
0x5664   : > { %10565 = vmatpush3.bf16.msra.mxu0 %v10564_v17  ;;  %10400 = vmatprep.mubr.msk.f32.mxu0 %vm11015_vm0, %v11016_v10 }
0x5665   : > { %10566 = vmatprep.subr.bf16.mxu0 %v11013_v4 }
0x5668   : > { %10568 = vmatpush3.bf16.msra.mxu0 %v10567_v52 }
0x5669   : > { %10569 = vmatprep.subr.bf16.mxu0 %v11013_v4 }
0x566b   : > { %10401 = vmatmul.mubr.msk.f32.vlgmr.msra.gmra.mrb[76].mxu0 %vm712_vm1, %v8849_v26 }
0x566c   : > { %10571 = vmatpush3.bf16.msra.mxu0 %v10570_v23  ;;  %10411 = vmatprep.mubr.msk.f32.mxu0 %vm11015_vm0, %v11016_v10 }
0x566d   : > { %10572 = vmatprep.subr.bf16.mxu0 %v11013_v4 }
0x5670   : > { %10574 = vmatpush3.bf16.msra.mxu0 %v10573_v30 }
0x5671   : > { %10575 = vmatprep.subr.bf16.mxu0 %v11013_v4 }
0x5673   : > { %10412 = vmatmul.mubr.msk.f32.vlgmr.msra.gmra.mrb[76].mxu0 %vm712_vm1, %v8928_v14 }
0x5674   : > { %10577 = vmatpush3.bf16.msra.mxu0 %v10576_v33  ;;  %10422 = vmatprep.mubr.msk.f32.mxu0 %vm11015_vm0, %v11016_v10 }
0x5675   : > { %10578 = vmatprep.subr.bf16.mxu0 %v11013_v4 }
0x5678   : > { %10580 = vmatpush3.bf16.msra.mxu0 %v10579_v36 }
0x567b   : > { %10423 = vmatmul.mubr.msk.f32.vlgmr.msra.gmra.mrb[76].mxu0 %vm712_vm1, %v9007_v38 }
0x574e   : > { %v9076_v41 = vpop.f32.mrb[76].mxu0 }
0x574f   : > { %v10581_v49 = vadd.f32 %v9076_v41, %v8449_v39  ;;  %v10424_v62 = vpop.f32.mrb[77].mxu0 }
0x5751   : > { %v9084_v42 = vsel %vm9083_vm9, %v10581_v49, 0.0 }
0x5752   : > { %9085 = vadd.xlane.f32.xlu1 %v9084_v42 }
0x57df   : > { %v9086_v10 = vpop.xlane.xlu1 %9085 }
0x57e0   : > { %v9088_v4 = vmul.f32 0.0625, %v9086_v10 }
0x57e2   : > { %v9089_v43 = vsub.f32 %v10581_v49, %v9088_v4 }
0x57e4   : > { %v9090_v44 = vmul.f32 %v9089_v43, %v9089_v43 }
0x57e6   : > { %v9091_v45 = vsel %vm9083_vm9, %v9090_v44, 0.0 }
0x57e7   : > { %9092 = vadd.xlane.f32.xlu0 %v9091_v45 }
0x5874   : > { %v9093_v27 = vpop.xlane.xlu0 %9092 }
0x5875   : > { %v9094_v46 = vmul.f32 0.0625, %v9093_v27 }
0x5877   : > { %v9095_v47 = vadd.f32 1e-05, %v9094_v46 }
0x5879   : > { %10816 = vrsqrt.f32 %v9095_v47 }
0x5883   : > { %v10817_v48 = vpop.eup %10816 }
0x5884   : > { %v9097_v51 = vmul.f32 %v10817_v48, %v9089_v43 }
0x5886   : > { %v9098_v40 = vmul.f32 %v9097_v51, %v9081_v50 }
0x5888   : > { %v9099_v11 = vadd.f32 %v9098_v40, %v9082_v53 }
0x588a   : > { %9100 = vst.msk [vmem:[%s647_s21] sm:$0x1] %vm9083_vm9, %v9099_v11 }
0x588b   : > { %10943 = shalt.err (!%p10940_p1)
}
0x588c   : > { %s10944_s17 = scalar_lea.hbm %s12399_s29, 16  ;;  %s10948_s2 = scalar_lea.hbm %s12555_s18, 32 }
0x588d   : > { %p10945_p0 = scmp.ne.s32.totalorder %s12399_s29, %s10944_s17  ;;  %p10949_p9 = scmp.lt.u32.totalorder %s12399_s29, %s12555_s18 }
0x588e   : > { %p10950_p12 = scmp.lt.u32.totalorder %s10948_s2, %s10944_s17  ;;  %p10952_p2 = scmp.lt.u32.totalorder %s10944_s17, %s12399_s29 }
0x588f   : > { %p10946_p6 = pnand %p10945_p0, %p12556_p3 }
0x5890   : > { %p10951_p10 = por %p10950_p12, %p10949_p9 }
0x5891   : > { %p10947_p5 = pneg %p10946_p6 }
0x5892   : > { %p10953_p4 = por %p10952_p2, %p10951_p10 }
0x5894   : > { %p10954_p7 = pnand %p10953_p4, %p10947_p5 }
0x5896   : > { %10957 = shalt.err (!%p10954_p7)
}
0x5897   : > { %10612 = dma.vmem_to_hbm [thread:$0]  (%p12556_p3), %s12401_s3, 16, %s12399_s29, %s9102_s30  }
0x5898 PF: > { %s12557_s20 = sld [smem:[#allocation18_spill]]  ;;  %s12558_s21 = sld [smem:[#allocation15_spill]] }
0x5899   : > { %s12559_s22 = sld [smem:[#allocation23_spill]] }
0x589e   : > { %p10639_p8 = scmp.ge.s32.totalorder %s12557_s20, 2  ;;  %s9126_s23 = sand.u32 1, %s12558_s21  }
0x589f   : > { %p12560_p11 = scmp.ne.s32.totalorder %s12559_s22, 0  ;;  %s9127_s9 = scalar_lea.sflag [#allocation4], %s9126_s23 }
0x58a1   : > { %p10628_p13 = pnand %p10639_p8, %p12560_p11 }
0x58a3   : > { %10987 = dma.done.wait (!%p10628_p13), %s9127_s9, 16  }
0x58a4   : > { %10989 = vsyncadd (!%p10628_p13), %s9127_s9, 4294967280  ;;  %s12561_s21 = sld [smem:[#allocation20_spill]]  ;;  %s12562_s0 = sld [smem:[#allocation16_spill]] }
0x58a5   : > { %s12563_s30 = sld [smem:[#allocation17_spill]]  ;;  %s12564_s20 = sld [smem:[#allocation21_spill]] }
0x58aa   : > { %p32_p1 = scmp.ge.s32.totalorder %s12561_s21, 4  }
0x58ac   :  { %34 = sbr.rel (!%p32_p1) target bundleno = 16 (0x10), region = 215 }
0x58b3   :  { %9131 = vsyncpa [#allocation3], 1 }
0x58b4   :  { %9133 = vsyncpa [#allocation3 + $0x1], 1 }
0x58b5   :  { %9134 = vsyncpa [#allocation6], 1 }
0x58b6   :  { %9135 = vsyncpa [#allocation9], 1 }
0x58b7   :  { %9136 = vsyncpa [#allocation4], 1 }
0x58b8   :  { %9138 = vsyncpa [#allocation4 + $0x1], 1 }

</bundles_post_ra>
